<compile_context>
chip_gen: v7x
topology: tpu7x:2x2x1
jax: 0.10.0
libtpu: 0.0.40
codegen_flags: <defaults>
</compile_context>

<pallas_src>
from functools import partial
from math import sqrt

import jax
import jax.numpy as jnp
from jax import lax
from jax.experimental import pallas as pl
from jax.experimental.pallas import tpu as pltpu

_VMEM_LIMIT = 48 * 1024 * 1024  # fits v7x's 64 MiB with headroom; fine on v5e/v6e


# -----------------------------------------------------------------------------
# Kernel 1: RMSNorm + fused QKV projection + RoPE   (grid: B x q-tiles)
# -----------------------------------------------------------------------------
def _qkv_rope_kernel(x_ref, wqkv_ref, g1_ref, cos_ref, sina_ref, sinb_ref,
                     q_ref, k_ref, v_ref, *, eps):
    D = x_ref.shape[-1]
    x = x_ref[...]                                        # (tq, D) f32
    inv_rms = lax.rsqrt(jnp.sum(x * x, axis=-1, keepdims=True) / D + eps)
    h = (x * inv_rms * g1_ref[...]).astype(jnp.bfloat16)  # bf16 matmul operand

    # one fused (tq, D) @ (D, 3D) GEMM, f32 accumulation
    qkv = jnp.dot(h, wqkv_ref[...], preferred_element_type=jnp.float32)

    cos, sa, sb = cos_ref[...], sina_ref[...], sinb_ref[...]

    def rope(t):
        # rot[2i] = -t[2i+1], rot[2i+1] = t[2i]; signs/selection folded into sa/sb.
        nxt = pltpu.roll(t, D - 1, 1)   # nxt[j] = t[(j+1) mod D]
        prv = pltpu.roll(t, 1, 1)       # prv[j] = t[j-1]
        return t * cos + nxt * sa + prv * sb

    q_ref[...] = rope(qkv[:, 0:D]).astype(q_ref.dtype)
    k_ref[...] = rope(qkv[:, D:2 * D]).astype(k_ref.dtype)
    v_ref[...] = qkv[:, 2 * D:3 * D].astype(v_ref.dtype)


# -----------------------------------------------------------------------------
# Kernel 2: flash attention (causal, online softmax)
#           grid: B x heads x q-tiles x kv-tiles (kv innermost reduction)
# -----------------------------------------------------------------------------
def _flash_attn_kernel(q_ref, k_ref, v_ref, o_ref, m_sc, l_sc, acc_sc):
    tq, dk = q_ref.shape
    tkv = k_ref.shape[0]
    i = pl.program_id(2)
    j = pl.program_id(3)
    scale = 1.0 / sqrt(dk)

    @pl.when(j == 0)
    def _():
        m_sc[...] = jnp.full_like(m_sc, -jnp.inf)
        l_sc[...] = jnp.zeros_like(l_sc)
        acc_sc[...] = jnp.zeros_like(acc_sc)

    # Skip KV tiles that are strictly in the future of every query row of this tile.
    @pl.when(j * tkv < (i + 1) * tq)
    def _():
        s = lax.dot_general(q_ref[...], k_ref[...],
                            (((1,), (1,)), ((), ())),
                            preferred_element_type=jnp.float32) * scale    # (tq, tkv)
        # per-tile causal mask from tile indices (no (S,S) iota)
        row = i * tq + lax.broadcasted_iota(jnp.int32, (tq, tkv), 0)
        col = j * tkv + lax.broadcasted_iota(jnp.int32, (tq, tkv), 1)
        s = jnp.where(col <= row, s, -jnp.inf)

        m_prev = m_sc[...]
        m_new = jnp.maximum(m_prev, jnp.max(s, axis=-1, keepdims=True))
        alpha = jnp.exp(m_prev - m_new)
        p = jnp.exp(s - m_new)
        l_sc[...] = alpha * l_sc[...] + jnp.sum(p, axis=-1, keepdims=True)
        acc_sc[...] = alpha * acc_sc[...] + jnp.dot(
            p.astype(jnp.bfloat16), v_ref[...], preferred_element_type=jnp.float32)
        m_sc[...] = m_new

    @pl.when(j == pl.num_programs(3) - 1)
    def _():
        o_ref[...] = (acc_sc[...] *
                      pl.reciprocal(l_sc[...], approx=True)).astype(o_ref.dtype)


# -----------------------------------------------------------------------------
# Kernel 3: o_proj + residual + RMSNorm + SwiGLU FFN (tiled over F) + residual
#           grid: B x q-tiles x F-tiles (F innermost reduction)
# -----------------------------------------------------------------------------
def _oproj_ffn_kernel(x_ref, attn_ref, wo_ref, g2_ref, w1_ref, w3_ref, w2_ref,
                      o_ref, x1_sc, h2_sc, acc_sc, *, eps):
    D = x_ref.shape[-1]
    f = pl.program_id(2)

    @pl.when(f == 0)
    def _():
        # single K=D output-projection GEMM (all heads at once)
        attn_out = jnp.dot(attn_ref[...], wo_ref[...],
                           preferred_element_type=jnp.float32)
        x1 = x_ref[...] + attn_out
        x1_sc[...] = x1
        inv_rms = lax.rsqrt(jnp.sum(x1 * x1, axis=-1, keepdims=True) / D + eps)
        h2_sc[...] = (x1 * inv_rms * g2_ref[...]).astype(jnp.bfloat16)
        acc_sc[...] = jnp.zeros_like(acc_sc)

    h2 = h2_sc[...]                                                   # (tq, D) bf16
    a = jnp.dot(h2, w1_ref[...], preferred_element_type=jnp.float32)  # (tq, tf)
    b = jnp.dot(h2, w3_ref[...], preferred_element_type=jnp.float32)
    gated = (a * jax.nn.sigmoid(a)) * b                               # SiLU(a) * b
    acc_sc[...] += jnp.dot(gated.astype(jnp.bfloat16), w2_ref[...],
                           preferred_element_type=jnp.float32)        # (tq, D)

    @pl.when(f == pl.num_programs(2) - 1)
    def _():
        o_ref[...] = (x1_sc[...] + acc_sc[...]).astype(o_ref.dtype)


# -----------------------------------------------------------------------------
# RoPE tables (wrapper-side glue)
# -----------------------------------------------------------------------------
def _rope_tables(S, dk, num_heads, theta):
    half = dk // 2
    pows = 2.0 * jnp.arange(half, dtype=jnp.float32) / dk
    inv_freq = 1.0 / (theta ** pows)                              # (dk//2,)
    ang = jnp.arange(S, dtype=jnp.float32)[:, None] * inv_freq[None, :]
    cos = jnp.tile(jnp.repeat(jnp.cos(ang), 2, axis=-1), (1, num_heads))  # (S, D)
    sin = jnp.tile(jnp.repeat(jnp.sin(ang), 2, axis=-1), (1, num_heads))  # (S, D)
    even = (jnp.arange(dk * num_heads) % 2 == 0)[None, :]
    sin_a = jnp.where(even, -sin, 0.0)   # pairs with roll(t, D-1) == t[j+1]
    sin_b = jnp.where(even, 0.0, sin)    # pairs with roll(t, 1)   == t[j-1]
    return cos, sin_a, sin_b


# -----------------------------------------------------------------------------
# Wrapper
# -----------------------------------------------------------------------------
@partial(jax.jit, static_argnames=("num_heads", "theta", "eps"))
def transformer_block(x, params, *, num_heads, theta, eps=1e-5):
    B, S, D = x.shape
    dk = D // num_heads
    F = params["W1"].shape[0]
    assert D % num_heads == 0 and dk % 2 == 0
    assert S % 8 == 0, "sequence length must be a multiple of 8"
    tq = 128 if S % 128 == 0 else S
    tkv = tq
    tf = 128 if F % 128 == 0 else F
    n_q, n_kv, n_f = S // tq, S // tkv, F // tf

    # --- wrapper-side weight prep: pre-transpose to [d_in, d_out], cast to bf16 ---
    wqkv = jnp.concatenate([params["q_proj"], params["k_proj"], params["v_proj"]],
                           axis=0).T.astype(jnp.bfloat16)            # (D, 3D)
    wo = params["o_proj"].T.astype(jnp.bfloat16)                     # (D, D)
    w1 = params["W1"].T.astype(jnp.bfloat16)                         # (D, F)
    w3 = params["W3"].T.astype(jnp.bfloat16)                         # (D, F)
    w2 = params["W2"].T.astype(jnp.bfloat16)                         # (F, D)
    g1 = params["g1"].reshape(1, D).astype(jnp.float32)
    g2 = params["g2"].reshape(1, D).astype(jnp.float32)
    cos, sin_a, sin_b = _rope_tables(S, dk, num_heads, theta)

    # ----------------- kernel 1: RMSNorm + fused QKV + RoPE -------------------
    q, k, v = pl.pallas_call(
        partial(_qkv_rope_kernel, eps=eps),
        out_shape=(jax.ShapeDtypeStruct((B, S, D), jnp.bfloat16),) * 3,
        grid=(B, n_q),
        in_specs=[
            pl.BlockSpec((None, tq, D), lambda b, i: (b, i, 0)),
            pl.BlockSpec((D, 3 * D), lambda b, i: (0, 0)),
            pl.BlockSpec((1, D), lambda b, i: (0, 0)),
            pl.BlockSpec((tq, D), lambda b, i: (i, 0)),
            pl.BlockSpec((tq, D), lambda b, i: (i, 0)),
            pl.BlockSpec((tq, D), lambda b, i: (i, 0)),
        ],
        out_specs=(pl.BlockSpec((None, tq, D), lambda b, i: (b, i, 0)),) * 3,
        compiler_params=pltpu.CompilerParams(
            dimension_semantics=("parallel", "parallel"),
            vmem_limit_bytes=_VMEM_LIMIT),
    )(x, wqkv, g1, cos, sin_a, sin_b)

    # head-major layout for flash attention (pure XLA layout plumbing)
    def split_heads(t):
        return t.reshape(B, S, num_heads, dk).transpose(0, 2, 1, 3)  # (B, nh, S, dk)

    qh, kh, vh = split_heads(q), split_heads(k), split_heads(v)

    # ----------------- kernel 2: flash attention (causal) ---------------------
    attn_h = pl.pallas_call(
        _flash_attn_kernel,
        out_shape=jax.ShapeDtypeStruct((B, num_heads, S, dk), jnp.bfloat16),
        grid=(B, num_heads, n_q, n_kv),
        in_specs=[
            pl.BlockSpec((None, None, tq, dk), lambda b, h, i, j: (b, h, i, 0)),
            pl.BlockSpec((None, None, tkv, dk), lambda b, h, i, j: (b, h, j, 0)),
            pl.BlockSpec((None, None, tkv, dk), lambda b, h, i, j: (b, h, j, 0)),
        ],
        out_specs=pl.BlockSpec((None, None, tq, dk), lambda b, h, i, j: (b, h, i, 0)),
        scratch_shapes=[
            pltpu.VMEM((tq, 1), jnp.float32),   # running max m
            pltpu.VMEM((tq, 1), jnp.float32),   # running denom l
            pltpu.VMEM((tq, dk), jnp.float32),  # output accumulator
        ],
        compiler_params=pltpu.CompilerParams(
            dimension_semantics=("parallel", "parallel", "parallel", "arbitrary"),
            vmem_limit_bytes=_VMEM_LIMIT),
    )(qh, kh, vh)

    attn = attn_h.transpose(0, 2, 1, 3).reshape(B, S, D)              # (B, S, D) bf16

    # ----------------- kernel 3: o_proj + residual + RMSNorm + SwiGLU ---------
    out = pl.pallas_call(
        partial(_oproj_ffn_kernel, eps=eps),
        out_shape=jax.ShapeDtypeStruct((B, S, D), x.dtype),
        grid=(B, n_q, n_f),
        in_specs=[
            pl.BlockSpec((None, tq, D), lambda b, i, f: (b, i, 0)),   # residual x
            pl.BlockSpec((None, tq, D), lambda b, i, f: (b, i, 0)),   # attn (heads packed)
            pl.BlockSpec((D, D), lambda b, i, f: (0, 0)),             # o_proj^T
            pl.BlockSpec((1, D), lambda b, i, f: (0, 0)),             # g2
            pl.BlockSpec((D, tf), lambda b, i, f: (0, f)),            # W1^T tile
            pl.BlockSpec((D, tf), lambda b, i, f: (0, f)),            # W3^T tile
            pl.BlockSpec((tf, D), lambda b, i, f: (f, 0)),            # W2^T tile
        ],
        out_specs=pl.BlockSpec((None, tq, D), lambda b, i, f: (b, i, 0)),
        scratch_shapes=[
            pltpu.VMEM((tq, D), jnp.float32),    # x1 (post-attention residual)
            pltpu.VMEM((tq, D), jnp.bfloat16),   # normalized h2 (matmul operand)
            pltpu.VMEM((tq, D), jnp.float32),    # FFN accumulator over F tiles
        ],
        compiler_params=pltpu.CompilerParams(
            dimension_semantics=("parallel", "parallel", "arbitrary"),
            vmem_limit_bytes=_VMEM_LIMIT),
    )(x, attn, wo, g2, w1, w3, w2)

    return out


# -----------------------------------------------------------------------------
# Pure-JAX reference (f32, matches the PyTorch module) for correctness check
# -----------------------------------------------------------------------------
def _ref_transformer_block(x, params, *, num_heads, theta, eps=1e-5):
    B, S, D = x.shape
    dk = D // num_heads

    def rmsnorm(v, g):
        rms = jnp.sqrt(jnp.sum(v * v, -1, keepdims=True) / D + eps)
        return v / rms * g

    pows = 2.0 * jnp.arange(dk // 2, dtype=jnp.float32) / dk
    inv_freq = 1.0 / (theta ** pows)
    ang = jnp.arange(S, dtype=jnp.float32)[:, None] * inv_freq[None, :]
    cos = jnp.repeat(jnp.cos(ang), 2, axis=-1)
    sin = jnp.repeat(jnp.sin(ang), 2, axis=-1)

    def rope(q):  # q: (B, H, S, dk)
        q2 = q.reshape(q.shape[:-1] + (dk // 2, 2))
        rot = jnp.stack([-q2[..., 1], q2[..., 0]], axis=-1).reshape(q.shape)
        return q * cos + rot * sin

    h = rmsnorm(x, params["g1"])
    lin = lambda a, w: jnp.einsum("bsd,od->bso", a, w, precision="highest")
    split = lambda t: t.reshape(B, S, num_heads, dk).transpose(0, 2, 1, 3)
    Q, K, V = (split(lin(h, params["q_proj"])), split(lin(h, params["k_proj"])),
               split(lin(h, params["v_proj"])))
    Q, K = rope(Q), rope(K)

    scores = jnp.einsum("bhqd,bhkd->bhqk", Q, K, precision="highest") / sqrt(dk)
    causal = jnp.tril(jnp.ones((S, S), bool))
    scores = jnp.where(causal, scores, -jnp.inf)
    scores = scores - jnp.max(scores, -1, keepdims=True)
    probs = jnp.exp(scores)
    probs = probs / jnp.sum(probs, -1, keepdims=True)
    attn = jnp.einsum("bhqk,bhkd->bhqd", probs, V, precision="highest")
    attn = attn.transpose(0, 2, 1, 3).reshape(B, S, D)
    x1 = x + jnp.einsum("bsd,od->bso", attn, params["o_proj"], precision="highest")

    h2 = rmsnorm(x1, params["g2"])
    a = jnp.einsum("bsd,fd->bsf", h2, params["W1"], precision="highest")
    b = jnp.einsum("bsd,fd->bsf", h2, params["W3"], precision="highest")
    ff = jnp.einsum("bsf,df->bsd", (a * jax.nn.sigmoid(a)) * b, params["W2"],
                    precision="highest")
    return x1 + ff


# -----------------------------------------------------------------------------
# Demo
# -----------------------------------------------------------------------------
if __name__ == "__main__":
    # small but TPU-tile-aligned shapes (last dims multiples of 128 / dk even)
    B, S = 2, 256
    d_model, num_heads, d_ff = 128, 4, 256
    theta = 10000.0

    key = jax.random.PRNGKey(0)
    kx, kq, kk, kv, ko, k1, k2, k3 = jax.random.split(key, 8)

    def trunc(k, shape, std):
        return jax.random.truncated_normal(k, -3.0, 3.0, shape, jnp.float32) * std

    std_attn = sqrt(2.0 / (d_model + d_model))
    std_ffn = sqrt(2.0 / (d_model + d_ff))

    params = {
        "q_proj": trunc(kq, (d_model, d_model), std_attn),
        "k_proj": trunc(kk, (d_model, d_model), std_attn),
        "v_proj": trunc(kv, (d_model, d_model), std_attn),
        "o_proj": trunc(ko, (d_model, d_model), std_attn),
        "W1": trunc(k1, (d_ff, d_model), std_ffn),
        "W2": trunc(k2, (d_model, d_ff), std_ffn),
        "W3": trunc(k3, (d_ff, d_model), std_ffn),
        "g1": jnp.ones((d_model,), jnp.float32),
        "g2": jnp.ones((d_model,), jnp.float32),
    }

    x = jax.random.normal(kx, (B, S, d_model), jnp.float32)

    out = transformer_block(x, params, num_heads=num_heads, theta=theta)
    out = jax.block_until_ready(out)

    ref = _ref_transformer_block(x, params, num_heads=num_heads, theta=theta)
    assert out.shape == (B, S, d_model)
    # kernel uses bf16 matmul operands (f32 accumulation), so allow a few percent
    # deviation against the all-f32 reference; a structural bug would be O(1).
    err = jnp.max(jnp.abs(out - ref) / (1.0 + jnp.abs(ref)))
    assert err < 0.1, f"max normalized err {float(err)}"

    print("KERNEL_OK")
</pallas_src>

<mosaic_0001>
module attributes {stable_mosaic.version = 11 : i64} {
  func.func @_qkv_rope_kernel(%arg0: i32, %arg1: i32, %arg2: memref<1x128x128xf32, #tpu.memory_space<vmem>>, %arg3: memref<128x384xbf16, #tpu.memory_space<vmem>>, %arg4: memref<1x128xf32, #tpu.memory_space<vmem>>, %arg5: memref<128x128xf32, #tpu.memory_space<vmem>>, %arg6: memref<128x128xf32, #tpu.memory_space<vmem>>, %arg7: memref<128x128xf32, #tpu.memory_space<vmem>>, %arg8: memref<1x128x128xbf16, #tpu.memory_space<vmem>>, %arg9: memref<1x128x128xbf16, #tpu.memory_space<vmem>>, %arg10: memref<1x128x128xbf16, #tpu.memory_space<vmem>>) attributes {dimension_semantics = [#tpu.dimension_semantics<parallel>, #tpu.dimension_semantics<parallel>], iteration_bounds = array<i64: 2, 2>, scalar_prefetch = 0 : i64, scratch_operands = 0 : i64, tpu.core_type = #tpu.core_type<tc>, window_params = [{transform_indices = @transform_0, window_bounds = array<i64: 1, 128, 128>}, {pipeline_mode = #tpu.pipeline_mode<synchronous>, transform_indices = @transform_1, window_bounds = array<i64: 128, 384>}, {pipeline_mode = #tpu.pipeline_mode<synchronous>, transform_indices = @transform_2, window_bounds = array<i64: 1, 128>}, {transform_indices = @transform_3, window_bounds = array<i64: 128, 128>}, {transform_indices = @transform_4, window_bounds = array<i64: 128, 128>}, {transform_indices = @transform_5, window_bounds = array<i64: 128, 128>}, {transform_indices = @transform_6, window_bounds = array<i64: 1, 128, 128>}, {transform_indices = @transform_7, window_bounds = array<i64: 1, 128, 128>}, {transform_indices = @transform_8, window_bounds = array<i64: 1, 128, 128>}]} {
    %c0 = arith.constant 0 : index
    %c0_0 = arith.constant 0 : index
    %c0_1 = arith.constant 0 : index
    %0 = vector.load %arg2[%c0, %c0_0, %c0_1] : memref<1x128x128xf32, #tpu.memory_space<vmem>>, vector<1x128x128xf32>
    %1 = vector.shape_cast %0 : vector<1x128x128xf32> to vector<128x128xf32>
    %2 = arith.mulf %1, %1 : vector<128x128xf32>
    %cst = arith.constant dense<0.000000e+00> : vector<128xf32>
    %3 = vector.multi_reduction <add>, %2, %cst [1] : vector<128x128xf32> to vector<128xf32>
    %4 = vector.shape_cast %3 : vector<128xf32> to vector<128x1xf32>
    %cst_2 = arith.constant 1.280000e+02 : f32
    %5 = vector.broadcast %cst_2 : f32 to vector<128x1xf32>
    %6 = arith.divf %4, %5 : vector<128x1xf32>
    %cst_3 = arith.constant 9.99999974E-6 : f32
    %7 = vector.broadcast %cst_3 : f32 to vector<128x1xf32>
    %8 = arith.addf %6, %7 : vector<128x1xf32>
    %9 = math.rsqrt %8 : vector<128x1xf32>
    %10 = vector.broadcast %9 : vector<128x1xf32> to vector<128x128xf32>
    %11 = arith.mulf %1, %10 : vector<128x128xf32>
    %c0_4 = arith.constant 0 : index
    %c0_5 = arith.constant 0 : index
    %12 = vector.load %arg4[%c0_4, %c0_5] : memref<1x128xf32, #tpu.memory_space<vmem>>, vector<1x128xf32>
    %13 = vector.broadcast %12 : vector<1x128xf32> to vector<128x128xf32>
    %14 = arith.mulf %11, %13 : vector<128x128xf32>
    %15 = arith.truncf %14 : vector<128x128xf32> to vector<128x128xbf16>
    %c0_6 = arith.constant 0 : index
    %c0_7 = arith.constant 0 : index
    %16 = vector.load %arg3[%c0_6, %c0_7] : memref<128x384xbf16, #tpu.memory_space<vmem>>, vector<128x384xbf16>
    %cst_8 = arith.constant dense<0.000000e+00> : vector<128x384xf32>
    %17 = tpu.matmul %15, %16, %cst_8 {dimension_numbers = #tpu.dot_dimension_numbers<[1], [0], [0], [1], [0, 0, 1, 1], [], []>} : vector<128x128xbf16>, vector<128x384xbf16>, vector<128x384xf32> -> vector<128x384xf32>
    %c0_9 = arith.constant 0 : index
    %c0_10 = arith.constant 0 : index
    %18 = vector.load %arg5[%c0_9, %c0_10] : memref<128x128xf32, #tpu.memory_space<vmem>>, vector<128x128xf32>
    %c0_11 = arith.constant 0 : index
    %c0_12 = arith.constant 0 : index
    %19 = vector.load %arg6[%c0_11, %c0_12] : memref<128x128xf32, #tpu.memory_space<vmem>>, vector<128x128xf32>
    %c0_13 = arith.constant 0 : index
    %c0_14 = arith.constant 0 : index
    %20 = vector.load %arg7[%c0_13, %c0_14] : memref<128x128xf32, #tpu.memory_space<vmem>>, vector<128x128xf32>
    %21 = vector.extract_strided_slice %17 {offsets = [0, 0], sizes = [128, 128], strides = [1, 1]} : vector<128x384xf32> to vector<128x128xf32>
    %c127_i32 = arith.constant 127 : i32
    %22 = tpu.dynamic_rotate %21 by %c127_i32 dim 1 : vector<128x128xf32>, i32 -> vector<128x128xf32>
    %c1_i32 = arith.constant 1 : i32
    %23 = tpu.dynamic_rotate %21 by %c1_i32 dim 1 : vector<128x128xf32>, i32 -> vector<128x128xf32>
    %24 = arith.mulf %21, %18 : vector<128x128xf32>
    %25 = arith.mulf %22, %19 : vector<128x128xf32>
    %26 = arith.addf %24, %25 : vector<128x128xf32>
    %27 = arith.mulf %23, %20 : vector<128x128xf32>
    %28 = arith.addf %26, %27 : vector<128x128xf32>
    %29 = arith.truncf %28 : vector<128x128xf32> to vector<128x128xbf16>
    %c0_15 = arith.constant 0 : index
    %c0_16 = arith.constant 0 : index
    %c0_17 = arith.constant 0 : index
    %30 = vector.load %arg8[%c0_15, %c0_16, %c0_17] : memref<1x128x128xbf16, #tpu.memory_space<vmem>>, vector<1x128x128xbf16>
    %31 = vector.shape_cast %30 : vector<1x128x128xbf16> to vector<128x128xbf16>
    %32 = vector.shape_cast %29 : vector<128x128xbf16> to vector<1x128x128xbf16>
    tpu.vector_store %arg8[%c0_15, %c0_16, %c0_17], %32 {strides = array<i32>} : memref<1x128x128xbf16, #tpu.memory_space<vmem>>, vector<1x128x128xbf16>,
    %33 = vector.extract_strided_slice %17 {offsets = [0, 128], sizes = [128, 128], strides = [1, 1]} : vector<128x384xf32> to vector<128x128xf32>
    %c127_i32_18 = arith.constant 127 : i32
    %34 = tpu.dynamic_rotate %33 by %c127_i32_18 dim 1 : vector<128x128xf32>, i32 -> vector<128x128xf32>
    %c1_i32_19 = arith.constant 1 : i32
    %35 = tpu.dynamic_rotate %33 by %c1_i32_19 dim 1 : vector<128x128xf32>, i32 -> vector<128x128xf32>
    %36 = arith.mulf %33, %18 : vector<128x128xf32>
    %37 = arith.mulf %34, %19 : vector<128x128xf32>
    %38 = arith.addf %36, %37 : vector<128x128xf32>
    %39 = arith.mulf %35, %20 : vector<128x128xf32>
    %40 = arith.addf %38, %39 : vector<128x128xf32>
    %41 = arith.truncf %40 : vector<128x128xf32> to vector<128x128xbf16>
    %c0_20 = arith.constant 0 : index
    %c0_21 = arith.constant 0 : index
    %c0_22 = arith.constant 0 : index
    %42 = vector.load %arg9[%c0_20, %c0_21, %c0_22] : memref<1x128x128xbf16, #tpu.memory_space<vmem>>, vector<1x128x128xbf16>
    %43 = vector.shape_cast %42 : vector<1x128x128xbf16> to vector<128x128xbf16>
    %44 = vector.shape_cast %41 : vector<128x128xbf16> to vector<1x128x128xbf16>
    tpu.vector_store %arg9[%c0_20, %c0_21, %c0_22], %44 {strides = array<i32>} : memref<1x128x128xbf16, #tpu.memory_space<vmem>>, vector<1x128x128xbf16>,
    %45 = vector.extract_strided_slice %17 {offsets = [0, 256], sizes = [128, 128], strides = [1, 1]} : vector<128x384xf32> to vector<128x128xf32>
    %46 = arith.truncf %45 : vector<128x128xf32> to vector<128x128xbf16>
    %c0_23 = arith.constant 0 : index
    %c0_24 = arith.constant 0 : index
    %c0_25 = arith.constant 0 : index
    %47 = vector.load %arg10[%c0_23, %c0_24, %c0_25] : memref<1x128x128xbf16, #tpu.memory_space<vmem>>, vector<1x128x128xbf16>
    %48 = vector.shape_cast %47 : vector<1x128x128xbf16> to vector<128x128xbf16>
    %49 = vector.shape_cast %46 : vector<128x128xbf16> to vector<1x128x128xbf16>
    tpu.vector_store %arg10[%c0_23, %c0_24, %c0_25], %49 {strides = array<i32>} : memref<1x128x128xbf16, #tpu.memory_space<vmem>>, vector<1x128x128xbf16>,
    return
  }
  func.func @transform_0(%arg0: i32, %arg1: i32) -> (i32, i32, i32) {
    %c0_i32 = arith.constant 0 : i32
    %c0_i32_0 = arith.constant 0 : i32
    return %arg0, %arg1, %c0_i32 : i32, i32, i32
  }
  func.func @transform_1(%arg0: i32, %arg1: i32) -> (i32, i32) {
    %c0_i32 = arith.constant 0 : i32
    %c0_i32_0 = arith.constant 0 : i32
    %c0_i32_1 = arith.constant 0 : i32
    return %c0_i32, %c0_i32_0 : i32, i32
  }
  func.func @transform_2(%arg0: i32, %arg1: i32) -> (i32, i32) {
    %c0_i32 = arith.constant 0 : i32
    %c0_i32_0 = arith.constant 0 : i32
    %c0_i32_1 = arith.constant 0 : i32
    return %c0_i32, %c0_i32_0 : i32, i32
  }
  func.func @transform_3(%arg0: i32, %arg1: i32) -> (i32, i32) {
    %c0_i32 = arith.constant 0 : i32
    %c0_i32_0 = arith.constant 0 : i32
    return %arg1, %c0_i32 : i32, i32
  }
  func.func @transform_4(%arg0: i32, %arg1: i32) -> (i32, i32) {
    %c0_i32 = arith.constant 0 : i32
    %c0_i32_0 = arith.constant 0 : i32
    return %arg1, %c0_i32 : i32, i32
  }
  func.func @transform_5(%arg0: i32, %arg1: i32) -> (i32, i32) {
    %c0_i32 = arith.constant 0 : i32
    %c0_i32_0 = arith.constant 0 : i32
    return %arg1, %c0_i32 : i32, i32
  }
  func.func @transform_6(%arg0: i32, %arg1: i32) -> (i32, i32, i32) {
    %c0_i32 = arith.constant 0 : i32
    %c0_i32_0 = arith.constant 0 : i32
    return %arg0, %arg1, %c0_i32 : i32, i32, i32
  }
  func.func @transform_7(%arg0: i32, %arg1: i32) -> (i32, i32, i32) {
    %c0_i32 = arith.constant 0 : i32
    %c0_i32_0 = arith.constant 0 : i32
    return %arg0, %arg1, %c0_i32 : i32, i32, i32
  }
  func.func @transform_8(%arg0: i32, %arg1: i32) -> (i32, i32, i32) {
    %c0_i32 = arith.constant 0 : i32
    %c0_i32_0 = arith.constant 0 : i32
    return %arg0, %arg1, %c0_i32 : i32, i32, i32
  }
}

module attributes {stable_mosaic.version = 11 : i64} {
  func.func @_flash_attn_kernel(%arg0: i32, %arg1: i32, %arg2: i32, %arg3: i32, %arg4: memref<1x1x128x32xbf16, #tpu.memory_space<vmem>>, %arg5: memref<1x1x128x32xbf16, #tpu.memory_space<vmem>>, %arg6: memref<1x1x128x32xbf16, #tpu.memory_space<vmem>>, %arg7: memref<1x1x128x32xbf16, #tpu.memory_space<vmem>>, %arg8: memref<128x1xf32, #tpu.memory_space<vmem>>, %arg9: memref<128x1xf32, #tpu.memory_space<vmem>>, %arg10: memref<128x32xf32, #tpu.memory_space<vmem>>) attributes {dimension_semantics = [#tpu.dimension_semantics<parallel>, #tpu.dimension_semantics<parallel>, #tpu.dimension_semantics<parallel>, #tpu.dimension_semantics<arbitrary>], iteration_bounds = array<i64: 2, 4, 2, 2>, scalar_prefetch = 0 : i64, scratch_operands = 3 : i64, tpu.core_type = #tpu.core_type<tc>, window_params = [{transform_indices = @transform_0, window_bounds = array<i64: 1, 1, 128, 32>}, {transform_indices = @transform_1, window_bounds = array<i64: 1, 1, 128, 32>}, {transform_indices = @transform_2, window_bounds = array<i64: 1, 1, 128, 32>}, {transform_indices = @transform_3, window_bounds = array<i64: 1, 1, 128, 32>}]} {
    %c0_i32 = arith.constant 0 : i32
    %0 = arith.cmpi eq, %arg3, %c0_i32 : i32
    %1 = arith.extui %0 : i1 to i32
    %c0_i32_0 = arith.constant 0 : i32
    %2 = arith.cmpi ne, %1, %c0_i32_0 : i32
    scf.if %2 {
      %cst = arith.constant 0xFF800000 : f32
      %12 = vector.broadcast %cst : f32 to vector<128x1xf32>
      %c0 = arith.constant 0 : index
      %c0_5 = arith.constant 0 : index
      %13 = vector.load %arg8[%c0, %c0_5] : memref<128x1xf32, #tpu.memory_space<vmem>>, vector<128x1xf32>
      tpu.vector_store %arg8[%c0, %c0_5], %12 {strides = array<i32>} : memref<128x1xf32, #tpu.memory_space<vmem>>, vector<128x1xf32>,
      %cst_6 = arith.constant 0.000000e+00 : f32
      %14 = vector.broadcast %cst_6 : f32 to vector<128x1xf32>
      %c0_7 = arith.constant 0 : index
      %c0_8 = arith.constant 0 : index
      %15 = vector.load %arg9[%c0_7, %c0_8] : memref<128x1xf32, #tpu.memory_space<vmem>>, vector<128x1xf32>
      tpu.vector_store %arg9[%c0_7, %c0_8], %14 {strides = array<i32>} : memref<128x1xf32, #tpu.memory_space<vmem>>, vector<128x1xf32>,
      %cst_9 = arith.constant 0.000000e+00 : f32
      %16 = vector.broadcast %cst_9 : f32 to vector<128x32xf32>
      %c0_10 = arith.constant 0 : index
      %c0_11 = arith.constant 0 : index
      %17 = vector.load %arg10[%c0_10, %c0_11] : memref<128x32xf32, #tpu.memory_space<vmem>>, vector<128x32xf32>
      tpu.vector_store %arg10[%c0_10, %c0_11], %16 {strides = array<i32>} : memref<128x32xf32, #tpu.memory_space<vmem>>, vector<128x32xf32>,
    } else {
    }
    %c128_i32 = arith.constant 128 : i32
    %3 = arith.muli %arg3, %c128_i32 : i32
    %c1_i32 = arith.constant 1 : i32
    %4 = arith.addi %arg2, %c1_i32 : i32
    %c128_i32_1 = arith.constant 128 : i32
    %5 = arith.muli %4, %c128_i32_1 : i32
    %6 = arith.cmpi slt, %3, %5 : i32
    %7 = arith.extui %6 : i1 to i32
    %c0_i32_2 = arith.constant 0 : i32
    %8 = arith.cmpi ne, %7, %c0_i32_2 : i32
    scf.if %8 {
      %c0 = arith.constant 0 : index
      %c0_5 = arith.constant 0 : index
      %c0_6 = arith.constant 0 : index
      %c0_7 = arith.constant 0 : index
      %12 = vector.load %arg4[%c0, %c0_5, %c0_6, %c0_7] : memref<1x1x128x32xbf16, #tpu.memory_space<vmem>>, vector<1x1x128x32xbf16>
      %13 = vector.shape_cast %12 : vector<1x1x128x32xbf16> to vector<128x32xbf16>
      %c0_8 = arith.constant 0 : index
      %c0_9 = arith.constant 0 : index
      %c0_10 = arith.constant 0 : index
      %c0_11 = arith.constant 0 : index
      %14 = vector.load %arg5[%c0_8, %c0_9, %c0_10, %c0_11] : memref<1x1x128x32xbf16, #tpu.memory_space<vmem>>, vector<1x1x128x32xbf16>
      %15 = vector.shape_cast %14 : vector<1x1x128x32xbf16> to vector<128x32xbf16>
      %cst = arith.constant dense<0.000000e+00> : vector<128x128xf32>
      %16 = tpu.matmul %13, %15, %cst {dimension_numbers = #tpu.dot_dimension_numbers<[1], [1], [0], [0], [0, 0, 1, 0], [], []>} : vector<128x32xbf16>, vector<128x32xbf16>, vector<128x128xf32> -> vector<128x128xf32>
      %cst_12 = arith.constant 0.176776692 : f32
      %17 = vector.broadcast %cst_12 : f32 to vector<128x128xf32>
      %18 = arith.mulf %16, %17 : vector<128x128xf32>
      %c128_i32_13 = arith.constant 128 : i32
      %19 = arith.muli %arg2, %c128_i32_13 : i32
      %20 = tpu.iota {dimensions = array<i32: 0>} : vector<128x128xi32>
      %21 = vector.broadcast %19 : i32 to vector<128x128xi32>
      %22 = arith.addi %21, %20 : vector<128x128xi32>
      %c128_i32_14 = arith.constant 128 : i32
      %23 = arith.muli %arg3, %c128_i32_14 : i32
      %24 = tpu.iota {dimensions = array<i32: 1>} : vector<128x128xi32>
      %25 = vector.broadcast %23 : i32 to vector<128x128xi32>
      %26 = arith.addi %25, %24 : vector<128x128xi32>
      %27 = arith.cmpi sle, %26, %22 : vector<128x128xi32>
      %cst_15 = arith.constant 0xFF800000 : f32
      %28 = vector.broadcast %cst_15 : f32 to vector<128x128xf32>
      %29 = arith.select %27, %18, %28 : vector<128x128xi1>, vector<128x128xf32>
      %c0_16 = arith.constant 0 : index
      %c0_17 = arith.constant 0 : index
      %30 = vector.load %arg8[%c0_16, %c0_17] : memref<128x1xf32, #tpu.memory_space<vmem>>, vector<128x1xf32>
      %cst_18 = arith.constant dense<0xFF800000> : vector<128xf32>
      %31 = vector.multi_reduction <maximumf>, %29, %cst_18 [1] : vector<128x128xf32> to vector<128xf32>
      %32 = vector.shape_cast %31 : vector<128xf32> to vector<128x1xf32>
      %33 = arith.maximumf %30, %32 : vector<128x1xf32>
      %34 = arith.subf %30, %33 : vector<128x1xf32>
      %35 = math.exp %34 : vector<128x1xf32>
      %36 = vector.broadcast %33 : vector<128x1xf32> to vector<128x128xf32>
      %37 = arith.subf %29, %36 : vector<128x128xf32>
      %38 = math.exp %37 : vector<128x128xf32>
      %c0_19 = arith.constant 0 : index
      %c0_20 = arith.constant 0 : index
      %39 = vector.load %arg9[%c0_19, %c0_20] : memref<128x1xf32, #tpu.memory_space<vmem>>, vector<128x1xf32>
      %40 = arith.mulf %35, %39 : vector<128x1xf32>
      %cst_21 = arith.constant dense<0.000000e+00> : vector<128xf32>
      %41 = vector.multi_reduction <add>, %38, %cst_21 [1] : vector<128x128xf32> to vector<128xf32>
      %42 = vector.shape_cast %41 : vector<128xf32> to vector<128x1xf32>
      %43 = arith.addf %40, %42 : vector<128x1xf32>
      %c0_22 = arith.constant 0 : index
      %c0_23 = arith.constant 0 : index
      %44 = vector.load %arg9[%c0_22, %c0_23] : memref<128x1xf32, #tpu.memory_space<vmem>>, vector<128x1xf32>
      tpu.vector_store %arg9[%c0_22, %c0_23], %43 {strides = array<i32>} : memref<128x1xf32, #tpu.memory_space<vmem>>, vector<128x1xf32>,
      %c0_24 = arith.constant 0 : index
      %c0_25 = arith.constant 0 : index
      %45 = vector.load %arg10[%c0_24, %c0_25] : memref<128x32xf32, #tpu.memory_space<vmem>>, vector<128x32xf32>
      %46 = vector.broadcast %35 : vector<128x1xf32> to vector<128x32xf32>
      %47 = arith.mulf %46, %45 : vector<128x32xf32>
      %48 = arith.truncf %38 : vector<128x128xf32> to vector<128x128xbf16>
      %c0_26 = arith.constant 0 : index
      %c0_27 = arith.constant 0 : index
      %c0_28 = arith.constant 0 : index
      %c0_29 = arith.constant 0 : index
      %49 = vector.load %arg6[%c0_26, %c0_27, %c0_28, %c0_29] : memref<1x1x128x32xbf16, #tpu.memory_space<vmem>>, vector<1x1x128x32xbf16>
      %50 = vector.shape_cast %49 : vector<1x1x128x32xbf16> to vector<128x32xbf16>
      %cst_30 = arith.constant dense<0.000000e+00> : vector<128x32xf32>
      %51 = tpu.matmul %48, %50, %cst_30 {dimension_numbers = #tpu.dot_dimension_numbers<[1], [0], [0], [1], [0, 0, 1, 1], [], []>} : vector<128x128xbf16>, vector<128x32xbf16>, vector<128x32xf32> -> vector<128x32xf32>
      %52 = arith.addf %47, %51 : vector<128x32xf32>
      %c0_31 = arith.constant 0 : index
      %c0_32 = arith.constant 0 : index
      %53 = vector.load %arg10[%c0_31, %c0_32] : memref<128x32xf32, #tpu.memory_space<vmem>>, vector<128x32xf32>
      tpu.vector_store %arg10[%c0_31, %c0_32], %52 {strides = array<i32>} : memref<128x32xf32, #tpu.memory_space<vmem>>, vector<128x32xf32>,
      %c0_33 = arith.constant 0 : index
      %c0_34 = arith.constant 0 : index
      %54 = vector.load %arg8[%c0_33, %c0_34] : memref<128x1xf32, #tpu.memory_space<vmem>>, vector<128x1xf32>
      tpu.vector_store %arg8[%c0_33, %c0_34], %33 {strides = array<i32>} : memref<128x1xf32, #tpu.memory_space<vmem>>, vector<128x1xf32>,
    } else {
    }
    %c1_i32_3 = arith.constant 1 : i32
    %9 = arith.cmpi eq, %arg3, %c1_i32_3 : i32
    %10 = arith.extui %9 : i1 to i32
    %c0_i32_4 = arith.constant 0 : i32
    %11 = arith.cmpi ne, %10, %c0_i32_4 : i32
    scf.if %11 {
      %c0 = arith.constant 0 : index
      %c0_5 = arith.constant 0 : index
      %12 = vector.load %arg10[%c0, %c0_5] : memref<128x32xf32, #tpu.memory_space<vmem>>, vector<128x32xf32>
      %c0_6 = arith.constant 0 : index
      %c0_7 = arith.constant 0 : index
      %13 = vector.load %arg9[%c0_6, %c0_7] : memref<128x1xf32, #tpu.memory_space<vmem>>, vector<128x1xf32>
      %14 = tpu.reciprocal %13 {approx = true} : vector<128x1xf32> -> vector<128x1xf32>
      %15 = vector.broadcast %14 : vector<128x1xf32> to vector<128x32xf32>
      %16 = arith.mulf %12, %15 : vector<128x32xf32>
      %17 = arith.truncf %16 : vector<128x32xf32> to vector<128x32xbf16>
      %c0_8 = arith.constant 0 : index
      %c0_9 = arith.constant 0 : index
      %c0_10 = arith.constant 0 : index
      %c0_11 = arith.constant 0 : index
      %18 = vector.load %arg7[%c0_8, %c0_9, %c0_10, %c0_11] : memref<1x1x128x32xbf16, #tpu.memory_space<vmem>>, vector<1x1x128x32xbf16>
      %19 = vector.shape_cast %18 : vector<1x1x128x32xbf16> to vector<128x32xbf16>
      %20 = vector.shape_cast %17 : vector<128x32xbf16> to vector<1x1x128x32xbf16>
      tpu.vector_store %arg7[%c0_8, %c0_9, %c0_10, %c0_11], %20 {strides = array<i32>} : memref<1x1x128x32xbf16, #tpu.memory_space<vmem>>, vector<1x1x128x32xbf16>,
    } else {
    }
    return
  }
  func.func @transform_0(%arg0: i32, %arg1: i32, %arg2: i32, %arg3: i32) -> (i32, i32, i32, i32) {
    %c0_i32 = arith.constant 0 : i32
    %c0_i32_0 = arith.constant 0 : i32
    return %arg0, %arg1, %arg2, %c0_i32 : i32, i32, i32, i32
  }
  func.func @transform_1(%arg0: i32, %arg1: i32, %arg2: i32, %arg3: i32) -> (i32, i32, i32, i32) {
    %c0_i32 = arith.constant 0 : i32
    %c0_i32_0 = arith.constant 0 : i32
    return %arg0, %arg1, %arg3, %c0_i32 : i32, i32, i32, i32
  }
  func.func @transform_2(%arg0: i32, %arg1: i32, %arg2: i32, %arg3: i32) -> (i32, i32, i32, i32) {
    %c0_i32 = arith.constant 0 : i32
    %c0_i32_0 = arith.constant 0 : i32
    return %arg0, %arg1, %arg3, %c0_i32 : i32, i32, i32, i32
  }
  func.func @transform_3(%arg0: i32, %arg1: i32, %arg2: i32, %arg3: i32) -> (i32, i32, i32, i32) {
    %c0_i32 = arith.constant 0 : i32
    %c0_i32_0 = arith.constant 0 : i32
    return %arg0, %arg1, %arg2, %c0_i32 : i32, i32, i32, i32
  }
}

module attributes {stable_mosaic.version = 11 : i64} {
  func.func @_oproj_ffn_kernel(%arg0: i32, %arg1: i32, %arg2: i32, %arg3: memref<1x128x128xf32, #tpu.memory_space<vmem>>, %arg4: memref<1x128x128xbf16, #tpu.memory_space<vmem>>, %arg5: memref<128x128xbf16, #tpu.memory_space<vmem>>, %arg6: memref<1x128xf32, #tpu.memory_space<vmem>>, %arg7: memref<128x128xbf16, #tpu.memory_space<vmem>>, %arg8: memref<128x128xbf16, #tpu.memory_space<vmem>>, %arg9: memref<128x128xbf16, #tpu.memory_space<vmem>>, %arg10: memref<1x128x128xf32, #tpu.memory_space<vmem>>, %arg11: memref<128x128xf32, #tpu.memory_space<vmem>>, %arg12: memref<128x128xbf16, #tpu.memory_space<vmem>>, %arg13: memref<128x128xf32, #tpu.memory_space<vmem>>) attributes {dimension_semantics = [#tpu.dimension_semantics<parallel>, #tpu.dimension_semantics<parallel>, #tpu.dimension_semantics<arbitrary>], iteration_bounds = array<i64: 2, 2, 2>, scalar_prefetch = 0 : i64, scratch_operands = 3 : i64, tpu.core_type = #tpu.core_type<tc>, window_params = [{transform_indices = @transform_0, window_bounds = array<i64: 1, 128, 128>}, {transform_indices = @transform_1, window_bounds = array<i64: 1, 128, 128>}, {pipeline_mode = #tpu.pipeline_mode<synchronous>, transform_indices = @transform_2, window_bounds = array<i64: 128, 128>}, {pipeline_mode = #tpu.pipeline_mode<synchronous>, transform_indices = @transform_3, window_bounds = array<i64: 1, 128>}, {transform_indices = @transform_4, window_bounds = array<i64: 128, 128>}, {transform_indices = @transform_5, window_bounds = array<i64: 128, 128>}, {transform_indices = @transform_6, window_bounds = array<i64: 128, 128>}, {transform_indices = @transform_7, window_bounds = array<i64: 1, 128, 128>}]} {
    %c0_i32 = arith.constant 0 : i32
    %0 = arith.cmpi eq, %arg2, %c0_i32 : i32
    %1 = arith.extui %0 : i1 to i32
    %c0_i32_0 = arith.constant 0 : i32
    %2 = arith.cmpi ne, %1, %c0_i32_0 : i32
    scf.if %2 {
      %c0_16 = arith.constant 0 : index
      %c0_17 = arith.constant 0 : index
      %c0_18 = arith.constant 0 : index
      %24 = vector.load %arg4[%c0_16, %c0_17, %c0_18] : memref<1x128x128xbf16, #tpu.memory_space<vmem>>, vector<1x128x128xbf16>
      %25 = vector.shape_cast %24 : vector<1x128x128xbf16> to vector<128x128xbf16>
      %c0_19 = arith.constant 0 : index
      %c0_20 = arith.constant 0 : index
      %26 = vector.load %arg5[%c0_19, %c0_20] : memref<128x128xbf16, #tpu.memory_space<vmem>>, vector<128x128xbf16>
      %cst_21 = arith.constant dense<0.000000e+00> : vector<128x128xf32>
      %27 = tpu.matmul %25, %26, %cst_21 {dimension_numbers = #tpu.dot_dimension_numbers<[1], [0], [0], [1], [0, 0, 1, 1], [], []>} : vector<128x128xbf16>, vector<128x128xbf16>, vector<128x128xf32> -> vector<128x128xf32>
      %c0_22 = arith.constant 0 : index
      %c0_23 = arith.constant 0 : index
      %c0_24 = arith.constant 0 : index
      %28 = vector.load %arg3[%c0_22, %c0_23, %c0_24] : memref<1x128x128xf32, #tpu.memory_space<vmem>>, vector<1x128x128xf32>
      %29 = vector.shape_cast %28 : vector<1x128x128xf32> to vector<128x128xf32>
      %30 = arith.addf %29, %27 : vector<128x128xf32>
      %c0_25 = arith.constant 0 : index
      %c0_26 = arith.constant 0 : index
      %31 = vector.load %arg11[%c0_25, %c0_26] : memref<128x128xf32, #tpu.memory_space<vmem>>, vector<128x128xf32>
      tpu.vector_store %arg11[%c0_25, %c0_26], %30 {strides = array<i32>} : memref<128x128xf32, #tpu.memory_space<vmem>>, vector<128x128xf32>,
      %32 = arith.mulf %30, %30 : vector<128x128xf32>
      %cst_27 = arith.constant dense<0.000000e+00> : vector<128xf32>
      %33 = vector.multi_reduction <add>, %32, %cst_27 [1] : vector<128x128xf32> to vector<128xf32>
      %34 = vector.shape_cast %33 : vector<128xf32> to vector<128x1xf32>
      %cst_28 = arith.constant 1.280000e+02 : f32
      %35 = vector.broadcast %cst_28 : f32 to vector<128x1xf32>
      %36 = arith.divf %34, %35 : vector<128x1xf32>
      %cst_29 = arith.constant 9.99999974E-6 : f32
      %37 = vector.broadcast %cst_29 : f32 to vector<128x1xf32>
      %38 = arith.addf %36, %37 : vector<128x1xf32>
      %39 = math.rsqrt %38 : vector<128x1xf32>
      %40 = vector.broadcast %39 : vector<128x1xf32> to vector<128x128xf32>
      %41 = arith.mulf %30, %40 : vector<128x128xf32>
      %c0_30 = arith.constant 0 : index
      %c0_31 = arith.constant 0 : index
      %42 = vector.load %arg6[%c0_30, %c0_31] : memref<1x128xf32, #tpu.memory_space<vmem>>, vector<1x128xf32>
      %43 = vector.broadcast %42 : vector<1x128xf32> to vector<128x128xf32>
      %44 = arith.mulf %41, %43 : vector<128x128xf32>
      %45 = arith.truncf %44 : vector<128x128xf32> to vector<128x128xbf16>
      %c0_32 = arith.constant 0 : index
      %c0_33 = arith.constant 0 : index
      %46 = vector.load %arg12[%c0_32, %c0_33] : memref<128x128xbf16, #tpu.memory_space<vmem>>, vector<128x128xbf16>
      tpu.vector_store %arg12[%c0_32, %c0_33], %45 {strides = array<i32>} : memref<128x128xbf16, #tpu.memory_space<vmem>>, vector<128x128xbf16>,
      %cst_34 = arith.constant 0.000000e+00 : f32
      %47 = vector.broadcast %cst_34 : f32 to vector<128x128xf32>
      %c0_35 = arith.constant 0 : index
      %c0_36 = arith.constant 0 : index
      %48 = vector.load %arg13[%c0_35, %c0_36] : memref<128x128xf32, #tpu.memory_space<vmem>>, vector<128x128xf32>
      tpu.vector_store %arg13[%c0_35, %c0_36], %47 {strides = array<i32>} : memref<128x128xf32, #tpu.memory_space<vmem>>, vector<128x128xf32>,
    } else {
    }
    %c0 = arith.constant 0 : index
    %c0_1 = arith.constant 0 : index
    %3 = vector.load %arg12[%c0, %c0_1] : memref<128x128xbf16, #tpu.memory_space<vmem>>, vector<128x128xbf16>
    %c0_2 = arith.constant 0 : index
    %c0_3 = arith.constant 0 : index
    %4 = vector.load %arg7[%c0_2, %c0_3] : memref<128x128xbf16, #tpu.memory_space<vmem>>, vector<128x128xbf16>
    %cst = arith.constant dense<0.000000e+00> : vector<128x128xf32>
    %5 = tpu.matmul %3, %4, %cst {dimension_numbers = #tpu.dot_dimension_numbers<[1], [0], [0], [1], [0, 0, 1, 1], [], []>} : vector<128x128xbf16>, vector<128x128xbf16>, vector<128x128xf32> -> vector<128x128xf32>
    %c0_4 = arith.constant 0 : index
    %c0_5 = arith.constant 0 : index
    %6 = vector.load %arg8[%c0_4, %c0_5] : memref<128x128xbf16, #tpu.memory_space<vmem>>, vector<128x128xbf16>
    %cst_6 = arith.constant dense<0.000000e+00> : vector<128x128xf32>
    %7 = tpu.matmul %3, %6, %cst_6 {dimension_numbers = #tpu.dot_dimension_numbers<[1], [0], [0], [1], [0, 0, 1, 1], [], []>} : vector<128x128xbf16>, vector<128x128xbf16>, vector<128x128xf32> -> vector<128x128xf32>
    %8 = arith.negf %5 : vector<128x128xf32>
    %9 = math.exp %8 : vector<128x128xf32>
    %cst_7 = arith.constant 1.000000e+00 : f32
    %10 = vector.broadcast %cst_7 : f32 to vector<128x128xf32>
    %11 = arith.addf %10, %9 : vector<128x128xf32>
    %12 = arith.divf %10, %11 : vector<128x128xf32>
    %13 = arith.mulf %5, %12 : vector<128x128xf32>
    %14 = arith.mulf %13, %7 : vector<128x128xf32>
    %c0_8 = arith.constant 0 : index
    %c0_9 = arith.constant 0 : index
    %15 = vector.load %arg13[%c0_8, %c0_9] : memref<128x128xf32, #tpu.memory_space<vmem>>, vector<128x128xf32>
    %16 = arith.truncf %14 : vector<128x128xf32> to vector<128x128xbf16>
    %c0_10 = arith.constant 0 : index
    %c0_11 = arith.constant 0 : index
    %17 = vector.load %arg9[%c0_10, %c0_11] : memref<128x128xbf16, #tpu.memory_space<vmem>>, vector<128x128xbf16>
    %cst_12 = arith.constant dense<0.000000e+00> : vector<128x128xf32>
    %18 = tpu.matmul %16, %17, %cst_12 {dimension_numbers = #tpu.dot_dimension_numbers<[1], [0], [0], [1], [0, 0, 1, 1], [], []>} : vector<128x128xbf16>, vector<128x128xbf16>, vector<128x128xf32> -> vector<128x128xf32>
    %19 = arith.addf %15, %18 : vector<128x128xf32>
    %c0_13 = arith.constant 0 : index
    %c0_14 = arith.constant 0 : index
    %20 = vector.load %arg13[%c0_13, %c0_14] : memref<128x128xf32, #tpu.memory_space<vmem>>, vector<128x128xf32>
    tpu.vector_store %arg13[%c0_13, %c0_14], %19 {strides = array<i32>} : memref<128x128xf32, #tpu.memory_space<vmem>>, vector<128x128xf32>,
    %c1_i32 = arith.constant 1 : i32
    %21 = arith.cmpi eq, %arg2, %c1_i32 : i32
    %22 = arith.extui %21 : i1 to i32
    %c0_i32_15 = arith.constant 0 : i32
    %23 = arith.cmpi ne, %22, %c0_i32_15 : i32
    scf.if %23 {
      %c0_16 = arith.constant 0 : index
      %c0_17 = arith.constant 0 : index
      %24 = vector.load %arg11[%c0_16, %c0_17] : memref<128x128xf32, #tpu.memory_space<vmem>>, vector<128x128xf32>
      %c0_18 = arith.constant 0 : index
      %c0_19 = arith.constant 0 : index
      %25 = vector.load %arg13[%c0_18, %c0_19] : memref<128x128xf32, #tpu.memory_space<vmem>>, vector<128x128xf32>
      %26 = arith.addf %24, %25 : vector<128x128xf32>
      %c0_20 = arith.constant 0 : index
      %c0_21 = arith.constant 0 : index
      %c0_22 = arith.constant 0 : index
      %27 = vector.load %arg10[%c0_20, %c0_21, %c0_22] : memref<1x128x128xf32, #tpu.memory_space<vmem>>, vector<1x128x128xf32>
      %28 = vector.shape_cast %27 : vector<1x128x128xf32> to vector<128x128xf32>
      %29 = vector.shape_cast %26 : vector<128x128xf32> to vector<1x128x128xf32>
      tpu.vector_store %arg10[%c0_20, %c0_21, %c0_22], %29 {strides = array<i32>} : memref<1x128x128xf32, #tpu.memory_space<vmem>>, vector<1x128x128xf32>,
    } else {
    }
    return
  }
  func.func @transform_0(%arg0: i32, %arg1: i32, %arg2: i32) -> (i32, i32, i32) {
    %c0_i32 = arith.constant 0 : i32
    %c0_i32_0 = arith.constant 0 : i32
    return %arg0, %arg1, %c0_i32 : i32, i32, i32
  }
  func.func @transform_1(%arg0: i32, %arg1: i32, %arg2: i32) -> (i32, i32, i32) {
    %c0_i32 = arith.constant 0 : i32
    %c0_i32_0 = arith.constant 0 : i32
    return %arg0, %arg1, %c0_i32 : i32, i32, i32
  }
  func.func @transform_2(%arg0: i32, %arg1: i32, %arg2: i32) -> (i32, i32) {
    %c0_i32 = arith.constant 0 : i32
    %c0_i32_0 = arith.constant 0 : i32
    %c0_i32_1 = arith.constant 0 : i32
    return %c0_i32, %c0_i32_0 : i32, i32
  }
  func.func @transform_3(%arg0: i32, %arg1: i32, %arg2: i32) -> (i32, i32) {
    %c0_i32 = arith.constant 0 : i32
    %c0_i32_0 = arith.constant 0 : i32
    %c0_i32_1 = arith.constant 0 : i32
    return %c0_i32, %c0_i32_0 : i32, i32
  }
  func.func @transform_4(%arg0: i32, %arg1: i32, %arg2: i32) -> (i32, i32) {
    %c0_i32 = arith.constant 0 : i32
    %c0_i32_0 = arith.constant 0 : i32
    return %c0_i32, %arg2 : i32, i32
  }
  func.func @transform_5(%arg0: i32, %arg1: i32, %arg2: i32) -> (i32, i32) {
    %c0_i32 = arith.constant 0 : i32
    %c0_i32_0 = arith.constant 0 : i32
    return %c0_i32, %arg2 : i32, i32
  }
  func.func @transform_6(%arg0: i32, %arg1: i32, %arg2: i32) -> (i32, i32) {
    %c0_i32 = arith.constant 0 : i32
    %c0_i32_0 = arith.constant 0 : i32
    return %arg2, %c0_i32 : i32, i32
  }
  func.func @transform_7(%arg0: i32, %arg1: i32, %arg2: i32) -> (i32, i32, i32) {
    %c0_i32 = arith.constant 0 : i32
    %c0_i32_0 = arith.constant 0 : i32
    return %arg0, %arg1, %c0_i32 : i32, i32, i32
  }
}

</mosaic_0001>

<bundles_post_ra>
// kernel: transformer_block.4
= control target key start
LH: loop header
LB: loop body
LE: loop exit
PB: predicated region body
PF: predicated region fallthrough
CT: control target
= control target key end

     0   :  { %s2317_s12 = smov 0   ;;  %s2319_s13 = smov 0   ;;  %s2983_s0 = inlined_call_operand.vmem [shape: bf16[2,4,256,32], index: 0, kind: input, shape index: {}]   ;;  %s2984_s1 = inlined_call_operand.vmem [shape: bf16[2,4,256,32], index: 1, kind: input, shape index: {}]   ;;  %s2985_s2 = inlined_call_operand.vmem [shape: bf16[2,4,256,32], index: 2, kind: input, shape index: {}]   ;;  %s2986_s3 = inlined_call_operand.vmem [shape: bf16[2,4,256,32], index: 3, kind: output, shape index: {}]  }
   0x1   :  { %s2321_s14 = smov 0   ;;  %s2323_s15 = smov 0  }
   0x2   :  { %s2325_s16 = smov 0   ;;  %s2327_s17 = smov 0  }
   0x3   :  { %s2329_s18 = smov 0   ;;  %s2331_s19 = smov 0  }
   0x4   :  { %s2333_s20 = smov 0  }
   0x5 LB: > { %s28_s21 = sadd.s32 1, %s2275_s16  ;;  %s31_s22 = sadd.s32 1, %s2279_s17  ;;  %s2291_s20 = sphi %s2333_s20, %s13_s20   ;;  %s2287_s19 = sphi %s2331_s19, %s2998_s19   ;;  %s2283_s18 = sphi %s2329_s18, %s2997_s18   ;;  %s2279_s17 = sphi %s2327_s17, %s2996_s17   ;;  %s2275_s16 = sphi %s2325_s16, %s2995_s16   ;;  %s2271_s15 = sphi %s2323_s15, %s2994_s15   ;;  %s2267_s14 = sphi %s2321_s14, %s2993_s14   ;;  %s2263_s13 = sphi %s2319_s13, %s2992_s13   ;;  %s2259_s12 = sphi %s2317_s12, %s2991_s12  }
   0x6   : > { %p29_p0 = scmp.ge.s32.totalorder %s28_s21, 2  ;;  %p1826_p1 = scmp.ge.s32.totalorder %s2291_s20, 1 }
   0x7   : > { %p226_p2 = scmp.lt.s32.totalorder %s2291_s20, 33  ;;  %s35_s23 = sadd.s32 1, %s2283_s18 }
   0x8   : > { %s3000_s21 = smov (%p29_p0, %s28_s21), 0  ;;  %s3002_s22 = smov (!%p29_p0, %s31_s22), %s2279_s17 }
   0x9   : > { %p33_p3 = scmp.ge.s32.totalorder %s3002_s22, 2  ;;  %p227_p4 = pnand %p1826_p1, %p226_p2 }
   0xa   : > { %s39_s24 = sadd.s32 1, %s2287_s19  ;;  %s1827_s25 = sshll.u32 (!%p227_p4), %s2263_s13, 4 }
   0xb   : > { %s3004_s22 = smov (%p33_p3, %s3002_s22), 0  ;;  %s3006_s23 = smov (!%p33_p3, %s35_s23), %s2283_s18 }
   0xc   : > { %p37_p5 = scmp.ge.s32.totalorder %s3006_s23, 4  ;;  %230 = sbr.rel (%p227_p4) target bundleno = 1051 (0x41b), region = 32 }
   0xd   : > { %p293_p7 = scmp.lt.s32.totalorder (!%p227_p4), %s2271_s15, 1  ;;  %p295_p8 = scmp.lt.s32.totalorder (!%p227_p4), %s2267_s14, 3 }
   0xe   : > { %s3008_s23 = smov (%p37_p5, %s3006_s23), 0  ;;  %s3010_s24 = smov (!%p37_p5, %s39_s24), %s2287_s19 }
   0xf   : > { %2987 = sst [smem:[#allocation5_spill]] %s3008_s23  ;;  %p41_p6 = scmp.ge.s32.totalorder %s3010_s24, 2 }
  0x10   : > { %p297_p9 = scmp.lt.s32.totalorder (!%p227_p4), %s1827_s25, 31  ;;  %s1831_s29 = sshll.u32 (!%p227_p4), %s2259_s12, 4 }
  0x11   : > { %s3012_s24 = smov (%p41_p6, %s3010_s24), 0  ;;  %p311_p10 = scmp.lt.s32.totalorder (!%p227_p4), %s1831_s29, 31 }
  0x12   : > { %2988 = sst [smem:[#allocation6_spill]] %s3012_s24  ;;  %p1843_p11 = scmp.ne.s32.totalorder (!%p227_p4), %s2259_s12, 0 }
  0x13   : > { %s3014_s15 = smov (!%p293_p7, %s2271_s15), 1  ;;  %s3016_s14 = smov (!%p295_p8, %s2267_s14), 3 }
  0x14   : > { %s3018_s25 = smov (!%p297_p9, %s1827_s25), 31  ;;  %s1828_s26 = sshll.u32 %s3016_s14, 5  ;;  %vm353_vm0 = vcmask (!%p1843_p11), 7168   ;;  %vm386_vm1 = vcmask (!%p1843_p11), 261120   ;;  %v2293_v0 = vmov (!%p1843_p11), -inf   ;;  %v2294_v1 = vmov (!%p1843_p11), 0.0  }
  0x15   : > { %s1829_s27 = sshll.u32 %s3014_s15, 7  ;;  %s300_s28 = sadd.s32 %s1828_s26, %s3018_s25  ;;  %354 = vst.msk [vmem:[#allocation2] sm:$0xff] (!%p1843_p11), %vm353_vm0, %v2293_v0  ;;  %355 = vst.msk [vmem:[#allocation2 + $0x8] sm:$0xff] (!%p1843_p11), %vm353_vm0, %v2293_v0 }
  0x16   : > { %s302_s30 = sadd.s32 %s1829_s27, %s300_s28  ;;  %s3020_s29 = smov (!%p311_p10, %s1831_s29), 31  ;;  %356 = vst.msk [vmem:[#allocation2 + $0x10] sm:$0xff] (!%p1843_p11), %vm353_vm0, %v2293_v0  ;;  %357 = vst.msk [vmem:[#allocation2 + $0x18] sm:$0xff] (!%p1843_p11), %vm353_vm0, %v2293_v0 }
  0x17   : > { %s1830_s4 = sshll.u32 %s302_s30, 2  ;;  %s314_s11 = sadd.s32 %s1828_s26, %s3020_s29  ;;  %358 = vst.msk [vmem:[#allocation2 + $0x20] sm:$0xff] (!%p1843_p11), %vm353_vm0, %v2293_v0  ;;  %359 = vst.msk [vmem:[#allocation2 + $0x28] sm:$0xff] (!%p1843_p11), %vm353_vm0, %v2293_v0 }
  0x18   : > { %s2384_s7 = scalar_lea.vmem %s2983_s0, %s1830_s4  ;;  %s2389_s10 = scalar_lea.vmem %s2986_s3, %s1830_s4  ;;  %360 = vst.msk [vmem:[#allocation2 + $0x30] sm:$0xff] (!%p1843_p11), %vm353_vm0, %v2293_v0  ;;  %361 = vst.msk [vmem:[#allocation2 + $0x38] sm:$0xff] (!%p1843_p11), %vm353_vm0, %v2293_v0 }
  0x19   : > { %s316_s24 = sadd.s32 %s1829_s27, %s314_s11  ;;  %352 = sbr.rel (%p1843_p11) target bundleno = 45 (0x2d), region = 36  ;;  %362 = vst.msk [vmem:[#allocation2 + $0x40] sm:$0xff] (!%p1843_p11), %vm353_vm0, %v2293_v0  ;;  %363 = vst.msk [vmem:[#allocation2 + $0x48] sm:$0xff] (!%p1843_p11), %vm353_vm0, %v2293_v0 }
  0x1a   : > { %s1834_s14 = sshll.u32 %s316_s24, 2  ;;  %364 = vst.msk [vmem:[#allocation2 + $0x50] sm:$0xff] (!%p1843_p11), %vm353_vm0, %v2293_v0  ;;  %365 = vst.msk [vmem:[#allocation2 + $0x58] sm:$0xff] (!%p1843_p11), %vm353_vm0, %v2293_v0 }
  0x1b   : > { %s2394_s28 = scalar_lea.vmem %s2984_s1, %s1834_s14  ;;  %s2399_s5 = scalar_lea.vmem %s2985_s2, %s1834_s14  ;;  %366 = vst.msk [vmem:[#allocation2 + $0x60] sm:$0xff] (!%p1843_p11), %vm353_vm0, %v2293_v0  ;;  %367 = vst.msk [vmem:[#allocation2 + $0x68] sm:$0xff] (!%p1843_p11), %vm353_vm0, %v2293_v0 }
  0x1c   : > { %368 = vst.msk [vmem:[#allocation2 + $0x70] sm:$0xff] (!%p1843_p11), %vm353_vm0, %v2293_v0  ;;  %369 = vst.msk [vmem:[#allocation2 + $0x78] sm:$0xff] (!%p1843_p11), %vm353_vm0, %v2293_v0 }
  0x1d   : > { %370 = vst.msk [vmem:[#allocation3] sm:$0xff] (!%p1843_p11), %vm353_vm0, %v2294_v1  ;;  %371 = vst.msk [vmem:[#allocation3 + $0x8] sm:$0xff] (!%p1843_p11), %vm353_vm0, %v2294_v1 }
  0x1e   : > { %372 = vst.msk [vmem:[#allocation3 + $0x10] sm:$0xff] (!%p1843_p11), %vm353_vm0, %v2294_v1  ;;  %373 = vst.msk [vmem:[#allocation3 + $0x18] sm:$0xff] (!%p1843_p11), %vm353_vm0, %v2294_v1 }
  0x1f   : > { %374 = vst.msk [vmem:[#allocation3 + $0x20] sm:$0xff] (!%p1843_p11), %vm353_vm0, %v2294_v1  ;;  %375 = vst.msk [vmem:[#allocation3 + $0x28] sm:$0xff] (!%p1843_p11), %vm353_vm0, %v2294_v1 }
  0x20   : > { %376 = vst.msk [vmem:[#allocation3 + $0x30] sm:$0xff] %vm353_vm0, %v2294_v1  ;;  %377 = vst.msk [vmem:[#allocation3 + $0x38] sm:$0xff] %vm353_vm0, %v2294_v1 }
  0x21   : > { %378 = vst.msk [vmem:[#allocation3 + $0x40] sm:$0xff] %vm353_vm0, %v2294_v1  ;;  %379 = vst.msk [vmem:[#allocation3 + $0x48] sm:$0xff] %vm353_vm0, %v2294_v1 }
  0x22   : > { %380 = vst.msk [vmem:[#allocation3 + $0x50] sm:$0xff] %vm353_vm0, %v2294_v1  ;;  %381 = vst.msk [vmem:[#allocation3 + $0x58] sm:$0xff] %vm353_vm0, %v2294_v1 }
  0x23   : > { %382 = vst.msk [vmem:[#allocation3 + $0x60] sm:$0xff] %vm353_vm0, %v2294_v1  ;;  %383 = vst.msk [vmem:[#allocation3 + $0x68] sm:$0xff] %vm353_vm0, %v2294_v1 }
  0x24   : > { %384 = vst.msk [vmem:[#allocation3 + $0x70] sm:$0xff] %vm353_vm0, %v2294_v1  ;;  %385 = vst.msk [vmem:[#allocation3 + $0x78] sm:$0xff] %vm353_vm0, %v2294_v1 }
  0x25   : > { %387 = vst.msk [vmem:[#allocation4] sm:$0xff] %vm386_vm1, %v2294_v1  ;;  %388 = vst.msk [vmem:[#allocation4 + $0x8] sm:$0xff] %vm386_vm1, %v2294_v1 }
  0x26   : > { %389 = vst.msk [vmem:[#allocation4 + $0x10] sm:$0xff] %vm386_vm1, %v2294_v1  ;;  %390 = vst.msk [vmem:[#allocation4 + $0x18] sm:$0xff] %vm386_vm1, %v2294_v1 }
  0x27   : > { %391 = vst.msk [vmem:[#allocation4 + $0x20] sm:$0xff] %vm386_vm1, %v2294_v1  ;;  %392 = vst.msk [vmem:[#allocation4 + $0x28] sm:$0xff] %vm386_vm1, %v2294_v1 }
  0x28   : > { %393 = vst.msk [vmem:[#allocation4 + $0x30] sm:$0xff] %vm386_vm1, %v2294_v1  ;;  %394 = vst.msk [vmem:[#allocation4 + $0x38] sm:$0xff] %vm386_vm1, %v2294_v1 }
  0x29   : > { %395 = vst.msk [vmem:[#allocation4 + $0x40] sm:$0xff] %vm386_vm1, %v2294_v1  ;;  %396 = vst.msk [vmem:[#allocation4 + $0x48] sm:$0xff] %vm386_vm1, %v2294_v1 }
  0x2a   : > { %397 = vst.msk [vmem:[#allocation4 + $0x50] sm:$0xff] %vm386_vm1, %v2294_v1  ;;  %398 = vst.msk [vmem:[#allocation4 + $0x58] sm:$0xff] %vm386_vm1, %v2294_v1 }
  0x2b   : > { %399 = vst.msk [vmem:[#allocation4 + $0x60] sm:$0xff] %vm386_vm1, %v2294_v1  ;;  %400 = vst.msk [vmem:[#allocation4 + $0x68] sm:$0xff] %vm386_vm1, %v2294_v1 }
  0x2c   : > { %401 = vst.msk [vmem:[#allocation4 + $0x70] sm:$0xff] %vm386_vm1, %v2294_v1  ;;  %402 = vst.msk [vmem:[#allocation4 + $0x78] sm:$0xff] %vm386_vm1, %v2294_v1 }
  0x2d PF: > { %s1844_s23 = sshll.u32 %s2259_s12, 7  ;;  %s1899_s24 = sshll.u32 %s2263_s13, 7 }
  0x2e   : > { %s1900_s26 = sadd.s32 128, %s1899_s24 }
  0x2f   : > { %p1846_p12 = scmp.ge.s32.totalorder %s1844_s23, %s1900_s26 }
  0x30   : > { %v2099_v2 = vld [vmem:[%s2394_s28] sm:$0xff] (!%p1846_p12)   ;;  %vm522_vm2 = vcmask (!%p1846_p12), 261120   ;;  %v2100_v3 = vld [vmem:[%s2394_s28 + $0x8] sm:$0xff] (!%p1846_p12)   ;;  %v2101_v5 = vld [vmem:[%s2394_s28 + $0x10] sm:$0xff] (!%p1846_p12)   ;;  %v685_v26 = vlaneseq (!%p1846_p12)  ;;  %v2501_v30 = vstv (!%p1846_p12), %s1899_s24 }
  0x31   : > { %409 = sbr.rel (%p1846_p12) target bundleno = 876 (0x36c), region = 40  ;;  %2013 = vmatprep.subr.msk.bf16.mxu0 (!%p1846_p12), %vm522_vm2, %v2099_v2  ;;  %v548_v4 = vsel (!%p1846_p12), %vm522_vm2, %v2099_v2, 0  ;;  %v551_v6 = vsel (!%p1846_p12), %vm522_vm2, %v2100_v3, 0  ;;  %v2107_v7 = vld [vmem:[%s2384_s7] sm:$0xff] (!%p1846_p12)   ;;  %v554_v8 = vsel (!%p1846_p12), %vm522_vm2, %v2101_v5, 0  ;;  %v2102_v9 = vld [vmem:[%s2394_s28 + $0x18] sm:$0xff] (!%p1846_p12)   ;;  %v721_v31 = vstv (!%p1846_p12), %s1844_s23 }
  0x32   : > { %1950 = vmatpush3.bf16.xpose.msra.mxu0 (!%p1846_p12), %v548_v4  ;;  %1965 = vmatprep.mubr.msk.bf16.mxu0 (!%p1846_p12), %vm522_vm2, %v2107_v7  ;;  %v557_v10 = vsel (!%p1846_p12), %vm522_vm2, %v2102_v9, 0  ;;  %v2103_v11 = vld [vmem:[%s2394_s28 + $0x20] sm:$0xff] (!%p1846_p12)   ;;  %v2104_v13 = vld [vmem:[%s2394_s28 + $0x28] sm:$0xff] (!%p1846_p12)   ;;  %v2105_v15 = vld [vmem:[%s2394_s28 + $0x30] sm:$0xff] (!%p1846_p12)   ;;  %v2496_v27 = vshrl.u32 (!%p1846_p12), %v685_v26, 7  ;;  %v720_v29 = vand.u32 (!%p1846_p12), 127, %v685_v26 }
  0x33   : > { %2014 = vmatprep.subr.msk.bf16.mxu0 (!%p1846_p12), %vm522_vm2, %v2100_v3  ;;  %v560_v12 = vsel (!%p1846_p12), %vm522_vm2, %v2103_v11, 0  ;;  %v563_v14 = vsel (!%p1846_p12), %vm522_vm2, %v2104_v13, 0  ;;  %v566_v16 = vsel (!%p1846_p12), %vm522_vm2, %v2105_v15, 0  ;;  %v2106_v17 = vld [vmem:[%s2394_s28 + $0x38] sm:$0xff] (!%p1846_p12)   ;;  %v2108_v19 = vld [vmem:[%s2384_s7 + $0x8] sm:$0xff] (!%p1846_p12)   ;;  %v2109_v20 = vld [vmem:[%s2384_s7 + $0x10] sm:$0xff] (!%p1846_p12)  }
  0x34   : > { %v569_v18 = vsel (!%p1846_p12), %vm522_vm2, %v2106_v17, 0  ;;  %v2110_v21 = vld [vmem:[%s2384_s7 + $0x18] sm:$0xff] (!%p1846_p12)   ;;  %v2111_v22 = vld [vmem:[%s2384_s7 + $0x20] sm:$0xff] (!%p1846_p12)   ;;  %v2112_v23 = vld [vmem:[%s2384_s7 + $0x28] sm:$0xff] (!%p1846_p12)   ;;  %v688_v28 = vadd.s32 (!%p1846_p12), 16, %v2496_v27  ;;  %v2506_v33 = vadd.s32 (!%p1846_p12), %v721_v31, %v720_v29  ;;  %v689_v34 = vadd.s32 (!%p1846_p12), 24, %v2496_v27 }
  0x35   : > { %v2113_v24 = vld [vmem:[%s2384_s7 + $0x30] sm:$0xff] (!%p1846_p12)   ;;  %v2114_v25 = vld [vmem:[%s2384_s7 + $0x38] sm:$0xff] (!%p1846_p12)   ;;  %v703_v35 = vadd.s32 (!%p1846_p12), %v2501_v30, %v2496_v27  ;;  %v687_v36 = vadd.s32 (!%p1846_p12), 8, %v2496_v27  ;;  %v690_v42 = vadd.s32 (!%p1846_p12), 32, %v2496_v27  ;;  %v693_v45 = vadd.s32 (!%p1846_p12), 56, %v2496_v27 }
  0x36   : > { %v705_v32 = vadd.s32 (!%p1846_p12), %v2501_v30, %v688_v28  ;;  %v706_v38 = vadd.s32 (!%p1846_p12), %v2501_v30, %v689_v34  ;;  %v692_v52 = vadd.s32 (!%p1846_p12), 48, %v2496_v27  ;;  %v691_v54 = vadd.s32 (!%p1846_p12), 40, %v2496_v27 }
  0x37   : > { %vm723_vm4 = vcmp.le.s32.totalorder (!%p1846_p12), %v2506_v33, %v703_v35  ;;  %v704_v41 = vadd.s32 (!%p1846_p12), %v2501_v30, %v687_v36  ;;  %v707_v51 = vadd.s32 (!%p1846_p12), %v2501_v30, %v690_v42  ;;  %v710_v53 = vadd.s32 (!%p1846_p12), %v2501_v30, %v693_v45 }
  0x38   : > { %vm725_vm3 = vcmp.le.s32.totalorder %v2506_v33, %v705_v32  ;;  %vm726_vm5 = vcmp.le.s32.totalorder %v2506_v33, %v706_v38  ;;  %v709_v59 = vadd.s32 %v2501_v30, %v692_v52  ;;  %v694_v60 = vadd.s32 64, %v2496_v27  ;;  %v2116_v52 = vld [vmem:[%s2399_s5 + $0x8] sm:$0xff]  }
  0x39   : > { %vm724_vm6 = vcmp.le.s32.totalorder %v2506_v33, %v704_v41  ;;  %vm727_vm7 = vcmp.le.s32.totalorder %v2506_v33, %v707_v51  ;;  %vm730_vm8 = vcmp.le.s32.totalorder %v2506_v33, %v710_v53  ;;  %v708_v63 = vadd.s32 %v2501_v30, %v691_v54  ;;  %v2115_v51 = vld [vmem:[%s2399_s5] sm:$0xff]  }
  0x3a   : > { %1952 = vmatpush3.bf16.xpose.msra.mxu0 %v551_v6  ;;  %v697_v0 = vadd.s32 88, %v2496_v27  ;;  %v696_v3 = vadd.s32 80, %v2496_v27  ;;  %v695_v6 = vadd.s32 72, %v2496_v27  ;;  %vm729_vm9 = vcmp.le.s32.totalorder %v2506_v33, %v709_v59  ;;  %1981 = vmatprep.subr.bf16.mxu1 %v2115_v51  ;;  %v2608_v53 = vld [vmem:[#allocation2] sm:$0xff] }
  0x3b   : > { %2015 = vmatprep.subr.msk.bf16.mxu0 %vm522_vm2, %v2101_v5  ;;  %vm728_vm10 = vcmp.le.s32.totalorder %v2506_v33, %v708_v63  ;;  %v699_v29 = vadd.s32 104, %v2496_v27  ;;  %1982 = vmatpush3.bf16.msra.mxu1 %v2115_v51 }
  0x3c   : > { %1983 = vmatprep.subr.bf16.mxu1 %v2116_v52 }
  0x3f   : > { %1984 = vmatpush3.bf16.msra.mxu1 %v2116_v52 }
  0x42   : > { %1954 = vmatpush3.bf16.xpose.msra.mxu0 %v554_v8 }
  0x43   : > { %2016 = vmatprep.subr.msk.bf16.mxu0 %vm522_vm2, %v2102_v9  ;;  %v711_v9 = vadd.s32 %v2501_v30, %v694_v60  ;;  %v2616_v60 = vld [vmem:[#allocation2 + $0x18] sm:$0xff] }
  0x45   : > { %vm731_vm11 = vcmp.le.s32.totalorder %v2506_v33, %v711_v9 }
  0x4a   : > { %1956 = vmatpush3.bf16.xpose.msra.mxu0 %v557_v10  ;;  %v714_v10 = vadd.s32 %v2501_v30, %v697_v0 }
  0x4b   : > { %2017 = vmatprep.subr.msk.bf16.mxu0 %vm522_vm2, %v2103_v11  ;;  %v713_v11 = vadd.s32 %v2501_v30, %v696_v3  ;;  %v2636_v3 = vld [vmem:[#allocation2 + $0x20] sm:$0xff] }
  0x4c   : > { %vm734_vm12 = vcmp.le.s32.totalorder %v2506_v33, %v714_v10 }
  0x4d   : > { %vm733_vm13 = vcmp.le.s32.totalorder %v2506_v33, %v713_v11 }
  0x52   : > { %1958 = vmatpush3.bf16.xpose.msra.mxu0 %v560_v12 }
  0x53   : > { %2018 = vmatprep.subr.msk.bf16.mxu0 %vm522_vm2, %v2104_v13 }
  0x5a   : > { %1960 = vmatpush3.bf16.xpose.msra.mxu0 %v563_v14  ;;  %v712_v14 = vadd.s32 %v2501_v30, %v695_v6  ;;  %v2641_v6 = vld [vmem:[#allocation2 + $0x38] sm:$0xff] }
  0x5b   : > { %2019 = vmatprep.subr.msk.bf16.mxu0 %vm522_vm2, %v2105_v15 }
  0x5c   : > { %vm732_vm14 = vcmp.le.s32.totalorder %v2506_v33, %v712_v14  ;;  %v2119_v14 = vld [vmem:[%s2399_s5 + $0x20] sm:$0xff]  }
  0x62   : > { %1962 = vmatpush3.bf16.xpose.msra.mxu0 %v566_v16 }
  0x63   : > { %2020 = vmatprep.subr.msk.bf16.mxu0 %vm522_vm2, %v2106_v17  ;;  %v701_v17 = vadd.s32 120, %v2496_v27 }
  0x65   : > { %v718_v35 = vadd.s32 %v2501_v30, %v701_v17 }
  0x67   : > { %vm738_vm0 = vcmp.le.s32.totalorder %v2506_v33, %v718_v35  ;;  %v2121_v35 = vld [vmem:[%s2399_s5 + $0x30] sm:$0xff]  }
  0x6a   : > { %1964 = vmatpush3.bf16.xpose.msra.mxu0 %v569_v18  ;;  %v698_v18 = vadd.s32 96, %v2496_v27 }
  0x6c   : > { %v715_v32 = vadd.s32 %v2501_v30, %v698_v18 }
  0x6e   : > { %vm735_vm15 = vcmp.le.s32.totalorder %v2506_v33, %v715_v32  ;;  %v2681_v32 = vld [vmem:[#allocation2 + $0x50] sm:$0xff] }
  0x71   : > { %1966 = vmatmul.mubr.msk.bf16.vlgmr.msra.gmra.mrb[0].mxu0 %vm522_vm2, %v2108_v19 }
  0x72   : > { %1969 = vmatprep.mubr.msk.bf16.mxu0 %vm522_vm2, %v2109_v20 }
  0x79   : > { %1970 = vmatmul.mubr.msk.bf16.gmra.mrb[4].mxu0 %vm522_vm2, %v2110_v21 }
  0x7a   : > { %1973 = vmatprep.mubr.msk.bf16.mxu0 %vm522_vm2, %v2111_v22 }
  0x81   : > { %1974 = vmatmul.mubr.msk.bf16.gmra.mrb[8].mxu0 %vm522_vm2, %v2112_v23 }
  0x82   : > { %1977 = vmatprep.mubr.msk.bf16.mxu0 %vm522_vm2, %v2113_v24  ;;  %v700_v24 = vadd.s32 112, %v2496_v27 }
  0x89   : > { %1978 = vmatmul.mubr.msk.bf16.gmra.mrb[12].mxu0 %vm522_vm2, %v2114_v25  ;;  %v2295_v25 = vmov 0  }
  0x8a   : > { %2098 = vset.pattern.permute.xlu1 %v2295_v25  ;;  %2097 = vset.pattern.permute.xlu0 %v2295_v25 }
 0x144   : > { %v1967_v37 = vpop.f32.mrb[0].mxu0 }
 0x145   : > { %v670_v39 = vmul.f32 0.17677669, %v1967_v37  ;;  %v605_v40 = vpop.f32.mrb[1].mxu0  ;;  %v717_v37 = vadd.s32 %v2501_v30, %v700_v24 }
 0x146   : > { %v668_v43 = vmul.f32 0.17677669, %v605_v40  ;;  %v1968_v44 = vpop.f32.mrb[2].mxu0 }
 0x147   : > { %v671_v46 = vmul.f32 0.17677669, %v1968_v44  ;;  %v608_v47 = vpop.f32.mrb[3].mxu0  ;;  %v2518_v48 = vsel %vm725_vm3, %v670_v39, -inf  ;;  %v716_v39 = vadd.s32 %v2501_v30, %v699_v29  ;;  %vm737_vm1 = vcmp.le.s32.totalorder %v2506_v33, %v717_v37  ;;  %v2687_v37 = vld [vmem:[#allocation2 + $0x48] sm:$0xff] }
 0x148   : > { %v669_v49 = vmul.f32 0.17677669, %v608_v47  ;;  %775 = vmax.xlane.f32.xlu1 %v2518_v48  ;;  %v2521_v50 = vsel %vm723_vm4, %v668_v43, -inf  ;;  %vm1075_vm4 = vcmask 7168  }
 0x149   : > { %771 = vmax.xlane.f32.xlu0 %v2521_v50  ;;  %v2530_v55 = vsel %vm726_vm5, %v671_v46, -inf  ;;  %vm736_vm3 = vcmp.le.s32.totalorder %v2506_v33, %v716_v39  ;;  %v2606_v33 = vld [vmem:[#allocation2 + $0x10] sm:$0xff] }
 0x14a   : > { %v2533_v57 = vsel %vm724_vm6, %v669_v49, -inf }
 0x14c   : > { %777 = vmax.xlane.f32.xlu1 %v2530_v55  ;;  %v1971_v56 = vpop.f32.mrb[4].mxu0 }
 0x14d   : > { %773 = vmax.xlane.f32.xlu0 %v2533_v57  ;;  %v621_v58 = vpop.f32.mrb[5].mxu0  ;;  %v674_v4 = vmul.f32 0.17677669, %v1971_v56 }
 0x14e   : > { %v672_v61 = vmul.f32 0.17677669, %v621_v58  ;;  %v1972_v62 = vpop.f32.mrb[6].mxu0 }
 0x14f   : > { %v675_v1 = vmul.f32 0.17677669, %v1972_v62  ;;  %v624_v2 = vpop.f32.mrb[7].mxu0  ;;  %v2555_v13 = vsel %vm729_vm9, %v674_v4, -inf  ;;  %v2117_v62 = vld [vmem:[%s2399_s5 + $0x10] sm:$0xff]   ;;  %v2118_v4 = vld [vmem:[%s2399_s5 + $0x18] sm:$0xff]  }
 0x150   : > { %v2543_v5 = vsel %vm727_vm7, %v672_v61, -inf  ;;  %v673_v7 = vmul.f32 0.17677669, %v624_v2  ;;  %v2621_v61 = vld [vmem:[#allocation2 + $0x8] sm:$0xff]  ;;  %1985 = vmatprep.subr.bf16.mxu1 %v2117_v62 }
 0x151   : > { %779 = vmax.xlane.f32.xlu0 %v2543_v5  ;;  %v2547_v8 = vsel %vm730_vm8, %v675_v1, -inf  ;;  %1986 = vmatpush3.bf16.msra.mxu1 %v2117_v62  ;;  %v768_v62 = vld [vmem:[#allocation2 + $0x68] sm:$0xff] }
 0x152   : > { %785 = vmax.xlane.f32.xlu1 %v2547_v8  ;;  %v2559_v16 = vsel %vm728_vm10, %v673_v7, -inf  ;;  %1987 = vmatprep.subr.bf16.mxu1 %v2118_v4 }
 0x154   : > { %v1975_v12 = vpop.f32.mrb[8].mxu0 }
 0x155   : > { %783 = vmax.xlane.f32.xlu0 %v2555_v13  ;;  %v637_v15 = vpop.f32.mrb[9].mxu0  ;;  %v678_v19 = vmul.f32 0.17677669, %v1975_v12  ;;  %1988 = vmatpush3.bf16.msra.mxu1 %v2118_v4  ;;  %v2650_v12 = vld [vmem:[#allocation2 + $0x30] sm:$0xff] }
 0x156   : > { %v676_v20 = vmul.f32 0.17677669, %v637_v15  ;;  %781 = vmax.xlane.f32.xlu1 %v2559_v16  ;;  %v1976_v21 = vpop.f32.mrb[10].mxu0  ;;  %v2655_v15 = vld [vmem:[#allocation2 + $0x28] sm:$0xff]  ;;  %1989 = vmatprep.subr.bf16.mxu1 %v2119_v14 }
 0x157   : > { %v679_v22 = vmul.f32 0.17677669, %v1976_v21  ;;  %v640_v23 = vpop.f32.mrb[11].mxu0  ;;  %v2579_v34 = vsel %vm733_vm13, %v678_v19, -inf  ;;  %v2665_v21 = vld [vmem:[#allocation2 + $0x40] sm:$0xff] }
 0x158   : > { %v677_v26 = vmul.f32 0.17677669, %v640_v23  ;;  %v2570_v28 = vsel %vm731_vm11, %v676_v20, -inf  ;;  %v2671_v23 = vld [vmem:[#allocation2 + $0x58] sm:$0xff] }
 0x159   : > { %v2574_v31 = vsel %vm734_vm12, %v679_v22, -inf  ;;  %787 = vmax.xlane.f32.xlu0 %v2570_v28  ;;  %1990 = vmatpush3.bf16.msra.mxu1 %v2119_v14  ;;  %v2120_v22 = vld [vmem:[%s2399_s5 + $0x28] sm:$0xff]  }
 0x15a   : > { %793 = vmax.xlane.f32.xlu1 %v2574_v31  ;;  %v2582_v36 = vsel %vm732_vm14, %v677_v26, -inf  ;;  %1991 = vmatprep.subr.bf16.mxu1 %v2120_v22 }
 0x15c   : > { %v1979_v38 = vpop.f32.mrb[12].mxu0 }
 0x15d   : > { %v653_v27 = vpop.f32.mrb[13].mxu0  ;;  %791 = vmax.xlane.f32.xlu0 %v2579_v34  ;;  %v682_v40 = vmul.f32 0.17677669, %v1979_v38  ;;  %1992 = vmatpush3.bf16.msra.mxu1 %v2120_v22 }
 0x15e   : > { %v680_v41 = vmul.f32 0.17677669, %v653_v27  ;;  %789 = vmax.xlane.f32.xlu1 %v2582_v36  ;;  %v1980_v42 = vpop.f32.mrb[14].mxu0  ;;  %1993 = vmatprep.subr.bf16.mxu1 %v2121_v35 }
 0x15f   : > { %v683_v43 = vmul.f32 0.17677669, %v1980_v42  ;;  %v656_v44 = vpop.f32.mrb[15].mxu0  ;;  %v2598_v47 = vsel %vm737_vm1, %v682_v40, -inf  ;;  %v2699_v42 = vld [vmem:[#allocation2 + $0x60] sm:$0xff] }
 0x160   : > { %v681_v45 = vmul.f32 0.17677669, %v656_v44  ;;  %v2591_v30 = vsel %vm735_vm15, %v680_v41, -inf  ;;  %v2705_v44 = vld [vmem:[#allocation2 + $0x78] sm:$0xff] }
 0x161   : > { %v2594_v46 = vsel %vm738_vm0, %v683_v43, -inf  ;;  %795 = vmax.xlane.f32.xlu0 %v2591_v30  ;;  %1994 = vmatpush3.bf16.msra.mxu1 %v2121_v35  ;;  %v2122_v43 = vld [vmem:[%s2399_s5 + $0x38] sm:$0xff]  }
 0x162   : > { %801 = vmax.xlane.f32.xlu1 %v2594_v46  ;;  %v2600_v49 = vsel %vm736_vm3, %v681_v45, -inf  ;;  %1995 = vmatprep.subr.bf16.mxu1 %v2122_v43 }
 0x165   : > { %799 = vmax.xlane.f32.xlu0 %v2598_v47  ;;  %1996 = vmatpush3.bf16.msra.mxu1 %v2122_v43 }
 0x166   : > { %797 = vmax.xlane.f32.xlu1 %v2600_v49 }
 0x1d5   : > { %v776_v54 = vpop.xlane.xlu1 %775 }
 0x1d6   : > { %v2611_v56 = vmax.f32 %v2606_v33, %v776_v54  ;;  %v772_v58 = vpop.xlane.xlu0 %771 }
 0x1d7   : > { %v2614_v59 = vmax.f32 %v2608_v53, %v772_v58 }
 0x1d8   : > { %1407 = vst.msk [vmem:[#allocation2 + $0x10] sm:$0xff] %vm1075_vm4, %v2611_v56  ;;  %879 = vperm.xlu1 %2098, %v2611_v56  }
 0x1d9   : > { %1405 = vst.msk [vmem:[#allocation2] sm:$0xff] %vm1075_vm4, %v2614_v59  ;;  %v778_v63 = vpop.xlane.xlu1 %777  ;;  %869 = vperm.xlu0 %2097, %v2614_v59   ;;  %v819_v39 = vsub.f32 %v2608_v53, %v2614_v59  ;;  %v2718_v59 = vld [vmem:[#allocation2 + $0x70] sm:$0xff] }
 0x1da   : > { %v2628_v0 = vmax.f32 %v2616_v60, %v778_v63  ;;  %v774_v1 = vpop.xlane.xlu0 %773 }
 0x1db   : > { %v2631_v2 = vmax.f32 %v2621_v61, %v774_v1  ;;  %v835_v51 = vmul.f32 1.442695, %v819_v39 }
 0x1dc   : > { %1408 = vst.msk [vmem:[#allocation2 + $0x18] sm:$0xff] %vm1075_vm4, %v2628_v0  ;;  %884 = vperm.xlu1 %2098, %v2628_v0   ;;  %v822_v52 = vsub.f32 %v2616_v60, %v2628_v0 }
 0x1dd   : > { %1406 = vst.msk [vmem:[#allocation2 + $0x8] sm:$0xff] %vm1075_vm4, %v2631_v2  ;;  %v820_v63 = vsub.f32 %v2621_v61, %v2631_v2  ;;  %2123 = vpow2.f32 %v835_v51 }
 0x1de   : > { %v780_v7 = vpop.xlane.xlu0 %779  ;;  %v841_v1 = vmul.f32 1.442695, %v822_v52 }
 0x1df   : > { %v2644_v9 = vmax.f32 %v2636_v3, %v780_v7  ;;  %v786_v10 = vpop.xlane.xlu1 %785 }
 0x1e0   : > { %v2647_v11 = vmax.f32 %v2641_v6, %v786_v10  ;;  %874 = vperm.xlu1 %2098, %v2631_v2   ;;  %v821_v2 = vsub.f32 %v2606_v33, %v2611_v56  ;;  %2125 = vpow2.f32 %v841_v1 }
 0x1e1   : > { %1409 = vst.msk [vmem:[#allocation2 + $0x20] sm:$0xff] %vm1075_vm4, %v2644_v9  ;;  %v823_v22 = vsub.f32 %v2636_v3, %v2644_v9 }
 0x1e2   : > { %1412 = vst.msk [vmem:[#allocation2 + $0x38] sm:$0xff] %vm1075_vm4, %v2647_v11  ;;  %v784_v17 = vpop.xlane.xlu0 %783 }
 0x1e3   : > { %v2660_v18 = vmax.f32 %v2650_v12, %v784_v17  ;;  %v782_v19 = vpop.xlane.xlu1 %781  ;;  %v837_v17 = vmul.f32 1.442695, %v820_v63 }
 0x1e4   : > { %v2663_v20 = vmax.f32 %v2655_v15, %v782_v19 }
 0x1e5   : > { %1411 = vst.msk [vmem:[#allocation2 + $0x30] sm:$0xff] %vm1075_vm4, %v2660_v18  ;;  %899 = vperm.xlu1 %2098, %v2660_v18   ;;  %2127 = vpow2.f32 %v837_v17 }
 0x1e6   : > { %1410 = vst.msk [vmem:[#allocation2 + $0x28] sm:$0xff] %vm1075_vm4, %v2663_v20  ;;  %v788_v24 = vpop.xlane.xlu0 %787  ;;  %v824_v4 = vsub.f32 %v2655_v15, %v2663_v20  ;;  %v826_v15 = vsub.f32 %v2641_v6, %v2647_v11  ;;  %v843_v6 = vmul.f32 1.442695, %v823_v22 }
 0x1e7   : > { %v794_v25 = vpop.xlane.xlu1 %793  ;;  %v2676_v26 = vmax.f32 %v2665_v21, %v788_v24  ;;  %v2751_v56 = vpop.eup %2123 }
 0x1e8   : > { %v2679_v29 = vmax.f32 %v2671_v23, %v794_v25  ;;  %v845_v19 = vmul.f32 1.442695, %v824_v4  ;;  %v849_v24 = vmul.f32 1.442695, %v826_v15 }
 0x1e9   : > { %1413 = vst.msk [vmem:[#allocation2 + $0x40] sm:$0xff] %vm1075_vm4, %v2676_v26  ;;  %889 = vperm.xlu1 %2098, %v2644_v9  }
 0x1ea   : > { %1416 = vst.msk [vmem:[#allocation2 + $0x58] sm:$0xff] %vm1075_vm4, %v2679_v29  ;;  %v792_v38 = vpop.xlane.xlu0 %791  ;;  %2129 = vpow2.f32 %v845_v19  ;;  %v830_v33 = vsub.f32 %v2671_v23, %v2679_v29  ;;  %v2759_v25 = vpop.eup %2125 }
 0x1eb   : > { %v790_v27 = vpop.xlane.xlu1 %789  ;;  %v2694_v40 = vmax.f32 %v2681_v32, %v792_v38 }
 0x1ec   : > { %v2697_v41 = vmax.f32 %v2687_v37, %v790_v27  ;;  %v857_v3 = vmul.f32 1.442695, %v830_v33 }
 0x1ed   : > { %1415 = vst.msk [vmem:[#allocation2 + $0x50] sm:$0xff] %vm1075_vm4, %v2694_v40  ;;  %894 = vperm.xlu1 %2098, %v2663_v20   ;;  %v839_v20 = vmul.f32 1.442695, %v821_v2 }
 0x1ee   : > { %1414 = vst.msk [vmem:[#allocation2 + $0x48] sm:$0xff] %vm1075_vm4, %v2697_v41  ;;  %914 = vperm.xlu0 %2097, %v2697_v41   ;;  %v796_v45 = vpop.xlane.xlu0 %795  ;;  %v828_v9 = vsub.f32 %v2687_v37, %v2697_v41  ;;  %v827_v37 = vsub.f32 %v2665_v21, %v2676_v26 }
 0x1ef   : > { %v802_v53 = vpop.xlane.xlu1 %801  ;;  %v2713_v54 = vmax.f32 %v2699_v42, %v796_v45  ;;  %2131 = vpow2.f32 %v839_v20  ;;  %v2765_v35 = vpop.eup %2127 }
 0x1f0   : > { %v2716_v58 = vmax.f32 %v2705_v44, %v802_v53  ;;  %2133 = vpow2.f32 %v849_v24  ;;  %v851_v41 = vmul.f32 1.442695, %v827_v37 }
 0x1f1   : > { %1417 = vst.msk [vmem:[#allocation2 + $0x60] sm:$0xff] %vm1075_vm4, %v2713_v54  ;;  %904 = vperm.xlu1 %2098, %v2647_v11   ;;  %v825_v11 = vsub.f32 %v2650_v12, %v2660_v18  ;;  %2135 = vpow2.f32 %v843_v6  ;;  %v853_v12 = vmul.f32 1.442695, %v828_v9  ;;  %v831_v43 = vsub.f32 %v2699_v42, %v2713_v54 }
 0x1f2   : > { %v834_v60 = vsub.f32 %v2705_v44, %v2716_v58  ;;  %1420 = vst.msk [vmem:[#allocation2 + $0x78] sm:$0xff] %vm1075_vm4, %v2716_v58  ;;  %924 = vperm.xlu0 %2097, %v2679_v29   ;;  %v800_v0 = vpop.xlane.xlu0 %799  ;;  %v829_v29 = vsub.f32 %v2681_v32, %v2694_v40  ;;  %2137 = vpow2.f32 %v857_v3 }
 0x1f3   : > { %v798_v7 = vpop.xlane.xlu1 %797  ;;  %v2733_v10 = vmax.f32 %v2718_v59, %v800_v0  ;;  %v847_v23 = vmul.f32 1.442695, %v825_v11  ;;  %v859_v45 = vmul.f32 1.442695, %v831_v43 }
 0x1f4   : > { %v816_v14 = vmax.f32 %v768_v62, %v798_v7  ;;  %v2767_v38 = vpop.eup %2129  ;;  %v855_v39 = vmul.f32 1.442695, %v829_v29 }
 0x1f5   : > { %v833_v61 = vsub.f32 %v2718_v59, %v2733_v10  ;;  %1419 = vst.msk [vmem:[#allocation2 + $0x70] sm:$0xff] %vm1075_vm4, %v2733_v10  ;;  %909 = vperm.xlu1 %2098, %v2676_v26   ;;  %2139 = vpow2.f32 %v847_v23 }
 0x1f6   : > { %1418 = vst.msk [vmem:[#allocation2 + $0x68] sm:$0xff] %vm1075_vm4, %v816_v14  ;;  %934 = vperm.xlu0 %2097, %v816_v14   ;;  %v832_v18 = vsub.f32 %v768_v62, %v816_v14  ;;  %2141 = vpow2.f32 %v853_v12 }
 0x1f7   : > { %2143 = vpow2.f32 %v855_v39 }
 0x1f8   : > { %v861_v32 = vmul.f32 1.442695, %v832_v18 }
 0x1f9   : > { %919 = vperm.xlu1 %2098, %v2694_v40   ;;  %v2773_v27 = vpop.eup %2131 }
 0x1fa   : > { %944 = vperm.xlu0 %2097, %v2716_v58   ;;  %v2775_v40 = vpop.eup %2133  ;;  %2145 = vpow2.f32 %v861_v32 }
 0x1fb   : > { %v2781_v21 = vpop.eup %2135  ;;  %2147 = vpow2.f32 %v851_v41 }
 0x1fc   : > { %v2783_v26 = vpop.eup %2137  ;;  %2149 = vpow2.f32 %v859_v45 }
 0x1fd   : > { %929 = vperm.xlu1 %2098, %v2713_v54  }
 0x1fe   : > { %1110 = vperm.xlu0 %2097, %v2751_v56  }
 0x1ff   : > { %v2787_v51 = vpop.eup %2139 }
 0x200   : > { %v2789_v52 = vpop.eup %2141 }
 0x201   : > { %939 = vperm.xlu1 %2098, %v2733_v10   ;;  %v2793_v42 = vpop.eup %2143 }
 0x202   : > { %1125 = vperm.xlu0 %2097, %v2759_v25  }
 0x204   : > { %v2795_v53 = vpop.eup %2145 }
 0x205   : > { %1115 = vperm.xlu1 %2098, %v2765_v35   ;;  %v2799_v54 = vpop.eup %2147 }
 0x206   : > { %1135 = vperm.xlu0 %2097, %v2767_v38   ;;  %v2802_v62 = vpop.eup %2149 }
 0x209   : > { %1120 = vperm.xlu1 %2098, %v2773_v27  }
 0x20a   : > { %1145 = vperm.xlu0 %2097, %v2775_v40  }
 0x20d   : > { %1130 = vperm.xlu1 %2098, %v2781_v21  }
 0x20e   : > { %1165 = vperm.xlu0 %2097, %v2783_v26  }
 0x211   : > { %1140 = vperm.xlu1 %2098, %v2787_v51  }
 0x212   : > { %1155 = vperm.xlu0 %2097, %v2789_v52  }
 0x215   : > { %1160 = vperm.xlu1 %2098, %v2793_v42  }
 0x216   : > { %1175 = vperm.xlu0 %2097, %v2795_v53  }
 0x219   : > { %1150 = vperm.xlu1 %2098, %v2799_v54  }
 0x21d   : > { %1170 = vperm.xlu1 %2098, %v2802_v62  }
 0x257   : > { %v880_v63 = vpop.permute.xlu1 %879 }
 0x258   : > { %v949_v0 = vsub.f32 %v2518_v48, %v880_v63  ;;  %v870_v1 = vpop.permute.xlu0 %869 }
 0x259   : > { %v947_v4 = vsub.f32 %v2521_v50, %v870_v1 }
 0x25a   : > { %v967_v7 = vmul.f32 1.442695, %v949_v0 }
 0x25b   : > { %v963_v14 = vmul.f32 1.442695, %v947_v4  ;;  %v885_v2 = vpop.permute.xlu1 %884 }
 0x25c   : > { %2151 = vpow2.f32 %v967_v7  ;;  %v950_v17 = vsub.f32 %v2530_v55, %v885_v2 }
 0x25d   : > { %2153 = vpow2.f32 %v963_v14 }
 0x25e   : > { %v969_v15 = vmul.f32 1.442695, %v950_v17 }
 0x25f   : > { %v875_v19 = vpop.permute.xlu1 %874 }
 0x260   : > { %2155 = vpow2.f32 %v969_v15  ;;  %v948_v20 = vsub.f32 %v2533_v57, %v875_v19 }
 0x262   : > { %v965_v22 = vmul.f32 1.442695, %v948_v20 }
 0x264   : > { %2157 = vpow2.f32 %v965_v22  ;;  %v900_v24 = vpop.permute.xlu1 %899 }
 0x265   : > { %v953_v48 = vsub.f32 %v2555_v13, %v900_v24 }
 0x266   : > { %v2152_v33 = vpop.eup %2151 }
 0x267   : > { %v2154_v6 = vpop.eup %2153  ;;  %v975_v50 = vmul.f32 1.442695, %v953_v48  ;;  %1031 = vadd.xlane.f32.xlu0 %v2152_v33 }
 0x268   : > { %1027 = vadd.xlane.f32.xlu1 %v2154_v6  ;;  %v890_v11 = vpop.permute.xlu1 %889 }
 0x269   : > { %2159 = vpow2.f32 %v975_v50  ;;  %v951_v55 = vsub.f32 %v2543_v5, %v890_v11 }
 0x26a   : > { %v2156_v3 = vpop.eup %2155 }
 0x26b   : > { %v971_v9 = vmul.f32 1.442695, %v951_v55  ;;  %v1205_v32 = vpack.c.bf16 %v2156_v3, %v2152_v33 }
 0x26c   : > { %1033 = vadd.xlane.f32.xlu1 %v2156_v3  ;;  %v895_v23 = vpop.permute.xlu1 %894 }
 0x26d   : > { %2161 = vpow2.f32 %v971_v9  ;;  %v952_v57 = vsub.f32 %v2559_v16, %v895_v23  ;;  %v915_v29 = vpop.permute.xlu0 %914 }
 0x26e   : > { %v2158_v12 = vpop.eup %2157  ;;  %v956_v37 = vsub.f32 %v2582_v36, %v915_v29 }
 0x26f   : > { %v973_v18 = vmul.f32 1.442695, %v952_v57  ;;  %1029 = vadd.xlane.f32.xlu0 %v2158_v12  ;;  %v1204_v13 = vpack.c.bf16 %v2158_v12, %v2154_v6 }
 0x270   : > { %v905_v39 = vpop.permute.xlu1 %904  ;;  %v981_v63 = vmul.f32 1.442695, %v956_v37 }
 0x271   : > { %2163 = vpow2.f32 %v973_v18  ;;  %v954_v41 = vsub.f32 %v2547_v8, %v905_v39  ;;  %v925_v5 = vpop.permute.xlu0 %924  ;;  %1997 = vmatprep.mubr.bf16.mxu1 %v1204_v13  ;;  %v863_v39 = vmul.f32 1.442695, %v833_v61 }
 0x272   : > { %1998 = vmatmul.mubr.bf16.vlgmr.msra.gmra.mrb[0].mxu1 %v1205_v32  ;;  %v958_v16 = vsub.f32 %v2574_v31, %v925_v5  ;;  %v865_v32 = vmul.f32 1.442695, %v834_v60 }
 0x273   : > { %v2160_v43 = vpop.eup %2159  ;;  %v977_v45 = vmul.f32 1.442695, %v954_v41 }
 0x274   : > { %1039 = vadd.xlane.f32.xlu0 %v2160_v43  ;;  %v910_v0 = vpop.permute.xlu1 %909  ;;  %v985_v14 = vmul.f32 1.442695, %v958_v16 }
 0x275   : > { %2165 = vpow2.f32 %v977_v45  ;;  %v955_v1 = vsub.f32 %v2570_v28, %v910_v0  ;;  %v935_v4 = vpop.permute.xlu0 %934 }
 0x276   : > { %2167 = vpow2.f32 %v981_v63  ;;  %v960_v8 = vsub.f32 %v2600_v49, %v935_v4 }
 0x277   : > { %v2162_v36 = vpop.eup %2161  ;;  %v979_v7 = vmul.f32 1.442695, %v955_v1 }
 0x278   : > { %1035 = vadd.xlane.f32.xlu0 %v2162_v36  ;;  %v920_v2 = vpop.permute.xlu1 %919  ;;  %v989_v20 = vmul.f32 1.442695, %v960_v8 }
 0x279   : > { %2169 = vpow2.f32 %v979_v7  ;;  %v957_v17 = vsub.f32 %v2579_v34, %v920_v2  ;;  %v945_v15 = vpop.permute.xlu0 %944 }
 0x27a   : > { %2171 = vpow2.f32 %v985_v14  ;;  %v962_v22 = vsub.f32 %v2594_v46, %v945_v15  ;;  %v995_v14 = vld [vmem:[#allocation3] sm:$0xff] }
 0x27b   : > { %v2164_v19 = vpop.eup %2163  ;;  %v983_v31 = vmul.f32 1.442695, %v957_v17  ;;  %v1011_v17 = vmul.f32 %v2751_v56, %v995_v14  ;;  %v1001_v56 = vld [vmem:[#allocation3 + $0x30] sm:$0xff] }
 0x27c   : > { %v930_v28 = vpop.permute.xlu1 %929  ;;  %v1206_v24 = vpack.c.bf16 %v2164_v19, %v2162_v36  ;;  %v993_v6 = vmul.f32 1.442695, %v962_v22  ;;  %v997_v36 = vld [vmem:[#allocation3 + $0x10] sm:$0xff] }
 0x27d   : > { %2173 = vpow2.f32 %v983_v31  ;;  %v959_v48 = vsub.f32 %v2591_v30, %v930_v28  ;;  %v1013_v8 = vmul.f32 %v2773_v27, %v997_v36  ;;  %v998_v31 = vld [vmem:[#allocation3 + $0x18] sm:$0xff]  ;;  %v996_v28 = vld [vmem:[#allocation3 + $0x8] sm:$0xff] }
 0x27e   : > { %2001 = vmatprep.mubr.bf16.mxu1 %v1206_v24  ;;  %2175 = vpow2.f32 %v989_v20  ;;  %v1014_v22 = vmul.f32 %v2759_v25, %v998_v31 }
 0x27f   : > { %v2166_v33 = vpop.eup %2165  ;;  %v987_v49 = vmul.f32 1.442695, %v959_v48 }
 0x280   : > { %1041 = vadd.xlane.f32.xlu1 %v2166_v33  ;;  %v940_v50 = vpop.permute.xlu1 %939  ;;  %v1207_v34 = vpack.c.bf16 %v2166_v33, %v2160_v43  ;;  %v2168_v55 = vpop.eup %2167  ;;  %v1012_v33 = vmul.f32 %v2765_v35, %v996_v28  ;;  %v1002_v35 = vld [vmem:[#allocation3 + $0x38] sm:$0xff]  ;;  %v1007_v28 = vld [vmem:[#allocation3 + $0x60] sm:$0xff] }
 0x281   : > { %2177 = vpow2.f32 %v987_v49  ;;  %v961_v11 = vsub.f32 %v2598_v47, %v940_v50  ;;  %v2833_v43 = vpop.permute.xlu0 %1110 }
 0x282   : > { %2002 = vmatmul.mubr.bf16.gmra.mrb[4].mxu1 %v1207_v34  ;;  %2179 = vpow2.f32 %v993_v6  ;;  %v1017_v6 = vmul.f32 %v2787_v51, %v1001_v56  ;;  %v999_v34 = vld [vmem:[#allocation3 + $0x20] sm:$0xff] }
 0x283   : > { %v2170_v3 = vpop.eup %2169  ;;  %v991_v46 = vmul.f32 1.442695, %v961_v11  ;;  %v1015_v25 = vmul.f32 %v2781_v21, %v999_v34  ;;  %v1093_v34 = vld [vmem:[#allocation4 + $0x8] sm:$0xff] }
 0x284   : > { %1037 = vadd.xlane.f32.xlu1 %v2164_v19  ;;  %v1208_v9 = vpack.c.bf16 %v2168_v55, %v2170_v3  ;;  %v2172_v30 = vpop.eup %2171  ;;  %v2835_v45 = vpop.permute.xlu1 %1115 }
 0x285   : > { %2181 = vpow2.f32 %v991_v46  ;;  %v2837_v59 = vpop.permute.xlu0 %1125  ;;  %v1018_v46 = vmul.f32 %v2775_v40, %v1002_v35  ;;  %v1003_v40 = vld [vmem:[#allocation3 + $0x40] sm:$0xff]  ;;  %v1189_v35 = vmul.f32 %v2835_v45, %v1093_v34 }
 0x286   : > { %2005 = vmatprep.mubr.bf16.mxu1 %v1208_v9  ;;  %2183 = vpow2.f32 %v863_v39  ;;  %v1004_v39 = vld [vmem:[#allocation3 + $0x48] sm:$0xff] }
 0x287   : > { %v2174_v23 = vpop.eup %2173  ;;  %2185 = vpow2.f32 %v865_v32  ;;  %v1020_v14 = vmul.f32 %v2789_v52, %v1004_v39 }
 0x288   : > { %1049 = vadd.xlane.f32.xlu1 %v2172_v30  ;;  %1047 = vadd.xlane.f32.xlu0 %v2174_v23  ;;  %v1209_v57 = vpack.c.bf16 %v2172_v30, %v2174_v23  ;;  %v2176_v29 = vpop.eup %2175  ;;  %v2839_v10 = vpop.permute.xlu1 %1120  ;;  %v1000_v30 = vld [vmem:[#allocation3 + $0x28] sm:$0xff] }
 0x289   : > { %v2841_v61 = vpop.permute.xlu0 %1135  ;;  %v1016_v51 = vmul.f32 %v2767_v38, %v1000_v30  ;;  %v1019_v38 = vmul.f32 %v2799_v54, %v1003_v40  ;;  %v1008_v54 = vld [vmem:[#allocation3 + $0x68] sm:$0xff] }
 0x28a   : > { %2006 = vmatmul.mubr.bf16.gmra.mrb[8].mxu1 %v1209_v57 }
 0x28b   : > { %v2178_v12 = vpop.eup %2177 }
 0x28c   : > { %1045 = vadd.xlane.f32.xlu1 %v2168_v55  ;;  %1043 = vadd.xlane.f32.xlu0 %v2170_v3  ;;  %v1210_v47 = vpack.c.bf16 %v2176_v29, %v2178_v12  ;;  %v2180_v18 = vpop.eup %2179  ;;  %v2843_v44 = vpop.permute.xlu1 %1130 }
 0x28d   : > { %v2845_v58 = vpop.permute.xlu0 %1145 }
 0x28e   : > { %2009 = vmatprep.mubr.bf16.mxu1 %v1210_v47 }
 0x28f   : > { %v2182_v13 = vpop.eup %2181 }
 0x290   : > { %1057 = vadd.xlane.f32.xlu1 %v2180_v18  ;;  %1055 = vadd.xlane.f32.xlu0 %v2182_v13  ;;  %v1211_v37 = vpack.c.bf16 %v2180_v18, %v2182_v13  ;;  %v2827_v41 = vpop.eup %2183  ;;  %v2847_v60 = vpop.permute.xlu1 %1140 }
 0x291   : > { %v2830_v5 = vpop.eup %2185  ;;  %v2849_v63 = vpop.permute.xlu0 %1165 }
 0x292   : > { %2010 = vmatmul.mubr.bf16.gmra.mrb[12].mxu1 %v1211_v37 }
 0x294   : > { %1053 = vadd.xlane.f32.xlu1 %v2176_v29  ;;  %1051 = vadd.xlane.f32.xlu0 %v2178_v12  ;;  %v2851_v16 = vpop.permute.xlu1 %1160  ;;  %v1005_v29 = vld [vmem:[#allocation3 + $0x50] sm:$0xff]  ;;  %v1006_v12 = vld [vmem:[#allocation3 + $0x58] sm:$0xff] }
 0x295   : > { %v2853_v0 = vpop.permute.xlu0 %1155  ;;  %v1021_v21 = vmul.f32 %v2793_v42, %v1005_v29  ;;  %v1022_v18 = vmul.f32 %v2783_v26, %v1006_v12  ;;  %v1010_v42 = vld [vmem:[#allocation3 + $0x78] sm:$0xff] }
 0x296   : > { %v1026_v31 = vmul.f32 %v2830_v5, %v1010_v42 }
 0x298   : > { %v2855_v1 = vpop.permute.xlu1 %1150 }
 0x299   : > { %v2857_v4 = vpop.permute.xlu0 %1175 }
 0x29c   : > { %v2859_v7 = vpop.permute.xlu1 %1170 }
 0x2a5   : > { %1180 = vperm.xlu1 %2098, %v2827_v41  }
 0x2aa   : > { %1185 = vperm.xlu0 %2097, %v2830_v5   ;;  %v1094_v5 = vld [vmem:[#allocation4 + $0x10] sm:$0xff] }
 0x2f4   : > { %v1032_v2 = vpop.xlane.xlu0 %1031 }
 0x2f5   : > { %v1061_v15 = vadd.f32 %v1032_v2, %v1013_v8  ;;  %v1028_v19 = vpop.xlane.xlu1 %1027 }
 0x2f6   : > { %v1059_v20 = vadd.f32 %v1028_v19, %v1011_v17  ;;  %v1009_v17 = vld [vmem:[#allocation3 + $0x70] sm:$0xff] }
 0x2f7   : > { %1078 = vst.msk [vmem:[#allocation3 + $0x10] sm:$0xff] %vm1075_vm4, %v1061_v15  ;;  %v1025_v19 = vmul.f32 %v2827_v41, %v1009_v17 }
 0x2f8   : > { %1076 = vst.msk [vmem:[#allocation3] sm:$0xff] %vm1075_vm4, %v1059_v20 }
 0x2f9   : > { %v1034_v24 = vpop.xlane.xlu1 %1033 }
 0x2fa   : > { %v1062_v48 = vadd.f32 %v1034_v24, %v1014_v22 }
 0x2fc   : > { %1079 = vst.msk [vmem:[#allocation3 + $0x18] sm:$0xff] %vm1075_vm4, %v1062_v48  ;;  %v1030_v27 = vpop.xlane.xlu0 %1029  ;;  %v1023_v48 = vmul.f32 %v2802_v62, %v1007_v28 }
 0x2fd   : > { %v1060_v49 = vadd.f32 %v1030_v27, %v1012_v33  ;;  %v1024_v33 = vmul.f32 %v2795_v53, %v1008_v54  ;;  %v1104_v54 = vld [vmem:[#allocation4 + $0x60] sm:$0xff] }
 0x2ff   : > { %1077 = vst.msk [vmem:[#allocation3 + $0x8] sm:$0xff] %vm1075_vm4, %v1060_v49 }
 0x301   : > { %v1040_v50 = vpop.xlane.xlu0 %1039 }
 0x302   : > { %v1065_v11 = vadd.f32 %v1040_v50, %v1017_v6  ;;  %v1092_v6 = vld [vmem:[#allocation4] sm:$0xff]  ;;  %v1095_v50 = vld [vmem:[#allocation4 + $0x18] sm:$0xff] }
 0x303   : > { %v1191_v62 = vmul.f32 %v2837_v59, %v1095_v50  ;;  %v1099_v59 = vld [vmem:[#allocation4 + $0x38] sm:$0xff] }
 0x304   : > { %1082 = vst.msk [vmem:[#allocation3 + $0x30] sm:$0xff] %vm1075_vm4, %v1065_v11  ;;  %v1190_v11 = vmul.f32 %v2839_v10, %v1094_v5  ;;  %v1096_v10 = vld [vmem:[#allocation4 + $0x20] sm:$0xff] }
 0x305   : > { %v1036_v55 = vpop.xlane.xlu0 %1035  ;;  %v1192_v45 = vmul.f32 %v2843_v44, %v1096_v10  ;;  %v1103_v44 = vld [vmem:[#allocation4 + $0x58] sm:$0xff] }
 0x306   : > { %v1063_v3 = vadd.f32 %v1036_v55, %v1015_v25  ;;  %v1188_v25 = vmul.f32 %v2833_v43, %v1092_v6  ;;  %v1098_v43 = vld [vmem:[#allocation4 + $0x30] sm:$0xff] }
 0x307   : > { %v1194_v29 = vmul.f32 %v2847_v60, %v1098_v43  ;;  %v1100_v60 = vld [vmem:[#allocation4 + $0x40] sm:$0xff] }
 0x308   : > { %1080 = vst.msk [vmem:[#allocation3 + $0x20] sm:$0xff] %vm1075_vm4, %v1063_v3 }
 0x30d   : > { %v1042_v9 = vpop.xlane.xlu1 %1041 }
 0x30e   : > { %v1066_v23 = vadd.f32 %v1042_v9, %v1018_v46 }
 0x310   : > { %1083 = vst.msk [vmem:[#allocation3 + $0x38] sm:$0xff] %vm1075_vm4, %v1066_v23 }
 0x311   : > { %v1038_v57 = vpop.xlane.xlu1 %1037 }
 0x312   : > { %v1064_v47 = vadd.f32 %v1038_v57, %v1016_v51  ;;  %v1097_v57 = vld [vmem:[#allocation4 + $0x28] sm:$0xff] }
 0x314   : > { %1081 = vst.msk [vmem:[#allocation3 + $0x28] sm:$0xff] %vm1075_vm4, %v1064_v47  ;;  %v1195_v47 = vmul.f32 %v2845_v58, %v1099_v59  ;;  %v1101_v58 = vld [vmem:[#allocation4 + $0x48] sm:$0xff] }
 0x315   : > { %v1048_v13 = vpop.xlane.xlu0 %1047  ;;  %v1050_v37 = vpop.xlane.xlu1 %1049 }
 0x316   : > { %v1069_v32 = vadd.f32 %v1048_v13, %v1021_v21  ;;  %v1070_v36 = vadd.f32 %v1050_v37, %v1022_v18  ;;  %v1193_v13 = vmul.f32 %v2841_v61, %v1097_v57  ;;  %v1196_v61 = vmul.f32 %v2855_v1, %v1100_v60  ;;  %v1107_v1 = vld [vmem:[#allocation4 + $0x78] sm:$0xff] }
 0x318   : > { %1086 = vst.msk [vmem:[#allocation3 + $0x50] sm:$0xff] %vm1075_vm4, %v1069_v32  ;;  %1087 = vst.msk [vmem:[#allocation3 + $0x58] sm:$0xff] %vm1075_vm4, %v1070_v36  ;;  %v1102_v36 = vld [vmem:[#allocation4 + $0x50] sm:$0xff] }
 0x319   : > { %v1044_v8 = vpop.xlane.xlu0 %1043  ;;  %v1046_v2 = vpop.xlane.xlu1 %1045 }
 0x31a   : > { %v1067_v15 = vadd.f32 %v1044_v8, %v1019_v38  ;;  %v1068_v26 = vadd.f32 %v1046_v2, %v1020_v14  ;;  %v1198_v14 = vmul.f32 %v2851_v16, %v1102_v36  ;;  %v1199_v2 = vmul.f32 %v2849_v63, %v1103_v44 }
 0x31c   : > { %1084 = vst.msk [vmem:[#allocation3 + $0x40] sm:$0xff] %vm1075_vm4, %v1067_v15  ;;  %1085 = vst.msk [vmem:[#allocation3 + $0x48] sm:$0xff] %vm1075_vm4, %v1068_v26  ;;  %v1197_v15 = vmul.f32 %v2853_v0, %v1101_v58 }
 0x31d   : > { %v1056_v20 = vpop.xlane.xlu0 %1055  ;;  %v1058_v22 = vpop.xlane.xlu1 %1057 }
 0x31e   : > { %v1073_v24 = vadd.f32 %v1056_v20, %v1025_v19  ;;  %v1074_v52 = vadd.f32 %v1058_v22, %v1026_v31  ;;  %v1106_v22 = vld [vmem:[#allocation4 + $0x70] sm:$0xff] }
 0x320   : > { %1090 = vst.msk [vmem:[#allocation3 + $0x70] sm:$0xff] %vm1075_vm4, %v1073_v24  ;;  %1091 = vst.msk [vmem:[#allocation3 + $0x78] sm:$0xff] %vm1075_vm4, %v1074_v52  ;;  %v1105_v24 = vld [vmem:[#allocation4 + $0x68] sm:$0xff]  ;;  %v1200_v52 = vmul.f32 %v2859_v7, %v1104_v54 }
 0x321   : > { %v1052_v27 = vpop.xlane.xlu0 %1051  ;;  %v1054_v49 = vpop.xlane.xlu1 %1053 }
 0x322   : > { %v1071_v56 = vadd.f32 %v1052_v27, %v1023_v48  ;;  %v1072_v41 = vadd.f32 %v1054_v49, %v1024_v33 }
 0x324   : > { %1088 = vst.msk [vmem:[#allocation3 + $0x60] sm:$0xff] %vm1075_vm4, %v1071_v56  ;;  %1089 = vst.msk [vmem:[#allocation3 + $0x68] sm:$0xff] %vm1075_vm4, %v1072_v41  ;;  %v1201_v56 = vmul.f32 %v2857_v4, %v1105_v24 }
 0x325   : > { %v1181_v28 = vpop.permute.xlu1 %1180 }
 0x326   : > { %v1202_v0 = vmul.f32 %v1181_v28, %v1106_v22 }
 0x329   : > { %v1186_v63 = vpop.permute.xlu0 %1185 }
 0x32a   : > { %v1203_v33 = vmul.f32 %v1186_v63, %v1107_v1 }
 0x345   : > { %v1999_v55 = vpop.f32.mrb[0].mxu1 }
 0x346   : > { %v1375_v53 = vadd.f32 %v1999_v55, %v1190_v11  ;;  %v1310_v3 = vpop.f32.mrb[1].mxu1 }
 0x347   : > { %v1373_v46 = vadd.f32 %v1310_v3, %v1188_v25  ;;  %v2000_v9 = vpop.f32.mrb[2].mxu1 }
 0x348   : > { %1391 = vst.msk [vmem:[#allocation4 + $0x10] sm:$0xff] %vm522_vm2, %v1375_v53  ;;  %v1376_v30 = vadd.f32 %v2000_v9, %v1191_v62  ;;  %v1313_v23 = vpop.f32.mrb[3].mxu1 }
 0x349   : > { %1389 = vst.msk [vmem:[#allocation4] sm:$0xff] %vm522_vm2, %v1373_v46  ;;  %v1374_v51 = vadd.f32 %v1313_v23, %v1189_v35 }
 0x34a   : > { %1392 = vst.msk [vmem:[#allocation4 + $0x18] sm:$0xff] %vm522_vm2, %v1376_v30 }
 0x34b   : > { %1390 = vst.msk [vmem:[#allocation4 + $0x8] sm:$0xff] %vm522_vm2, %v1374_v51 }
 0x355   : > { %v2003_v12 = vpop.f32.mrb[4].mxu1 }
 0x356   : > { %v1379_v21 = vadd.f32 %v2003_v12, %v1194_v29  ;;  %v1326_v18 = vpop.f32.mrb[5].mxu1 }
 0x357   : > { %v1377_v37 = vadd.f32 %v1326_v18, %v1192_v45  ;;  %v2004_v40 = vpop.f32.mrb[6].mxu1 }
 0x358   : > { %1395 = vst.msk [vmem:[#allocation4 + $0x30] sm:$0xff] %vm522_vm2, %v1379_v21  ;;  %v1380_v39 = vadd.f32 %v2004_v40, %v1195_v47  ;;  %v1329_v32 = vpop.f32.mrb[7].mxu1 }
 0x359   : > { %1393 = vst.msk [vmem:[#allocation4 + $0x20] sm:$0xff] %vm522_vm2, %v1377_v37  ;;  %v1378_v38 = vadd.f32 %v1329_v32, %v1193_v13 }
 0x35a   : > { %1396 = vst.msk [vmem:[#allocation4 + $0x38] sm:$0xff] %vm522_vm2, %v1380_v39 }
 0x35b   : > { %1394 = vst.msk [vmem:[#allocation4 + $0x28] sm:$0xff] %vm522_vm2, %v1378_v38 }
 0x35d   : > { %v2007_v8 = vpop.f32.mrb[8].mxu1 }
 0x35e   : > { %v1383_v17 = vadd.f32 %v2007_v8, %v1198_v14  ;;  %v1342_v42 = vpop.f32.mrb[9].mxu1 }
 0x35f   : > { %v1381_v26 = vadd.f32 %v1342_v42, %v1196_v61  ;;  %v2008_v19 = vpop.f32.mrb[10].mxu1 }
 0x360   : > { %1399 = vst.msk [vmem:[#allocation4 + $0x50] sm:$0xff] %vm522_vm2, %v1383_v17  ;;  %v1384_v31 = vadd.f32 %v2008_v19, %v1199_v2  ;;  %v1345_v20 = vpop.f32.mrb[11].mxu1 }
 0x361   : > { %1397 = vst.msk [vmem:[#allocation4 + $0x40] sm:$0xff] %vm522_vm2, %v1381_v26  ;;  %v1382_v16 = vadd.f32 %v1345_v20, %v1197_v15 }
 0x362   : > { %1400 = vst.msk [vmem:[#allocation4 + $0x58] sm:$0xff] %vm522_vm2, %v1384_v31 }
 0x363   : > { %1398 = vst.msk [vmem:[#allocation4 + $0x48] sm:$0xff] %vm522_vm2, %v1382_v16 }
 0x365   : > { %v2011_v48 = vpop.f32.mrb[12].mxu1 }
 0x366   : > { %v1387_v27 = vadd.f32 %v2011_v48, %v1202_v0  ;;  %v1358_v49 = vpop.f32.mrb[13].mxu1 }
 0x367   : > { %v1385_v41 = vadd.f32 %v1358_v49, %v1200_v52  ;;  %v2012_v5 = vpop.f32.mrb[14].mxu1 }
 0x368   : > { %1403 = vst.msk [vmem:[#allocation4 + $0x70] sm:$0xff] %vm522_vm2, %v1387_v27  ;;  %v1388_v6 = vadd.f32 %v2012_v5, %v1203_v33  ;;  %v1361_v50 = vpop.f32.mrb[15].mxu1 }
 0x369   : > { %1401 = vst.msk [vmem:[#allocation4 + $0x60] sm:$0xff] %vm522_vm2, %v1385_v41  ;;  %v1386_v34 = vadd.f32 %v1361_v50, %v1201_v56 }
 0x36a   : > { %1404 = vst.msk [vmem:[#allocation4 + $0x78] sm:$0xff] %vm522_vm2, %v1388_v6 }
 0x36b   : > { %1402 = vst.msk [vmem:[#allocation4 + $0x68] sm:$0xff] %vm522_vm2, %v1386_v34 }
 0x36c PF: > { %p1880_p13 = scmp.ne.s32.totalorder %s2259_s12, 1 }
 0x36d   : > { %v1443_v7 = vld [vmem:[#allocation3 + $0x10] sm:$0xff] (!%p1880_p13)  ;;  %v1441_v11 = vld [vmem:[#allocation3] sm:$0xff] (!%p1880_p13)  ;;  %v1444_v4 = vld [vmem:[#allocation3 + $0x18] sm:$0xff] (!%p1880_p13)  ;;  %v2296_v25 = vmov (!%p1880_p13), 0   ;;  %vm1633_vm2 = vcmask (!%p1880_p13), 257024  }
 0x36e   : > { %1424 = sbr.rel (%p1880_p13) target bundleno = 1051 (0x41b), region = 44  ;;  %2188 = vset.pattern.permute.xlu1 (!%p1880_p13), %v2296_v25  ;;  %2187 = vset.pattern.permute.xlu0 (!%p1880_p13), %v2296_v25  ;;  %2189 = vrcp.f32 (!%p1880_p13), %v1443_v7  ;;  %v1442_v55 = vld [vmem:[#allocation3 + $0x8] sm:$0xff] (!%p1880_p13)  ;;  %v1445_v53 = vld [vmem:[#allocation3 + $0x20] sm:$0xff] (!%p1880_p13)  ;;  %v1448_v3 = vld [vmem:[#allocation3 + $0x38] sm:$0xff] (!%p1880_p13) }
 0x36f   : > { %2191 = vrcp.f32 (!%p1880_p13), %v1441_v11  ;;  %v1446_v62 = vld [vmem:[#allocation3 + $0x28] sm:$0xff] (!%p1880_p13)  ;;  %v1447_v35 = vld [vmem:[#allocation3 + $0x30] sm:$0xff] (!%p1880_p13)  ;;  %v1449_v51 = vld [vmem:[#allocation3 + $0x40] sm:$0xff] (!%p1880_p13) }
 0x370   : > { %2193 = vrcp.f32 (!%p1880_p13), %v1444_v4  ;;  %v1450_v30 = vld [vmem:[#allocation3 + $0x48] sm:$0xff] (!%p1880_p13)  ;;  %v1452_v10 = vld [vmem:[#allocation3 + $0x58] sm:$0xff] (!%p1880_p13)  ;;  %v1451_v57 = vld [vmem:[#allocation3 + $0x50] sm:$0xff] (!%p1880_p13) }
 0x371   : > { %2195 = vrcp.f32 (!%p1880_p13), %v1442_v55  ;;  %v1454_v45 = vld [vmem:[#allocation3 + $0x68] sm:$0xff] (!%p1880_p13)  ;;  %v1453_v47 = vld [vmem:[#allocation3 + $0x60] sm:$0xff] (!%p1880_p13)  ;;  %v1456_v18 = vld [vmem:[#allocation3 + $0x78] sm:$0xff] (!%p1880_p13) }
 0x372   : > { %2197 = vrcp.f32 (!%p1880_p13), %v1446_v62  ;;  %v1455_v37 = vld [vmem:[#allocation3 + $0x70] sm:$0xff] (!%p1880_p13)  ;;  %v1425_v14 = vld [vmem:[#allocation4] sm:$0xff] (!%p1880_p13)  ;;  %v1428_v42 = vld [vmem:[#allocation4 + $0x18] sm:$0xff] (!%p1880_p13) }
 0x373   : > { %2199 = vrcp.f32 (!%p1880_p13), %v1445_v53  ;;  %v1427_v58 = vld [vmem:[#allocation4 + $0x10] sm:$0xff] (!%p1880_p13)  ;;  %v1426_v26 = vld [vmem:[#allocation4 + $0x8] sm:$0xff] (!%p1880_p13)  ;;  %v1429_v1 = vld [vmem:[#allocation4 + $0x20] sm:$0xff] (!%p1880_p13) }
 0x374   : > { %2201 = vrcp.f32 (!%p1880_p13), %v1448_v3  ;;  %v1430_v16 = vld [vmem:[#allocation4 + $0x28] sm:$0xff] (!%p1880_p13)  ;;  %v1432_v33 = vld [vmem:[#allocation4 + $0x38] sm:$0xff] (!%p1880_p13)  ;;  %v1431_v49 = vld [vmem:[#allocation4 + $0x30] sm:$0xff] (!%p1880_p13) }
 0x375   : > { %2203 = vrcp.f32 %v1447_v35  ;;  %v1434_v34 = vld [vmem:[#allocation4 + $0x48] sm:$0xff]  ;;  %v1433_v11 = vld [vmem:[#allocation4 + $0x40] sm:$0xff]  ;;  %v1436_v3 = vld [vmem:[#allocation4 + $0x58] sm:$0xff] }
 0x376   : > { %2205 = vrcp.f32 %v1450_v30 }
 0x377   : > { %2207 = vrcp.f32 %v1449_v51 }
 0x378   : > { %v2190_v46 = vpop.eup %2189  ;;  %2209 = vrcp.f32 %v1452_v10  ;;  %v1438_v10 = vld [vmem:[#allocation4 + $0x68] sm:$0xff] }
 0x379   : > { %v2192_v9 = vpop.eup %2191  ;;  %1485 = vperm.xlu1 %2188, %v2190_v46   ;;  %2211 = vrcp.f32 %v1451_v57  ;;  %v1435_v46 = vld [vmem:[#allocation4 + $0x50] sm:$0xff]  ;;  %v1437_v57 = vld [vmem:[#allocation4 + $0x60] sm:$0xff] }
 0x37a   : > { %v2194_v23 = vpop.eup %2193  ;;  %1475 = vperm.xlu0 %2187, %v2192_v9   ;;  %2213 = vrcp.f32 %v1454_v45 }
 0x37b   : > { %v2196_v43 = vpop.eup %2195  ;;  %2215 = vrcp.f32 %v1453_v47 }
 0x37c   : > { %v2198_v59 = vpop.eup %2197  ;;  %2217 = vrcp.f32 %v1456_v18  ;;  %v1440_v18 = vld [vmem:[#allocation4 + $0x78] sm:$0xff] }
 0x37d   : > { %1490 = vperm.xlu1 %2188, %v2194_v23   ;;  %v2200_v29 = vpop.eup %2199  ;;  %2219 = vrcp.f32 %v1455_v37  ;;  %v1439_v37 = vld [vmem:[#allocation4 + $0x70] sm:$0xff] }
 0x37e   : > { %1480 = vperm.xlu0 %2187, %v2196_v43   ;;  %v2202_v12 = vpop.eup %2201 }
 0x37f   : > { %v2204_v21 = vpop.eup %2203 }
 0x380   : > { %v2206_v13 = vpop.eup %2205 }
 0x381   : > { %1500 = vperm.xlu1 %2188, %v2198_v59   ;;  %v2208_v40 = vpop.eup %2207 }
 0x382   : > { %1495 = vperm.xlu0 %2187, %v2200_v29   ;;  %v2210_v39 = vpop.eup %2209 }
 0x383   : > { %v2212_v32 = vpop.eup %2211 }
 0x384   : > { %v2214_v36 = vpop.eup %2213 }
 0x385   : > { %1510 = vperm.xlu1 %2188, %v2202_v12   ;;  %v2216_v38 = vpop.eup %2215 }
 0x386   : > { %1505 = vperm.xlu0 %2187, %v2204_v21   ;;  %v2218_v60 = vpop.eup %2217 }
 0x387   : > { %v2220_v44 = vpop.eup %2219 }
 0x389   : > { %1520 = vperm.xlu1 %2188, %v2206_v13  }
 0x38a   : > { %1515 = vperm.xlu0 %2187, %v2208_v40  }
 0x38d   : > { %1530 = vperm.xlu1 %2188, %v2210_v39  }
 0x38e   : > { %1525 = vperm.xlu0 %2187, %v2212_v32  }
 0x391   : > { %1540 = vperm.xlu1 %2188, %v2214_v36  }
 0x392   : > { %1535 = vperm.xlu0 %2187, %v2216_v38  }
 0x395   : > { %1550 = vperm.xlu1 %2188, %v2218_v60  }
 0x396   : > { %1545 = vperm.xlu0 %2187, %v2220_v44  }
 0x3f8   : > { %v1486_v61 = vpop.permute.xlu1 %1485 }
 0x3f9   : > { %v1555_v8 = vmul.f32 %v1486_v61, %v1427_v58  ;;  %v1476_v2 = vpop.permute.xlu0 %1475 }
 0x3fa   : > { %v1553_v17 = vmul.f32 %v1476_v2, %v1425_v14 }
 0x3fb   : > { %v1903_v15 = vpack.c.bf16 %v1555_v8, %v1555_v8 }
 0x3fc   : > { %v1901_v19 = vpack.c.bf16 %v1553_v17, %v1553_v17  ;;  %v1491_v31 = vpop.permute.xlu1 %1490 }
 0x3fd   : > { %1636 = vst.msk [vmem:[%s2389_s10 + $0x8] sm:$0xf] %vm1633_vm2, %v1903_v15  ;;  %v1556_v20 = vmul.f32 %v1491_v31, %v1428_v42  ;;  %v1481_v22 = vpop.permute.xlu0 %1480 }
 0x3fe   : > { %1634 = vst.msk [vmem:[%s2389_s10] sm:$0xf] %vm1633_vm2, %v1901_v19  ;;  %v1554_v28 = vmul.f32 %v1481_v22, %v1426_v26 }
 0x3ff   : > { %v1904_v54 = vpack.c.bf16 %v1556_v20, %v1556_v20 }
 0x400   : > { %v1902_v63 = vpack.c.bf16 %v1554_v28, %v1554_v28  ;;  %v1501_v24 = vpop.permute.xlu1 %1500 }
 0x401   : > { %1637 = vst.msk [vmem:[%s2389_s10 + $0xc] sm:$0xf] %vm1633_vm2, %v1904_v54  ;;  %v1558_v0 = vmul.f32 %v1501_v24, %v1430_v16  ;;  %v1496_v52 = vpop.permute.xlu0 %1495 }
 0x402   : > { %1635 = vst.msk [vmem:[%s2389_s10 + $0x4] sm:$0xf] %vm1633_vm2, %v1902_v63  ;;  %v1557_v48 = vmul.f32 %v1496_v52, %v1429_v1 }
 0x403   : > { %v1906_v27 = vpack.c.bf16 %v1558_v0, %v1558_v0 }
 0x404   : > { %v1905_v56 = vpack.c.bf16 %v1557_v48, %v1557_v48  ;;  %v1511_v41 = vpop.permute.xlu1 %1510 }
 0x405   : > { %1639 = vst.msk [vmem:[%s2389_s10 + $0x14] sm:$0xf] %vm1633_vm2, %v1906_v27  ;;  %v1560_v5 = vmul.f32 %v1511_v41, %v1432_v33  ;;  %v1506_v6 = vpop.permute.xlu0 %1505 }
 0x406   : > { %1638 = vst.msk [vmem:[%s2389_s10 + $0x10] sm:$0xf] %vm1633_vm2, %v1905_v56  ;;  %v1559_v50 = vmul.f32 %v1506_v6, %v1431_v49 }
 0x407   : > { %v1908_v7 = vpack.c.bf16 %v1560_v5, %v1560_v5 }
 0x408   : > { %v1907_v4 = vpack.c.bf16 %v1559_v50, %v1559_v50  ;;  %v1521_v25 = vpop.permute.xlu1 %1520 }
 0x409   : > { %1641 = vst.msk [vmem:[%s2389_s10 + $0x1c] sm:$0xf] %vm1633_vm2, %v1908_v7  ;;  %v1562_v55 = vmul.f32 %v1521_v25, %v1434_v34  ;;  %v1516_v62 = vpop.permute.xlu0 %1515 }
 0x40a   : > { %1640 = vst.msk [vmem:[%s2389_s10 + $0x18] sm:$0xf] %vm1633_vm2, %v1907_v4  ;;  %v1561_v53 = vmul.f32 %v1516_v62, %v1433_v11 }
 0x40b   : > { %v1910_v35 = vpack.c.bf16 %v1562_v55, %v1562_v55 }
 0x40c   : > { %v1909_v9 = vpack.c.bf16 %v1561_v53, %v1561_v53  ;;  %v1531_v30 = vpop.permute.xlu1 %1530 }
 0x40d   : > { %1643 = vst.msk [vmem:[%s2389_s10 + $0x24] sm:$0xf] %vm1633_vm2, %v1910_v35  ;;  %v1564_v23 = vmul.f32 %v1531_v30, %v1436_v3  ;;  %v1526_v51 = vpop.permute.xlu0 %1525 }
 0x40e   : > { %1642 = vst.msk [vmem:[%s2389_s10 + $0x20] sm:$0xf] %vm1633_vm2, %v1909_v9  ;;  %v1563_v43 = vmul.f32 %v1526_v51, %v1435_v46 }
 0x40f   : > { %v1912_v59 = vpack.c.bf16 %v1564_v23, %v1564_v23 }
 0x410   : > { %v1911_v29 = vpack.c.bf16 %v1563_v43, %v1563_v43  ;;  %v1541_v45 = vpop.permute.xlu1 %1540 }
 0x411   : > { %1645 = vst.msk [vmem:[%s2389_s10 + $0x2c] sm:$0xf] %vm1633_vm2, %v1912_v59  ;;  %v1566_v12 = vmul.f32 %v1541_v45, %v1438_v10  ;;  %v1536_v47 = vpop.permute.xlu0 %1535 }
 0x412   : > { %1644 = vst.msk [vmem:[%s2389_s10 + $0x28] sm:$0xf] %vm1633_vm2, %v1911_v29  ;;  %v1565_v21 = vmul.f32 %v1536_v47, %v1437_v57 }
 0x413   : > { %v1914_v13 = vpack.c.bf16 %v1566_v12, %v1566_v12 }
 0x414   : > { %v1913_v40 = vpack.c.bf16 %v1565_v21, %v1565_v21  ;;  %v1551_v39 = vpop.permute.xlu1 %1550 }
 0x415   : > { %1647 = vst.msk [vmem:[%s2389_s10 + $0x34] sm:$0xf] %vm1633_vm2, %v1914_v13  ;;  %v1568_v32 = vmul.f32 %v1551_v39, %v1440_v18  ;;  %v1546_v36 = vpop.permute.xlu0 %1545 }
 0x416   : > { %1646 = vst.msk [vmem:[%s2389_s10 + $0x30] sm:$0xf] %vm1633_vm2, %v1913_v40  ;;  %v1567_v38 = vmul.f32 %v1546_v36, %v1439_v37 }
 0x417   : > { %v1916_v60 = vpack.c.bf16 %v1568_v32, %v1568_v32 }
 0x418   : > { %v1915_v44 = vpack.c.bf16 %v1567_v38, %v1567_v38 }
 0x419   : > { %1649 = vst.msk [vmem:[%s2389_s10 + $0x3c] sm:$0xf] %vm1633_vm2, %v1916_v60 }
 0x41a   : > { %1648 = vst.msk [vmem:[%s2389_s10 + $0x38] sm:$0xf] %vm1633_vm2, %v1915_v44 }
 0x41b PF: > { %s13_s20 = sadd.s32 1, %s2291_s20   ;;  %s2989_s27 = sld [smem:[#allocation5_spill]] }
 0x41c   : > { %p10_p0 = scmp.ge.s32.totalorder %s13_s20, 34   ;;  %s2990_s29 = sld [smem:[#allocation6_spill]] }
 0x41d   : > { %s2991_s12 = smov %s2275_s16  ;;  %s2992_s13 = smov %s2279_s17 }
 0x41e   : > { %s2993_s14 = smov %s2283_s18  ;;  %s2994_s15 = smov %s2287_s19 }
 0x41f   : > { %s2995_s16 = smov %s3000_s21  ;;  %s2996_s17 = smov %s3004_s22 }
 0x420   :  { %12 = sbr.rel (!%p10_p0) target bundleno = 5 (0x5), region = 80 }
 0x421   : > { %s2997_s18 = smov %s2989_s27 }
 0x422   : > { %s2998_s19 = smov %s2990_s29 }

// kernel: transformer_block.3
= control target key start
LH: loop header
LB: loop body
LE: loop exit
PB: predicated region body
PF: predicated region fallthrough
CT: control target
= control target key end

     0   :  { %s2321_s27 = smov 0   ;;  %s2323_s28 = smov 0   ;;  %s2907_s0 = inlined_call_operand.vmem [shape: f32[2,256,128], index: 0, kind: input, shape index: {}]   ;;  %s2908_s1 = inlined_call_operand.vmem [shape: bf16[128,384], index: 1, kind: input, shape index: {}]   ;;  %s2909_s2 = inlined_call_operand.vmem [shape: f32[1,128], index: 2, kind: input, shape index: {}]   ;;  %s2910_s3 = inlined_call_operand.vmem [shape: f32[256,128], index: 3, kind: input, shape index: {}]   ;;  %s2911_s4 = inlined_call_operand.vmem [shape: f32[256,128], index: 4, kind: input, shape index: {}]   ;;  %s2912_s5 = inlined_call_operand.vmem [shape: f32[256,128], index: 5, kind: input, shape index: {}]   ;;  %s2913_s6 = inlined_call_operand.vmem [shape: bf16[2,256,128], index: 6, kind: output, shape index: {0}]   ;;  %s2914_s7 = inlined_call_operand.vmem [shape: bf16[2,256,128], index: 7, kind: output, shape index: {1}]   ;;  %s2915_s8 = inlined_call_operand.vmem [shape: bf16[2,256,128], index: 8, kind: output, shape index: {2}]  }
   0x1   :  { %s2325_s29 = smov 0   ;;  %s2327_s30 = smov 0  }
   0x2   :  { %s2329_s9 = smov 0  }
   0x3 LB: > { %s28_s10 = sadd.s32 1, %s2263_s29  ;;  %s31_s11 = sadd.s32 1, %s2267_s30  ;;  %s2271_s9 = sphi %s2329_s9, %s19_s9   ;;  %s2267_s30 = sphi %s2327_s30, %s2919_s30   ;;  %s2263_s29 = sphi %s2325_s29, %s2918_s29   ;;  %s2259_s28 = sphi %s2323_s28, %s2917_s28   ;;  %s2255_s27 = sphi %s2321_s27, %s2916_s27  }
   0x4   : > { %p29_p0 = scmp.ge.s32.totalorder %s28_s10, 2  ;;  %p1795_p1 = scmp.ge.s32.totalorder %s2271_s9, 1 }
   0x5   : > { %p325_p2 = scmp.lt.s32.totalorder %s2271_s9, 5 }
   0x6   : > { %s2921_s10 = smov (%p29_p0, %s28_s10), 0  ;;  %s2923_s11 = smov (!%p29_p0, %s31_s11), %s2267_s30 }
   0x7   : > { %p326_p3 = pnand %p1795_p1, %p325_p2  ;;  %p33_p4 = scmp.ge.s32.totalorder %s2923_s11, 2 }
   0x8   : > { %s1796_s12 = sshll.u32 (!%p326_p3), %s2255_s27, 4  ;;  %p401_p5 = scmp.lt.s32.totalorder (!%p326_p3), %s2259_s28, 1  ;;  %v2169_v0 = vld [vmem:[%s2908_s1 + $0x4] ss:$12 sps:$4 sm:$0xff] (!%p326_p3)   ;;  %v2171_v1 = vld [vmem:[%s2908_s1] ss:$12 sps:$4 sm:$0xff] (!%p326_p3)  }
   0x9   : > { %s2925_s11 = smov (%p33_p4, %s2923_s11), 0  ;;  %329 = sbr.rel (%p326_p3) target bundleno = 654 (0x28e), region = 44 }
   0xa   : > { %p403_p6 = scmp.lt.s32.totalorder (!%p326_p3), %s1796_s12, 31  ;;  %779 = vmatprep.subr.bf16.mxu0 (!%p326_p3), %v2169_v0  ;;  %v2172_v2 = vld [vmem:[%s2908_s1 + $0x1c] ss:$12 sps:$4 sm:$0xff] (!%p326_p3)   ;;  %v2174_v3 = vld [vmem:[%s2908_s1 + $0x18] ss:$12 sps:$4 sm:$0xff] (!%p326_p3)   ;;  %v2273_v50 = vmov (!%p326_p3), 0  }
   0xb   : > { %780 = vmatpush1.bf16.msra.mxu0 (!%p326_p3), %v2171_v1  ;;  %v2175_v26 = vld [vmem:[%s2908_s1 + $0x34] ss:$12 sps:$4 sm:$0xff] (!%p326_p3)   ;;  %v2177_v27 = vld [vmem:[%s2908_s1 + $0x30] ss:$12 sps:$4 sm:$0xff] (!%p326_p3)   ;;  %v2179_v33 = vld [vmem:[%s2908_s1 + $0x4c] ss:$12 sps:$4 sm:$0xff] (!%p326_p3)   ;;  %811 = vmatprep.mubr.bf16.mxu0 (!%p326_p3), %v2273_v50 }
   0xc   : > { %781 = vmatprep.subr.bf16.mxu0 (!%p326_p3), %v2172_v2  ;;  %v2178_v28 = vld [vmem:[%s2908_s1 + $0x8] ss:$12 sps:$4 sm:$0xff] (!%p326_p3)   ;;  %v2182_v35 = vld [vmem:[%s2908_s1 + $0x20] ss:$12 sps:$4 sm:$0xff] (!%p326_p3)   ;;  %v2183_v40 = vld [vmem:[%s2908_s1 + $0x64] ss:$12 sps:$4 sm:$0xff] (!%p326_p3)  }
   0xd   : > { %2094 = vmatprep.subr.bf16.mxu1 (!%p326_p3), %v2178_v28  ;;  %v2181_v34 = vld [vmem:[%s2908_s1 + $0x48] ss:$12 sps:$4 sm:$0xff] (!%p326_p3)   ;;  %v2185_v41 = vld [vmem:[%s2908_s1 + $0x60] ss:$12 sps:$4 sm:$0xff] (!%p326_p3)   ;;  %v2186_v42 = vld [vmem:[%s2908_s1 + $0x38] ss:$12 sps:$4 sm:$0xff] (!%p326_p3)  }
   0xe   : > { %2095 = vmatpush3.bf16.msra.mxu1 (!%p326_p3), %v2178_v28  ;;  %v2187_v43 = vld [vmem:[%s2908_s1 + $0x7c] ss:$12 sps:$4 sm:$0xff] (!%p326_p3)   ;;  %v2189_v47 = vld [vmem:[%s2908_s1 + $0x78] ss:$12 sps:$4 sm:$0xff] (!%p326_p3)   ;;  %v2191_v48 = vld [vmem:[%s2908_s1 + $0x94] ss:$12 sps:$4 sm:$0xff] (!%p326_p3)  }
   0xf   : > { %782 = vmatpush1.bf16.msra.mxu0 (!%p326_p3), %v2174_v3  ;;  %2096 = vmatprep.subr.bf16.mxu1 (!%p326_p3), %v2182_v35  ;;  %v2190_v44 = vld [vmem:[%s2908_s1 + $0x50] ss:$12 sps:$4 sm:$0xff] (!%p326_p3)   ;;  %v2194_v49 = vld [vmem:[%s2908_s1 + $0x68] ss:$12 sps:$4 sm:$0xff] (!%p326_p3)   ;;  %v2195_v52 = vld [vmem:[%s2908_s1 + $0xac] ss:$12 sps:$4 sm:$0xff] (!%p326_p3)  }
  0x10   : > { %s2927_s28 = smov (!%p401_p5, %s2259_s28), 1  ;;  %s2929_s12 = smov (!%p403_p6, %s1796_s12), 31  ;;  %783 = vmatprep.subr.bf16.mxu0 %v2175_v26  ;;  %v2193_v51 = vld [vmem:[%s2908_s1 + $0x90] ss:$12 sps:$4 sm:$0xff]   ;;  %v2198_v53 = vld [vmem:[%s2908_s1 + $0x80] ss:$12 sps:$4 sm:$0xff]  }
  0x11   : > { %s1797_s21 = sshll.u32 %s2927_s28, 5  ;;  %v2197_v54 = vld [vmem:[%s2908_s1 + $0xa8] ss:$12 sps:$4 sm:$0xff]   ;;  %v2199_v55 = vld [vmem:[%s2908_s1 + $0x98] ss:$12 sps:$4 sm:$0xff]   ;;  %s2274_s25 = smov 127  }
  0x12   : > { %s2366_s22 = sadd.s32 %s1797_s21, %s2929_s12  ;;  %2097 = vmatpush3.bf16.msra.mxu1 %v2182_v35  ;;  %v2200_v56 = vld [vmem:[%s2908_s1 + $0xb0] ss:$12 sps:$4 sm:$0xff]   ;;  %s2275_s13 = smov 1  }
  0x13   : > { %s1798_s23 = sshll.u32 %s2366_s22, 3  ;;  %784 = vmatpush1.bf16.msra.mxu0 %v2177_v27  ;;  %2098 = vmatprep.subr.bf16.mxu1 %v2186_v42  ;;  %s2562_s24 = sshll.u32 %s2366_s22, 2 }
  0x14   : > { %s2372_s26 = scalar_lea.vmem %s2907_s0, %s1798_s23  ;;  %785 = vmatprep.subr.bf16.mxu0 %v2179_v33  ;;  %s2578_s22 = scalar_lea.vmem %s2915_s8, %s2562_s24 }
  0x15   : > { %v2375_v4 = vld [vmem:[%s2372_s26] sm:$0xff]  ;;  %v2378_v5 = vld [vmem:[%s2372_s26 + $0x8] sm:$0xff]  ;;  %v2381_v6 = vld [vmem:[%s2372_s26 + $0x10] sm:$0xff]  ;;  %s1800_s14 = sshll.u32 %s2929_s12, 3  ;;  %s2796_s27 = scalar_lea.vmem %s2913_s6, %s2562_s24 }
  0x16   : > { %v475_v7 = vmul.f32 %v2375_v4, %v2375_v4  ;;  %v477_v8 = vmul.f32 %v2381_v6, %v2381_v6  ;;  %v2388_v9 = vld [vmem:[%s2372_s26 + $0x18] sm:$0xff]  ;;  %v476_v10 = vmul.f32 %v2378_v5, %v2378_v5  ;;  %v2395_v12 = vld [vmem:[%s2372_s26 + $0x28] sm:$0xff]  ;;  %v2398_v13 = vld [vmem:[%s2372_s26 + $0x20] sm:$0xff]  ;;  %2099 = vmatpush3.bf16.msra.mxu1 %v2186_v42  ;;  %s2765_s19 = scalar_lea.vmem %s2910_s3, %s1800_s14  ;;  %s2772_s21 = scalar_lea.vmem %s2912_s5, %s1800_s14 }
  0x17   : > { %v478_v11 = vmul.f32 %v2388_v9, %v2388_v9  ;;  %v2401_v14 = vld [vmem:[%s2372_s26 + $0x38] sm:$0xff]  ;;  %v2404_v15 = vld [vmem:[%s2372_s26 + $0x30] sm:$0xff]  ;;  %v480_v16 = vmul.f32 %v2395_v12, %v2395_v12  ;;  %v479_v17 = vmul.f32 %v2398_v13, %v2398_v13  ;;  %v2415_v20 = vld [vmem:[%s2372_s26 + $0x48] sm:$0xff]  ;;  %786 = vmatpush1.bf16.msra.mxu0 %v2181_v34  ;;  %2100 = vmatprep.subr.bf16.mxu1 %v2190_v44 }
  0x18   : > { %491 = vadd.xlane.f32.xlu0 %v475_v7  ;;  %495 = vadd.xlane.f32.xlu1 %v477_v8  ;;  %v482_v18 = vmul.f32 %v2401_v14, %v2401_v14  ;;  %v481_v19 = vmul.f32 %v2404_v15, %v2404_v15  ;;  %v2418_v21 = vld [vmem:[%s2372_s26 + $0x40] sm:$0xff]  ;;  %v484_v22 = vmul.f32 %v2415_v20, %v2415_v20  ;;  %v2425_v24 = vld [vmem:[%s2372_s26 + $0x58] sm:$0xff]  ;;  %v2428_v25 = vld [vmem:[%s2372_s26 + $0x50] sm:$0xff] }
  0x19   : > { %v483_v23 = vmul.f32 %v2418_v21, %v2418_v21  ;;  %v486_v29 = vmul.f32 %v2425_v24, %v2425_v24  ;;  %v485_v30 = vmul.f32 %v2428_v25, %v2428_v25  ;;  %v2444_v31 = vld [vmem:[%s2372_s26 + $0x68] sm:$0xff]  ;;  %v2447_v32 = vld [vmem:[%s2372_s26 + $0x60] sm:$0xff]  ;;  %v2463_v38 = vld [vmem:[%s2372_s26 + $0x78] sm:$0xff]  ;;  %787 = vmatprep.subr.bf16.mxu0 %v2183_v40 }
  0x1a   : > { %v488_v36 = vmul.f32 %v2444_v31, %v2444_v31  ;;  %v487_v37 = vmul.f32 %v2447_v32, %v2447_v32  ;;  %v2466_v39 = vld [vmem:[%s2372_s26 + $0x70] sm:$0xff]  ;;  %v490_v45 = vmul.f32 %v2463_v38, %v2463_v38  ;;  %2101 = vmatpush3.bf16.msra.mxu1 %v2190_v44  ;;  %v2520_v42 = vld [vmem:[%s2909_s2] ss:$0 sm:$0xff]  ;;  %s2760_s26 = scalar_lea.vmem %s2911_s4, %s1800_s14  ;;  %s2805_s14 = scalar_lea.vmem %s2914_s7, %s2562_s24 }
  0x1b   : > { %v489_v46 = vmul.f32 %v2466_v39, %v2466_v39  ;;  %788 = vmatpush1.bf16.msra.mxu0 %v2185_v41  ;;  %2102 = vmatprep.subr.bf16.mxu1 %v2194_v49 }
  0x1c   : > { %493 = vadd.xlane.f32.xlu0 %v476_v10  ;;  %497 = vadd.xlane.f32.xlu1 %v478_v11 }
  0x1d   : > { %789 = vmatprep.subr.bf16.mxu0 %v2187_v43 }
  0x1e   : > { %2103 = vmatpush3.bf16.msra.mxu1 %v2194_v49 }
  0x1f   : > { %790 = vmatpush1.bf16.msra.mxu0 %v2189_v47  ;;  %2104 = vmatprep.subr.bf16.mxu1 %v2198_v53 }
  0x20   : > { %501 = vadd.xlane.f32.xlu1 %v480_v16  ;;  %499 = vadd.xlane.f32.xlu0 %v479_v17 }
  0x21   : > { %791 = vmatprep.subr.bf16.mxu0 %v2191_v48 }
  0x22   : > { %2105 = vmatpush3.bf16.msra.mxu1 %v2198_v53 }
  0x23   : > { %792 = vmatpush1.bf16.msra.mxu0 %v2193_v51  ;;  %2106 = vmatprep.subr.bf16.mxu1 %v2199_v55 }
  0x24   : > { %505 = vadd.xlane.f32.xlu1 %v482_v18  ;;  %503 = vadd.xlane.f32.xlu0 %v481_v19 }
  0x25   : > { %793 = vmatprep.subr.bf16.mxu0 %v2195_v52 }
  0x26   : > { %2107 = vmatpush3.bf16.msra.mxu1 %v2199_v55 }
  0x27   : > { %794 = vmatpush1.bf16.msra.mxu0 %v2197_v54  ;;  %2108 = vmatprep.subr.bf16.mxu1 %v2200_v56 }
  0x28   : > { %509 = vadd.xlane.f32.xlu1 %v484_v22  ;;  %507 = vadd.xlane.f32.xlu0 %v483_v23 }
  0x2a   : > { %2109 = vmatpush3.bf16.msra.mxu1 %v2200_v56 }
  0x2c   : > { %513 = vadd.xlane.f32.xlu1 %v486_v29  ;;  %511 = vadd.xlane.f32.xlu0 %v485_v30 }
  0x30   : > { %517 = vadd.xlane.f32.xlu1 %v488_v36  ;;  %515 = vadd.xlane.f32.xlu0 %v487_v37 }
  0x34   : > { %521 = vadd.xlane.f32.xlu1 %v490_v45  ;;  %519 = vadd.xlane.f32.xlu0 %v489_v46 }
  0xa5   : > { %v492_v57 = vpop.xlane.xlu0 %491  ;;  %v496_v58 = vpop.xlane.xlu1 %495 }
  0xa6   : > { %v524_v59 = vmul.f32 0.0078125, %v492_v57  ;;  %v526_v60 = vmul.f32 0.0078125, %v496_v58 }
  0xa8   : > { %v540_v61 = vadd.f32 1e-05, %v524_v59  ;;  %v542_v62 = vadd.f32 1e-05, %v526_v60 }
  0xa9   : > { %v494_v63 = vpop.xlane.xlu0 %493  ;;  %v498_v0 = vpop.xlane.xlu1 %497 }
  0xaa   : > { %2201 = vrsqrt.f32 %v540_v61  ;;  %v525_v1 = vmul.f32 0.0078125, %v494_v63  ;;  %v527_v2 = vmul.f32 0.0078125, %v498_v0 }
  0xab   : > { %2203 = vrsqrt.f32 %v542_v62 }
  0xac   : > { %v541_v3 = vadd.f32 1e-05, %v525_v1  ;;  %v543_v7 = vadd.f32 1e-05, %v527_v2 }
  0xad   : > { %v502_v8 = vpop.xlane.xlu1 %501  ;;  %v500_v10 = vpop.xlane.xlu0 %499 }
  0xae   : > { %2205 = vrsqrt.f32 %v541_v3  ;;  %v529_v11 = vmul.f32 0.0078125, %v502_v8  ;;  %v528_v16 = vmul.f32 0.0078125, %v500_v10 }
  0xaf   : > { %2207 = vrsqrt.f32 %v543_v7 }
  0xb0   : > { %v545_v17 = vadd.f32 1e-05, %v529_v11  ;;  %v544_v18 = vadd.f32 1e-05, %v528_v16 }
  0xb1   : > { %v506_v19 = vpop.xlane.xlu1 %505  ;;  %v504_v22 = vpop.xlane.xlu0 %503 }
  0xb2   : > { %2209 = vrsqrt.f32 %v545_v17  ;;  %v531_v23 = vmul.f32 0.0078125, %v506_v19  ;;  %v530_v26 = vmul.f32 0.0078125, %v504_v22 }
  0xb3   : > { %2211 = vrsqrt.f32 %v544_v18 }
  0xb4   : > { %v2202_v27 = vpop.eup %2201  ;;  %v547_v28 = vadd.f32 1e-05, %v531_v23  ;;  %v546_v29 = vadd.f32 1e-05, %v530_v26 }
  0xb5   : > { %v2204_v30 = vpop.eup %2203  ;;  %v510_v33 = vpop.xlane.xlu1 %509  ;;  %v572_v40 = vmul.f32 %v2202_v27, %v2375_v4 }
  0xb6   : > { %v508_v34 = vpop.xlane.xlu0 %507  ;;  %v574_v35 = vmul.f32 %v2204_v30, %v2381_v6  ;;  %2213 = vrsqrt.f32 %v547_v28  ;;  %v533_v36 = vmul.f32 0.0078125, %v510_v33 }
  0xb7   : > { %v532_v37 = vmul.f32 0.0078125, %v508_v34  ;;  %2215 = vrsqrt.f32 %v546_v29  ;;  %v595_v52 = vmul.f32 %v2520_v42, %v572_v40 }
  0xb8   : > { %v2206_v41 = vpop.eup %2205  ;;  %v549_v43 = vadd.f32 1e-05, %v533_v36  ;;  %v597_v47 = vmul.f32 %v2520_v42, %v574_v35 }
  0xb9   : > { %v548_v44 = vadd.f32 1e-05, %v532_v37  ;;  %v2208_v45 = vpop.eup %2207  ;;  %v573_v46 = vmul.f32 %v2206_v41, %v2378_v5  ;;  %v514_v6 = vpop.xlane.xlu1 %513 }
  0xba   : > { %v512_v48 = vpop.xlane.xlu0 %511  ;;  %v575_v49 = vmul.f32 %v2208_v45, %v2388_v9  ;;  %2217 = vrsqrt.f32 %v549_v43  ;;  %v535_v4 = vmul.f32 0.0078125, %v514_v6 }
  0xbb   : > { %v534_v51 = vmul.f32 0.0078125, %v512_v48  ;;  %v596_v53 = vmul.f32 %v2520_v42, %v573_v46  ;;  %2219 = vrsqrt.f32 %v548_v44 }
  0xbc   : > { %v2210_v54 = vpop.eup %2209  ;;  %v598_v55 = vmul.f32 %v2520_v42, %v575_v49  ;;  %v551_v56 = vadd.f32 1e-05, %v535_v4 }
  0xbd   : > { %v550_v57 = vadd.f32 1e-05, %v534_v51  ;;  %v2212_v5 = vpop.eup %2211  ;;  %v611_v58 = vpack.c.bf16 %v596_v53, %v595_v52  ;;  %v577_v59 = vmul.f32 %v2210_v54, %v2395_v12  ;;  %v518_v60 = vpop.xlane.xlu1 %517 }
  0xbe   : > { %v516_v61 = vpop.xlane.xlu0 %515  ;;  %v612_v9 = vpack.c.bf16 %v598_v55, %v597_v47  ;;  %v576_v62 = vmul.f32 %v2212_v5, %v2398_v13  ;;  %2221 = vrsqrt.f32 %v551_v56  ;;  %v537_v63 = vmul.f32 0.0078125, %v518_v60 }
  0xbf   : > { %812 = vmatmul.mubr.bf16.vlgmr.msra.gmra.mrb[0].mxu0 %v611_v58  ;;  %2110 = vmatprep.mubr.bf16.mxu1 %v611_v58  ;;  %v600_v0 = vmul.f32 %v2520_v42, %v577_v59  ;;  %2223 = vrsqrt.f32 %v550_v57  ;;  %v536_v1 = vmul.f32 0.0078125, %v516_v61 }
  0xc0   : > { %v2214_v2 = vpop.eup %2213  ;;  %821 = vmatprep.mubr.bf16.mxu0 %v2273_v50  ;;  %2111 = vmatmul.mubr.bf16.vlgmr.msra.gmra.mrb[0].mxu1 %v612_v9  ;;  %v599_v3 = vmul.f32 %v2520_v42, %v576_v62  ;;  %v553_v12 = vadd.f32 1e-05, %v537_v63 }
  0xc1   : > { %v2216_v7 = vpop.eup %2215  ;;  %v579_v8 = vmul.f32 %v2214_v2, %v2401_v14  ;;  %v552_v10 = vadd.f32 1e-05, %v536_v1  ;;  %v522_v13 = vpop.xlane.xlu1 %521 }
  0xc2   : > { %v520_v11 = vpop.xlane.xlu0 %519  ;;  %v613_v16 = vpack.c.bf16 %v600_v0, %v599_v3  ;;  %v578_v17 = vmul.f32 %v2216_v7, %v2404_v15  ;;  %2225 = vrsqrt.f32 %v553_v12  ;;  %v539_v18 = vmul.f32 0.0078125, %v522_v13 }
  0xc3   : > { %v602_v19 = vmul.f32 %v2520_v42, %v579_v8  ;;  %2227 = vrsqrt.f32 %v552_v10  ;;  %v538_v22 = vmul.f32 0.0078125, %v520_v11 }
  0xc4   : > { %v2218_v23 = vpop.eup %2217  ;;  %2114 = vmatprep.mubr.bf16.mxu1 %v613_v16  ;;  %v601_v26 = vmul.f32 %v2520_v42, %v578_v17  ;;  %v555_v27 = vadd.f32 1e-05, %v539_v18 }
  0xc5   : > { %v2220_v28 = vpop.eup %2219  ;;  %v581_v14 = vmul.f32 %v2218_v23, %v2415_v20  ;;  %v554_v29 = vadd.f32 1e-05, %v538_v22 }
  0xc6   : > { %v614_v30 = vpack.c.bf16 %v602_v19, %v601_v26  ;;  %v580_v33 = vmul.f32 %v2220_v28, %v2418_v21  ;;  %2229 = vrsqrt.f32 %v555_v27 }
  0xc7   : > { %822 = vmatmul.mubr.bf16.gmra.mrb[4].mxu0 %v612_v9  ;;  %v604_v15 = vmul.f32 %v2520_v42, %v581_v14  ;;  %2231 = vrsqrt.f32 %v554_v29 }
  0xc8   : > { %v2222_v34 = vpop.eup %2221  ;;  %831 = vmatprep.mubr.bf16.mxu0 %v2273_v50  ;;  %2115 = vmatmul.mubr.bf16.gmra.mrb[4].mxu1 %v614_v30  ;;  %v603_v35 = vmul.f32 %v2520_v42, %v580_v33 }
  0xc9   : > { %v2224_v36 = vpop.eup %2223  ;;  %v583_v37 = vmul.f32 %v2222_v34, %v2425_v24 }
  0xca   : > { %v615_v40 = vpack.c.bf16 %v604_v15, %v603_v35  ;;  %v582_v20 = vmul.f32 %v2224_v36, %v2428_v25 }
  0xcb   : > { %v606_v41 = vmul.f32 %v2520_v42, %v583_v37 }
  0xcc   : > { %v2226_v21 = vpop.eup %2225  ;;  %2118 = vmatprep.mubr.bf16.mxu1 %v615_v40  ;;  %v605_v43 = vmul.f32 %v2520_v42, %v582_v20 }
  0xcd   : > { %v2228_v44 = vpop.eup %2227  ;;  %v585_v45 = vmul.f32 %v2226_v21, %v2444_v31 }
  0xce   : > { %v616_v46 = vpack.c.bf16 %v606_v41, %v605_v43  ;;  %v584_v47 = vmul.f32 %v2228_v44, %v2447_v32 }
  0xcf   : > { %832 = vmatmul.mubr.bf16.gmra.mrb[8].mxu0 %v613_v16  ;;  %v608_v6 = vmul.f32 %v2520_v42, %v585_v45 }
  0xd0   : > { %v2230_v48 = vpop.eup %2229  ;;  %841 = vmatprep.mubr.bf16.mxu0 %v2273_v50  ;;  %2119 = vmatmul.mubr.bf16.gmra.mrb[8].mxu1 %v616_v46  ;;  %v607_v24 = vmul.f32 %v2520_v42, %v584_v47 }
  0xd1   : > { %v2232_v25 = vpop.eup %2231  ;;  %v587_v49 = vmul.f32 %v2230_v48, %v2463_v38 }
  0xd2   : > { %v617_v4 = vpack.c.bf16 %v608_v6, %v607_v24  ;;  %v586_v51 = vmul.f32 %v2232_v25, %v2466_v39 }
  0xd3   : > { %v610_v31 = vmul.f32 %v2520_v42, %v587_v49  ;;  %v1005_v49 = vld [vmem:[%s2760_s26] sm:$0xff] }
  0xd4   : > { %2122 = vmatprep.mubr.bf16.mxu1 %v617_v4  ;;  %v609_v32 = vmul.f32 %v2520_v42, %v586_v51 }
  0xd6   : > { %v618_v52 = vpack.c.bf16 %v610_v31, %v609_v32  ;;  %v989_v31 = vld [vmem:[%s2765_s19] sm:$0xff]  ;;  %v990_v32 = vld [vmem:[%s2765_s19 + $0x8] sm:$0xff] }
  0xd7   : > { %842 = vmatmul.mubr.bf16.gmra.mrb[12].mxu0 %v614_v30 }
  0xd8   : > { %851 = vmatprep.mubr.bf16.mxu0 %v2273_v50  ;;  %2123 = vmatmul.mubr.bf16.gmra.mrb[12].mxu1 %v618_v52 }
  0xdf   : > { %852 = vmatmul.mubr.bf16.gmra.mrb[16].mxu0 %v615_v40 }
  0xe0   : > { %861 = vmatprep.mubr.bf16.mxu0 %v2273_v50 }
  0xe7   : > { %862 = vmatmul.mubr.bf16.gmra.mrb[20].mxu0 %v616_v46 }
  0xe8   : > { %871 = vmatprep.mubr.bf16.mxu0 %v2273_v50 }
  0xef   : > { %872 = vmatmul.mubr.bf16.gmra.mrb[24].mxu0 %v617_v4  ;;  %v1006_v4 = vld [vmem:[%s2760_s26 + $0x8] sm:$0xff] }
  0xf0   : > { %881 = vmatprep.mubr.bf16.mxu0 %v2273_v50 }
  0xf7   : > { %882 = vmatmul.mubr.bf16.gmra.mrb[28].mxu0 %v618_v52  ;;  %v1021_v52 = vld [vmem:[%s2772_s21] sm:$0xff] }
 0x192   : > { %v2559_v38 = vpop.f32.mrb[0].mxu0 }
 0x193   : > { %1037 = vrot.lane.b32.xlu0 %v2559_v38, %s2274_s25  ;;  %v2566_v39 = vpop.f32.mrb[1].mxu0  ;;  %v2112_v42 = vpop.f32.mrb[0].mxu1 }
 0x194   : > { %1261 = vrot.lane.b32.xlu1 %v2566_v39, %s2274_s25  ;;  %v2570_v53 = vpop.f32.mrb[2].mxu0  ;;  %v926_v54 = vpop.f32.mrb[1].mxu1 }
 0x195   : > { %v2572_v50 = vpop.f32.mrb[3].mxu0  ;;  %v2113_v55 = vpop.f32.mrb[2].mxu1 }
 0x196   : > { %v2025_v56 = vpack.c.bf16 %v2113_v55, %v2112_v42  ;;  %v929_v57 = vpop.f32.mrb[3].mxu1 }
 0x197   : > { %1069 = vrot.lane.b32.xlu0 %v2559_v38, %s2275_s13  ;;  %v2020_v5 = vpack.c.bf16 %v929_v57, %v926_v54  ;;  %v1101_v57 = vmul.f32 %v989_v31, %v2559_v38  ;;  %v1326_v38 = vmul.f32 %v990_v32, %v2572_v50 }
 0x198   : > { %1039 = vrot.lane.b32.xlu1 %v2570_v53, %s2274_s25  ;;  %2071 = vst [vmem:[%s2578_s22 + $0x8] sm:$0xff] %v2025_v56   ;;  %v1022_v56 = vld [vmem:[%s2772_s21 + $0x8] sm:$0xff] }
 0x199   : > { %2021 = vst [vmem:[%s2578_s22] sm:$0xff] %v2020_v5   ;;  %v1102_v5 = vmul.f32 %v990_v32, %v2570_v53  ;;  %v1008_v32 = vld [vmem:[%s2760_s26 + $0x18] sm:$0xff] }
 0x19a   : > { %v2586_v58 = vpop.f32.mrb[4].mxu0 }
 0x19b   : > { %1293 = vrot.lane.b32.xlu0 %v2566_v39, %s2275_s13  ;;  %v2590_v59 = vpop.f32.mrb[5].mxu0  ;;  %v2116_v60 = vpop.f32.mrb[4].mxu1 }
 0x19c   : > { %1071 = vrot.lane.b32.xlu1 %v2570_v53, %s2275_s13  ;;  %v2594_v61 = vpop.f32.mrb[6].mxu0  ;;  %v942_v9 = vpop.f32.mrb[5].mxu1 }
 0x19d   : > { %v2596_v62 = vpop.f32.mrb[7].mxu0  ;;  %v2117_v63 = vpop.f32.mrb[6].mxu1 }
 0x19e   : > { %v2035_v0 = vpack.c.bf16 %v2117_v63, %v2116_v60  ;;  %v945_v1 = vpop.f32.mrb[7].mxu1 }
 0x19f   : > { %1263 = vrot.lane.b32.xlu0 %v2572_v50, %s2274_s25  ;;  %v2030_v2 = vpack.c.bf16 %v945_v1, %v942_v9 }
 0x1a0   : > { %1295 = vrot.lane.b32.xlu1 %v2572_v50, %s2275_s13  ;;  %2073 = vst [vmem:[%s2578_s22 + $0x18] sm:$0xff] %v2035_v0  }
 0x1a1   : > { %2072 = vst [vmem:[%s2578_s22 + $0x10] sm:$0xff] %v2030_v2  }
 0x1a2   : > { %v2604_v3 = vpop.f32.mrb[8].mxu0 }
 0x1a3   : > { %1073 = vrot.lane.b32.xlu0 %v2586_v58, %s2275_s13  ;;  %v2608_v12 = vpop.f32.mrb[9].mxu0  ;;  %v2120_v7 = vpop.f32.mrb[8].mxu1 }
 0x1a4   : > { %1041 = vrot.lane.b32.xlu1 %v2586_v58, %s2274_s25  ;;  %v2612_v8 = vpop.f32.mrb[10].mxu0  ;;  %v958_v10 = vpop.f32.mrb[9].mxu1 }
 0x1a5   : > { %v2614_v13 = vpop.f32.mrb[11].mxu0  ;;  %v2121_v11 = vpop.f32.mrb[10].mxu1 }
 0x1a6   : > { %v2045_v16 = vpack.c.bf16 %v2121_v11, %v2120_v7  ;;  %v961_v17 = vpop.f32.mrb[11].mxu1 }
 0x1a7   : > { %1297 = vrot.lane.b32.xlu0 %v2590_v59, %s2275_s13  ;;  %v2040_v18 = vpack.c.bf16 %v961_v17, %v958_v10  ;;  %v1325_v17 = vmul.f32 %v989_v31, %v2566_v39  ;;  %v991_v31 = vld [vmem:[%s2765_s19 + $0x10] sm:$0xff] }
 0x1a8   : > { %1265 = vrot.lane.b32.xlu1 %v2590_v59, %s2274_s25  ;;  %2075 = vst [vmem:[%s2578_s22 + $0x28] sm:$0xff] %v2045_v16  }
 0x1a9   : > { %2074 = vst [vmem:[%s2578_s22 + $0x20] sm:$0xff] %v2040_v18  }
 0x1aa   : > { %v2622_v19 = vpop.f32.mrb[12].mxu0 }
 0x1ab   : > { %1267 = vrot.lane.b32.xlu0 %v2596_v62, %s2274_s25  ;;  %v2626_v22 = vpop.f32.mrb[13].mxu0  ;;  %v2124_v23 = vpop.f32.mrb[12].mxu1 }
 0x1ac   : > { %1043 = vrot.lane.b32.xlu1 %v2594_v61, %s2274_s25  ;;  %v2630_v26 = vpop.f32.mrb[14].mxu0  ;;  %v974_v27 = vpop.f32.mrb[13].mxu1 }
 0x1ad   : > { %v2632_v28 = vpop.f32.mrb[15].mxu0  ;;  %v2125_v14 = vpop.f32.mrb[14].mxu1 }
 0x1ae   : > { %v2055_v29 = vpack.c.bf16 %v2125_v14, %v2124_v23  ;;  %v977_v30 = vpop.f32.mrb[15].mxu1 }
 0x1af   : > { %1045 = vrot.lane.b32.xlu0 %v2604_v3, %s2274_s25  ;;  %v2050_v33 = vpack.c.bf16 %v977_v30, %v974_v27 }
 0x1b0   : > { %1075 = vrot.lane.b32.xlu1 %v2594_v61, %s2275_s13  ;;  %2077 = vst [vmem:[%s2578_s22 + $0x38] sm:$0xff] %v2055_v29  }
 0x1b1   : > { %2076 = vst [vmem:[%s2578_s22 + $0x30] sm:$0xff] %v2050_v33  }
 0x1b2   : > { %v2640_v15 = vpop.f32.mrb[16].mxu0 }
 0x1b3   : > { %1077 = vrot.lane.b32.xlu0 %v2604_v3, %s2275_s13  ;;  %v2644_v34 = vpop.f32.mrb[17].mxu0 }
 0x1b4   : > { %1299 = vrot.lane.b32.xlu1 %v2596_v62, %s2275_s13  ;;  %v2648_v35 = vpop.f32.mrb[18].mxu0 }
 0x1b5   : > { %v2650_v36 = vpop.f32.mrb[19].mxu0 }
 0x1b7   : > { %1301 = vrot.lane.b32.xlu0 %v2608_v12, %s2275_s13 }
 0x1b8   : > { %1269 = vrot.lane.b32.xlu1 %v2608_v12, %s2274_s25 }
 0x1ba   : > { %v2656_v37 = vpop.f32.mrb[20].mxu0 }
 0x1bb   : > { %1271 = vrot.lane.b32.xlu0 %v2614_v13, %s2274_s25  ;;  %v2660_v40 = vpop.f32.mrb[21].mxu0 }
 0x1bc   : > { %1047 = vrot.lane.b32.xlu1 %v2612_v8, %s2274_s25  ;;  %v2664_v20 = vpop.f32.mrb[22].mxu0 }
 0x1bd   : > { %v2666_v41 = vpop.f32.mrb[23].mxu0 }
 0x1bf   : > { %1049 = vrot.lane.b32.xlu0 %v2622_v19, %s2274_s25 }
 0x1c0   : > { %1079 = vrot.lane.b32.xlu1 %v2612_v8, %s2275_s13 }
 0x1c2   : > { %v2672_v21 = vpop.f32.mrb[24].mxu0 }
 0x1c3   : > { %1081 = vrot.lane.b32.xlu0 %v2622_v19, %s2275_s13  ;;  %v2676_v43 = vpop.f32.mrb[25].mxu0 }
 0x1c4   : > { %1303 = vrot.lane.b32.xlu1 %v2614_v13, %s2275_s13  ;;  %v2680_v44 = vpop.f32.mrb[26].mxu0 }
 0x1c5   : > { %v2682_v45 = vpop.f32.mrb[27].mxu0 }
 0x1c7   : > { %1305 = vrot.lane.b32.xlu0 %v2626_v22, %s2275_s13 }
 0x1c8   : > { %1273 = vrot.lane.b32.xlu1 %v2626_v22, %s2274_s25 }
 0x1ca   : > { %v2688_v46 = vpop.f32.mrb[28].mxu0 }
 0x1cb   : > { %1275 = vrot.lane.b32.xlu0 %v2632_v28, %s2274_s25  ;;  %v2692_v47 = vpop.f32.mrb[29].mxu0 }
 0x1cc   : > { %1051 = vrot.lane.b32.xlu1 %v2630_v26, %s2274_s25  ;;  %v2696_v6 = vpop.f32.mrb[30].mxu0 }
 0x1cd   : > { %v2698_v48 = vpop.f32.mrb[31].mxu0 }
 0x1cf   : > { %1053 = vrot.lane.b32.xlu0 %v2640_v15, %s2274_s25 }
 0x1d0   : > { %1083 = vrot.lane.b32.xlu1 %v2630_v26, %s2275_s13 }
 0x1d3   : > { %1085 = vrot.lane.b32.xlu0 %v2640_v15, %s2275_s13 }
 0x1d4   : > { %1307 = vrot.lane.b32.xlu1 %v2632_v28, %s2275_s13 }
 0x1d7   : > { %1309 = vrot.lane.b32.xlu0 %v2644_v34, %s2275_s13 }
 0x1d8   : > { %1277 = vrot.lane.b32.xlu1 %v2644_v34, %s2274_s25 }
 0x1db   : > { %1279 = vrot.lane.b32.xlu0 %v2650_v36, %s2274_s25 }
 0x1dc   : > { %1055 = vrot.lane.b32.xlu1 %v2648_v35, %s2274_s25 }
 0x1df   : > { %1057 = vrot.lane.b32.xlu0 %v2656_v37, %s2274_s25 }
 0x1e0   : > { %1087 = vrot.lane.b32.xlu1 %v2648_v35, %s2275_s13 }
 0x1e3   : > { %1089 = vrot.lane.b32.xlu0 %v2656_v37, %s2275_s13 }
 0x1e4   : > { %1311 = vrot.lane.b32.xlu1 %v2650_v36, %s2275_s13 }
 0x1e7   : > { %1313 = vrot.lane.b32.xlu0 %v2660_v40, %s2275_s13 }
 0x1e8   : > { %1281 = vrot.lane.b32.xlu1 %v2660_v40, %s2274_s25 }
 0x1eb   : > { %1283 = vrot.lane.b32.xlu0 %v2666_v41, %s2274_s25 }
 0x1ec   : > { %1059 = vrot.lane.b32.xlu1 %v2664_v20, %s2274_s25 }
 0x1ef   : > { %1061 = vrot.lane.b32.xlu0 %v2672_v21, %s2274_s25 }
 0x1f0   : > { %1091 = vrot.lane.b32.xlu1 %v2664_v20, %s2275_s13 }
 0x1f3   : > { %1093 = vrot.lane.b32.xlu0 %v2672_v21, %s2275_s13 }
 0x1f4   : > { %1315 = vrot.lane.b32.xlu1 %v2666_v41, %s2275_s13 }
 0x1f7   : > { %1317 = vrot.lane.b32.xlu0 %v2676_v43, %s2275_s13 }
 0x1f8   : > { %1285 = vrot.lane.b32.xlu1 %v2676_v43, %s2274_s25 }
 0x1fb   : > { %1287 = vrot.lane.b32.xlu0 %v2682_v45, %s2274_s25 }
 0x1fc   : > { %1063 = vrot.lane.b32.xlu1 %v2680_v44, %s2274_s25 }
 0x1ff   : > { %1065 = vrot.lane.b32.xlu0 %v2688_v46, %s2274_s25 }
 0x200   : > { %1095 = vrot.lane.b32.xlu1 %v2680_v44, %s2275_s13 }
 0x203   : > { %1097 = vrot.lane.b32.xlu0 %v2688_v46, %s2275_s13 }
 0x204   : > { %1319 = vrot.lane.b32.xlu1 %v2682_v45, %s2275_s13 }
 0x205   : > { %v1038_v24 = vpop.permute.xlu0 %1037 }
 0x206   : > { %v1262_v25 = vpop.permute.xlu1 %1261  ;;  %v1117_v54 = vmul.f32 %v1038_v24, %v1005_v49 }
 0x207   : > { %1291 = vrot.lane.b32.xlu0 %v2698_v48, %s2274_s25  ;;  %v1341_v7 = vmul.f32 %v1262_v25, %v1005_v49 }
 0x208   : > { %1289 = vrot.lane.b32.xlu1 %v2692_v47, %s2274_s25  ;;  %v1133_v0 = vadd.f32 %v1117_v54, %v1101_v57  ;;  %v992_v54 = vld [vmem:[%s2765_s19 + $0x18] sm:$0xff] }
 0x209   : > { %v1070_v51 = vpop.permute.xlu0 %1069  ;;  %v1357_v29 = vadd.f32 %v1341_v7, %v1325_v17 }
 0x20a   : > { %v1040_v42 = vpop.permute.xlu1 %1039  ;;  %v1149_v60 = vmul.f32 %v1070_v51, %v1021_v52 }
 0x20b   : > { %v1118_v55 = vmul.f32 %v1040_v42, %v1006_v4  ;;  %1321 = vrot.lane.b32.xlu0 %v2692_v47, %s2275_s13 }
 0x20c   : > { %1067 = vrot.lane.b32.xlu1 %v2696_v6, %s2274_s25  ;;  %v1165_v10 = vadd.f32 %v1149_v60, %v1133_v0  ;;  %v1024_v60 = vld [vmem:[%s2772_s21 + $0x18] sm:$0xff] }
 0x20d   : > { %v1294_v9 = vpop.permute.xlu0 %1293  ;;  %v1134_v1 = vadd.f32 %v1118_v55, %v1102_v5  ;;  %v1023_v5 = vld [vmem:[%s2772_s21 + $0x10] sm:$0xff] }
 0x20e   : > { %v1072_v63 = vpop.permute.xlu1 %1071  ;;  %v1373_v18 = vmul.f32 %v1294_v9, %v1021_v52  ;;  %v1104_v9 = vmul.f32 %v992_v54, %v2594_v61 }
 0x20f   : > { %v1150_v2 = vmul.f32 %v1072_v63, %v1022_v56 }
 0x210   : > { %1099 = vrot.lane.b32.xlu1 %v2696_v6, %s2275_s13  ;;  %v1389_v50 = vadd.f32 %v1373_v18, %v1357_v29 }
 0x211   : > { %v1166_v11 = vadd.f32 %v1150_v2, %v1134_v1  ;;  %v1264_v16 = vpop.permute.xlu0 %1263  ;;  %v1327_v2 = vmul.f32 %v991_v31, %v2590_v59 }
 0x212   : > { %v1342_v53 = vmul.f32 %v1264_v16, %v1006_v4  ;;  %v1296_v23 = vpop.permute.xlu1 %1295  ;;  %v1007_v4 = vld [vmem:[%s2760_s26 + $0x10] sm:$0xff] }
 0x213   : > { %v1940_v27 = vpack.c.bf16 %v1166_v11, %v1165_v10  ;;  %v1374_v14 = vmul.f32 %v1296_v23, %v1022_v56  ;;  %v1103_v56 = vmul.f32 %v991_v31, %v2586_v58  ;;  %v994_v31 = vld [vmem:[%s2765_s19 + $0x28] sm:$0xff] }
 0x214   : > { %v1358_v30 = vadd.f32 %v1342_v53, %v1326_v38  ;;  %1323 = vrot.lane.b32.xlu1 %v2698_v48, %s2275_s13  ;;  %v1328_v38 = vmul.f32 %v992_v54, %v2596_v62  ;;  %v1026_v54 = vld [vmem:[%s2772_s21 + $0x28] sm:$0xff] }
 0x215   : > { %1941 = vst [vmem:[%s2796_s27] sm:$0xff] %v1940_v27   ;;  %v1074_v39 = vpop.permute.xlu0 %1073 }
 0x216   : > { %v1390_v33 = vadd.f32 %v1374_v14, %v1358_v30  ;;  %v1042_v24 = vpop.permute.xlu1 %1041  ;;  %v1151_v10 = vmul.f32 %v1074_v39, %v1023_v5 }
 0x217   : > { %v1119_v52 = vmul.f32 %v1042_v24, %v1007_v4  ;;  %v1009_v24 = vld [vmem:[%s2760_s26 + $0x20] sm:$0xff] }
 0x218   : > { %v1980_v25 = vpack.c.bf16 %v1390_v33, %v1389_v50 }
 0x219   : > { %v1298_v49 = vpop.permute.xlu0 %1297  ;;  %v1135_v63 = vadd.f32 %v1119_v52, %v1103_v56  ;;  %v1106_v56 = vmul.f32 %v994_v31, %v2612_v8 }
 0x21a   : > { %1981 = vst [vmem:[%s2805_s14] sm:$0xff] %v1980_v25   ;;  %v1266_v51 = vpop.permute.xlu1 %1265  ;;  %v1375_v27 = vmul.f32 %v1298_v49, %v1023_v5  ;;  %v1010_v25 = vld [vmem:[%s2760_s26 + $0x28] sm:$0xff] }
 0x21b   : > { %v1343_v0 = vmul.f32 %v1266_v51, %v1007_v4  ;;  %v1167_v58 = vadd.f32 %v1151_v10, %v1135_v63  ;;  %v993_v51 = vld [vmem:[%s2765_s19 + $0x20] sm:$0xff] }
 0x21d   : > { %v1268_v42 = vpop.permute.xlu0 %1267  ;;  %v1359_v18 = vadd.f32 %v1343_v0, %v1327_v2 }
 0x21e   : > { %v1044_v55 = vpop.permute.xlu1 %1043  ;;  %v1344_v11 = vmul.f32 %v1268_v42, %v1008_v32 }
 0x21f   : > { %v1120_v57 = vmul.f32 %v1044_v55, %v1008_v32  ;;  %v1391_v30 = vadd.f32 %v1375_v27, %v1359_v18  ;;  %v1025_v32 = vld [vmem:[%s2772_s21 + $0x20] sm:$0xff]  ;;  %v1105_v55 = vmul.f32 %v993_v51, %v2604_v3 }
 0x220   : > { %v1360_v59 = vadd.f32 %v1344_v11, %v1328_v38  ;;  %v1330_v11 = vmul.f32 %v994_v31, %v2614_v13 }
 0x221   : > { %v1046_v1 = vpop.permute.xlu0 %1045  ;;  %v1136_v16 = vadd.f32 %v1120_v57, %v1104_v9  ;;  %v1329_v9 = vmul.f32 %v993_v51, %v2608_v12 }
 0x222   : > { %v1076_v7 = vpop.permute.xlu1 %1075  ;;  %v1121_v49 = vmul.f32 %v1046_v1, %v1009_v24 }
 0x223   : > { %v1152_v17 = vmul.f32 %v1076_v7, %v1024_v60 }
 0x224   : > { %v1137_v0 = vadd.f32 %v1121_v49, %v1105_v55 }
 0x225   : > { %v1168_v53 = vadd.f32 %v1152_v17, %v1136_v16  ;;  %v1078_v61 = vpop.permute.xlu0 %1077 }
 0x226   : > { %v1300_v23 = vpop.permute.xlu1 %1299  ;;  %v1153_v57 = vmul.f32 %v1078_v61, %v1025_v32 }
 0x227   : > { %v1945_v14 = vpack.c.bf16 %v1168_v53, %v1167_v58  ;;  %v1376_v29 = vmul.f32 %v1300_v23, %v1024_v60 }
 0x228   : > { %v1169_v1 = vadd.f32 %v1153_v57, %v1137_v0 }
 0x229   : > { %2057 = vst [vmem:[%s2796_s27 + $0x8] sm:$0xff] %v1945_v14   ;;  %v1392_v39 = vadd.f32 %v1376_v29, %v1360_v59  ;;  %v1302_v62 = vpop.permute.xlu0 %1301  ;;  %v1011_v59 = vld [vmem:[%s2760_s26 + $0x30] sm:$0xff]  ;;  %v1012_v14 = vld [vmem:[%s2760_s26 + $0x38] sm:$0xff] }
 0x22a   : > { %v1270_v50 = vpop.permute.xlu1 %1269  ;;  %v1377_v38 = vmul.f32 %v1302_v62, %v1025_v32 }
 0x22b   : > { %v1985_v33 = vpack.c.bf16 %v1392_v39, %v1391_v30  ;;  %v1345_v5 = vmul.f32 %v1270_v50, %v1009_v24  ;;  %v995_v30 = vld [vmem:[%s2765_s19 + $0x30] sm:$0xff]  ;;  %v996_v39 = vld [vmem:[%s2765_s19 + $0x38] sm:$0xff] }
 0x22c   : > { %v1027_v50 = vld [vmem:[%s2772_s21 + $0x30] sm:$0xff]  ;;  %v1108_v51 = vmul.f32 %v996_v39, %v2630_v26  ;;  %v1331_v49 = vmul.f32 %v995_v30, %v2626_v22 }
 0x22d   : > { %2064 = vst [vmem:[%s2805_s14 + $0x8] sm:$0xff] %v1985_v33   ;;  %v1272_v4 = vpop.permute.xlu0 %1271  ;;  %v1361_v16 = vadd.f32 %v1345_v5, %v1329_v9  ;;  %v1332_v5 = vmul.f32 %v996_v39, %v2632_v28 }
 0x22e   : > { %v1048_v52 = vpop.permute.xlu1 %1047  ;;  %v1346_v2 = vmul.f32 %v1272_v4, %v1010_v25  ;;  %v1107_v4 = vmul.f32 %v995_v30, %v2622_v19 }
 0x22f   : > { %v1122_v42 = vmul.f32 %v1048_v52, %v1010_v25  ;;  %v1393_v53 = vadd.f32 %v1377_v38, %v1361_v16  ;;  %v1028_v25 = vld [vmem:[%s2772_s21 + $0x38] sm:$0xff]  ;;  %v997_v38 = vld [vmem:[%s2765_s19 + $0x40] sm:$0xff] }
 0x230   : > { %v1362_v12 = vadd.f32 %v1346_v2, %v1330_v11  ;;  %v1333_v30 = vmul.f32 %v997_v38, %v2644_v34 }
 0x231   : > { %v1050_v60 = vpop.permute.xlu0 %1049  ;;  %v1138_v7 = vadd.f32 %v1122_v42, %v1106_v56 }
 0x232   : > { %v1080_v63 = vpop.permute.xlu1 %1079  ;;  %v1123_v62 = vmul.f32 %v1050_v60, %v1011_v59 }
 0x233   : > { %v1154_v10 = vmul.f32 %v1080_v63, %v1026_v54 }
 0x235   : > { %v1170_v3 = vadd.f32 %v1154_v10, %v1138_v7  ;;  %v1082_v8 = vpop.permute.xlu0 %1081 }
 0x236   : > { %v1304_v17 = vpop.permute.xlu1 %1303  ;;  %v1155_v31 = vmul.f32 %v1082_v8, %v1027_v50  ;;  %v1014_v8 = vld [vmem:[%s2760_s26 + $0x48] sm:$0xff] }
 0x237   : > { %v1950_v58 = vpack.c.bf16 %v1170_v3, %v1169_v1  ;;  %v1378_v18 = vmul.f32 %v1304_v17, %v1026_v54  ;;  %v1139_v54 = vadd.f32 %v1123_v62, %v1107_v4  ;;  %v1013_v3 = vld [vmem:[%s2760_s26 + $0x40] sm:$0xff] }
 0x239   : > { %2058 = vst [vmem:[%s2796_s27 + $0x10] sm:$0xff] %v1950_v58   ;;  %v1394_v61 = vadd.f32 %v1378_v18, %v1362_v12  ;;  %v1306_v13 = vpop.permute.xlu0 %1305  ;;  %v1171_v60 = vadd.f32 %v1155_v31, %v1139_v54  ;;  %v998_v12 = vld [vmem:[%s2765_s19 + $0x48] sm:$0xff]  ;;  %v1029_v58 = vld [vmem:[%s2772_s21 + $0x40] sm:$0xff] }
 0x23a   : > { %v1274_v23 = vpop.permute.xlu1 %1273  ;;  %v1379_v0 = vmul.f32 %v1306_v13, %v1027_v50  ;;  %v1030_v13 = vld [vmem:[%s2772_s21 + $0x48] sm:$0xff] }
 0x23b   : > { %v1990_v27 = vpack.c.bf16 %v1394_v61, %v1393_v53  ;;  %v1347_v32 = vmul.f32 %v1274_v23, %v1011_v59  ;;  %v1109_v23 = vmul.f32 %v997_v38, %v2640_v15 }
 0x23d   : > { %2065 = vst [vmem:[%s2805_s14 + $0x10] sm:$0xff] %v1990_v27   ;;  %v1276_v29 = vpop.permute.xlu0 %1275  ;;  %v1363_v9 = vadd.f32 %v1347_v32, %v1331_v49  ;;  %v1110_v27 = vmul.f32 %v998_v12, %v2648_v35 }
 0x23e   : > { %v1052_v33 = vpop.permute.xlu1 %1051  ;;  %v1348_v55 = vmul.f32 %v1276_v29, %v1012_v14 }
 0x23f   : > { %v1124_v24 = vmul.f32 %v1052_v33, %v1012_v14  ;;  %v1395_v10 = vadd.f32 %v1379_v0, %v1363_v9  ;;  %v999_v9 = vld [vmem:[%s2765_s19 + $0x50] sm:$0xff] }
 0x240   : > { %v1364_v22 = vadd.f32 %v1348_v55, %v1332_v5  ;;  %v1016_v5 = vld [vmem:[%s2760_s26 + $0x58] sm:$0xff] }
 0x241   : > { %v1054_v52 = vpop.permute.xlu0 %1053  ;;  %v1140_v56 = vadd.f32 %v1124_v24, %v1108_v51 }
 0x242   : > { %v1084_v42 = vpop.permute.xlu1 %1083  ;;  %v1125_v53 = vmul.f32 %v1054_v52, %v1013_v3 }
 0x243   : > { %v1156_v57 = vmul.f32 %v1084_v42, %v1028_v25 }
 0x244   : > { %v1141_v50 = vadd.f32 %v1125_v53, %v1109_v23 }
 0x245   : > { %v1172_v19 = vadd.f32 %v1156_v57, %v1140_v56  ;;  %v1086_v26 = vpop.permute.xlu0 %1085  ;;  %v1015_v57 = vld [vmem:[%s2760_s26 + $0x50] sm:$0xff] }
 0x246   : > { %v1308_v63 = vpop.permute.xlu1 %1307  ;;  %v1157_v59 = vmul.f32 %v1086_v26, %v1029_v58  ;;  %v1031_v26 = vld [vmem:[%s2772_s21 + $0x50] sm:$0xff] }
 0x247   : > { %v1955_v2 = vpack.c.bf16 %v1172_v19, %v1171_v60  ;;  %v1380_v7 = vmul.f32 %v1308_v63, %v1028_v25  ;;  %v1334_v25 = vmul.f32 %v998_v12, %v2650_v36  ;;  %v1000_v19 = vld [vmem:[%s2765_s19 + $0x58] sm:$0xff] }
 0x248   : > { %v1173_v4 = vadd.f32 %v1157_v59, %v1141_v50  ;;  %v1018_v50 = vld [vmem:[%s2760_s26 + $0x68] sm:$0xff] }
 0x249   : > { %2059 = vst [vmem:[%s2796_s27 + $0x18] sm:$0xff] %v1955_v2   ;;  %v1396_v11 = vadd.f32 %v1380_v7, %v1364_v22  ;;  %v1310_v28 = vpop.permute.xlu0 %1309  ;;  %v1032_v2 = vld [vmem:[%s2772_s21 + $0x58] sm:$0xff]  ;;  %v1111_v7 = vmul.f32 %v999_v9, %v2656_v37 }
 0x24a   : > { %v1278_v1 = vpop.permute.xlu1 %1277  ;;  %v1381_v32 = vmul.f32 %v1310_v28, %v1029_v58  ;;  %v1336_v58 = vmul.f32 %v1000_v19, %v2666_v41 }
 0x24b   : > { %v1995_v16 = vpack.c.bf16 %v1396_v11, %v1395_v10  ;;  %v1349_v14 = vmul.f32 %v1278_v1, %v1013_v3  ;;  %v1112_v10 = vmul.f32 %v1000_v19, %v2664_v20 }
 0x24d   : > { %2066 = vst [vmem:[%s2805_s14 + $0x18] sm:$0xff] %v1995_v16   ;;  %v1280_v17 = vpop.permute.xlu0 %1279  ;;  %v1365_v51 = vadd.f32 %v1349_v14, %v1333_v30  ;;  %v1335_v16 = vmul.f32 %v999_v9, %v2660_v40 }
 0x24e   : > { %v1056_v18 = vpop.permute.xlu1 %1055  ;;  %v1350_v33 = vmul.f32 %v1280_v17, %v1014_v8 }
 0x24f   : > { %v1126_v61 = vmul.f32 %v1056_v18, %v1014_v8  ;;  %v1397_v42 = vadd.f32 %v1381_v32, %v1365_v51 }
 0x250   : > { %v1366_v34 = vadd.f32 %v1350_v33, %v1334_v25  ;;  %v1033_v25 = vld [vmem:[%s2772_s21 + $0x60] sm:$0xff] }
 0x251   : > { %v1058_v29 = vpop.permute.xlu0 %1057  ;;  %v1142_v62 = vadd.f32 %v1126_v61, %v1110_v27 }
 0x252   : > { %v1088_v39 = vpop.permute.xlu1 %1087  ;;  %v1127_v0 = vmul.f32 %v1058_v29, %v1015_v57 }
 0x253   : > { %v1158_v24 = vmul.f32 %v1088_v39, %v1030_v13  ;;  %v1017_v39 = vld [vmem:[%s2760_s26 + $0x60] sm:$0xff] }
 0x254   : > { %v1143_v8 = vadd.f32 %v1127_v0, %v1111_v7 }
 0x255   : > { %v1174_v15 = vadd.f32 %v1158_v24, %v1142_v62  ;;  %v1090_v35 = vpop.permute.xlu0 %1089  ;;  %v1001_v62 = vld [vmem:[%s2765_s19 + $0x60] sm:$0xff]  ;;  %v1002_v24 = vld [vmem:[%s2765_s19 + $0x68] sm:$0xff] }
 0x256   : > { %v1312_v31 = vpop.permute.xlu1 %1311  ;;  %v1159_v11 = vmul.f32 %v1090_v35, %v1031_v26  ;;  %v1034_v35 = vld [vmem:[%s2772_s21 + $0x68] sm:$0xff]  ;;  %v1114_v32 = vmul.f32 %v1002_v24, %v2680_v44 }
 0x257   : > { %v1960_v52 = vpack.c.bf16 %v1174_v15, %v1173_v4  ;;  %v1382_v49 = vmul.f32 %v1312_v31, %v1030_v13  ;;  %v1113_v31 = vmul.f32 %v1001_v62, %v2672_v21 }
 0x258   : > { %v1175_v18 = vadd.f32 %v1159_v11, %v1143_v8 }
 0x259   : > { %2060 = vst [vmem:[%s2796_s27 + $0x20] sm:$0xff] %v1960_v52   ;;  %v1398_v54 = vadd.f32 %v1382_v49, %v1366_v34  ;;  %v1314_v36 = vpop.permute.xlu0 %1313 }
 0x25a   : > { %v1282_v55 = vpop.permute.xlu1 %1281  ;;  %v1383_v13 = vmul.f32 %v1314_v36, %v1031_v26 }
 0x25b   : > { %v2000_v56 = vpack.c.bf16 %v1398_v54, %v1397_v42  ;;  %v1351_v28 = vmul.f32 %v1282_v55, %v1015_v57  ;;  %v1337_v42 = vmul.f32 %v1001_v62, %v2676_v43 }
 0x25d   : > { %2067 = vst [vmem:[%s2805_s14 + $0x20] sm:$0xff] %v2000_v56   ;;  %v1284_v60 = vpop.permute.xlu0 %1283  ;;  %v1367_v53 = vadd.f32 %v1351_v28, %v1335_v16  ;;  %v1003_v28 = vld [vmem:[%s2765_s19 + $0x70] sm:$0xff] }
 0x25e   : > { %v1060_v63 = vpop.permute.xlu1 %1059  ;;  %v1352_v17 = vmul.f32 %v1284_v60, %v1016_v5  ;;  %v1035_v16 = vld [vmem:[%s2772_s21 + $0x70] sm:$0xff] }
 0x25f   : > { %v1128_v22 = vmul.f32 %v1060_v63, %v1016_v5  ;;  %v1399_v59 = vadd.f32 %v1383_v13, %v1367_v53  ;;  %v1338_v5 = vmul.f32 %v1002_v24, %v2682_v45 }
 0x260   : > { %v1368_v40 = vadd.f32 %v1352_v17, %v1336_v58  ;;  %v1115_v58 = vmul.f32 %v1003_v28, %v2688_v46 }
 0x261   : > { %v1062_v1 = vpop.permute.xlu0 %1061  ;;  %v1144_v38 = vadd.f32 %v1128_v22, %v1112_v10  ;;  %v1019_v10 = vld [vmem:[%s2760_s26 + $0x70] sm:$0xff] }
 0x262   : > { %v1092_v3 = vpop.permute.xlu1 %1091  ;;  %v1129_v51 = vmul.f32 %v1062_v1, %v1017_v39  ;;  %v1004_v1 = vld [vmem:[%s2765_s19 + $0x78] sm:$0xff] }
 0x263   : > { %v1160_v12 = vmul.f32 %v1092_v3, %v1032_v2  ;;  %v1020_v3 = vld [vmem:[%s2760_s26 + $0x78] sm:$0xff] }
 0x264   : > { %v1145_v36 = vadd.f32 %v1129_v51, %v1113_v31 }
 0x265   : > { %v1176_v37 = vadd.f32 %v1160_v12, %v1144_v38  ;;  %v1094_v20 = vpop.permute.xlu0 %1093  ;;  %v1036_v12 = vld [vmem:[%s2772_s21 + $0x78] sm:$0xff] }
 0x266   : > { %v1316_v61 = vpop.permute.xlu1 %1315  ;;  %v1161_v34 = vmul.f32 %v1094_v20, %v1033_v25  ;;  %v1339_v20 = vmul.f32 %v1003_v28, %v2692_v47 }
 0x267   : > { %v1965_v23 = vpack.c.bf16 %v1176_v37, %v1175_v18  ;;  %v1384_v27 = vmul.f32 %v1316_v61, %v1032_v2  ;;  %v1116_v18 = vmul.f32 %v1004_v1, %v2696_v6 }
 0x268   : > { %v1177_v60 = vadd.f32 %v1161_v34, %v1145_v36 }
 0x269   : > { %2061 = vst [vmem:[%s2796_s27 + $0x28] sm:$0xff] %v1965_v23   ;;  %v1400_v14 = vadd.f32 %v1384_v27, %v1368_v40  ;;  %v1318_v41 = vpop.permute.xlu0 %1317 }
 0x26a   : > { %v1286_v29 = vpop.permute.xlu1 %1285  ;;  %v1385_v43 = vmul.f32 %v1318_v41, %v1033_v25 }
 0x26b   : > { %v2005_v30 = vpack.c.bf16 %v1400_v14, %v1399_v59  ;;  %v1353_v52 = vmul.f32 %v1286_v29, %v1017_v39  ;;  %v1340_v14 = vmul.f32 %v1004_v1, %v2698_v48 }
 0x26d   : > { %2068 = vst [vmem:[%s2805_s14 + $0x28] sm:$0xff] %v2005_v30   ;;  %v1288_v33 = vpop.permute.xlu0 %1287  ;;  %v1369_v9 = vadd.f32 %v1353_v52, %v1337_v42 }
 0x26e   : > { %v1064_v4 = vpop.permute.xlu1 %1063  ;;  %v1354_v55 = vmul.f32 %v1288_v33, %v1018_v50 }
 0x26f   : > { %v1130_v15 = vmul.f32 %v1064_v4, %v1018_v50  ;;  %v1401_v22 = vadd.f32 %v1385_v43, %v1369_v9 }
 0x270   : > { %v1370_v26 = vadd.f32 %v1354_v55, %v1338_v5 }
 0x271   : > { %v1066_v49 = vpop.permute.xlu0 %1065  ;;  %v1146_v56 = vadd.f32 %v1130_v15, %v1114_v32 }
 0x272   : > { %v1096_v54 = vpop.permute.xlu1 %1095  ;;  %v1131_v17 = vmul.f32 %v1066_v49, %v1019_v10 }
 0x273   : > { %v1162_v57 = vmul.f32 %v1096_v54, %v1034_v35 }
 0x274   : > { %v1147_v40 = vadd.f32 %v1131_v17, %v1115_v58 }
 0x275   : > { %v1178_v21 = vadd.f32 %v1162_v57, %v1146_v56  ;;  %v1098_v44 = vpop.permute.xlu0 %1097 }
 0x276   : > { %v1320_v19 = vpop.permute.xlu1 %1319  ;;  %v1163_v53 = vmul.f32 %v1098_v44, %v1035_v16 }
 0x277   : > { %v1970_v63 = vpack.c.bf16 %v1178_v21, %v1177_v60  ;;  %v1386_v0 = vmul.f32 %v1320_v19, %v1034_v35 }
 0x278   : > { %v1179_v41 = vadd.f32 %v1163_v53, %v1147_v40 }
 0x279   : > { %2062 = vst [vmem:[%s2796_s27 + $0x30] sm:$0xff] %v1970_v63   ;;  %v1402_v2 = vadd.f32 %v1386_v0, %v1370_v26  ;;  %v1292_v11 = vpop.permute.xlu0 %1291 }
 0x27a   : > { %v1290_v7 = vpop.permute.xlu1 %1289  ;;  %v1356_v23 = vmul.f32 %v1292_v11, %v1020_v3 }
 0x27b   : > { %v2010_v45 = vpack.c.bf16 %v1402_v2, %v1401_v22  ;;  %v1355_v37 = vmul.f32 %v1290_v7, %v1019_v10 }
 0x27c   : > { %v1372_v6 = vadd.f32 %v1356_v23, %v1340_v14 }
 0x27d   : > { %2069 = vst [vmem:[%s2805_s14 + $0x30] sm:$0xff] %v2010_v45   ;;  %v1322_v61 = vpop.permute.xlu0 %1321  ;;  %v1371_v29 = vadd.f32 %v1355_v37, %v1339_v20 }
 0x27e   : > { %v1068_v8 = vpop.permute.xlu1 %1067  ;;  %v1387_v30 = vmul.f32 %v1322_v61, %v1035_v16 }
 0x27f   : > { %v1132_v38 = vmul.f32 %v1068_v8, %v1020_v3 }
 0x280   : > { %v1403_v62 = vadd.f32 %v1387_v30, %v1371_v29 }
 0x281   : > { %v1148_v27 = vadd.f32 %v1132_v38, %v1116_v18 }
 0x282   : > { %v1100_v13 = vpop.permute.xlu1 %1099 }
 0x283   : > { %v1164_v59 = vmul.f32 %v1100_v13, %v1036_v12 }
 0x285   : > { %v1180_v46 = vadd.f32 %v1164_v59, %v1148_v27 }
 0x286   : > { %v1324_v39 = vpop.permute.xlu1 %1323 }
 0x287   : > { %v1975_v50 = vpack.c.bf16 %v1180_v46, %v1179_v41  ;;  %v1388_v33 = vmul.f32 %v1324_v39, %v1036_v12 }
 0x289   : > { %2063 = vst [vmem:[%s2796_s27 + $0x38] sm:$0xff] %v1975_v50   ;;  %v1404_v47 = vadd.f32 %v1388_v33, %v1372_v6 }
 0x28b   : > { %v2015_v24 = vpack.c.bf16 %v1404_v47, %v1403_v62 }
 0x28d   : > { %2070 = vst [vmem:[%s2805_s14 + $0x38] sm:$0xff] %v2015_v24  }
 0x28e PF: > { %s19_s9 = sadd.s32 1, %s2271_s9   ;;  %s2916_s27 = smov %s2263_s29 }
 0x28f   : > { %p16_p7 = scmp.ge.s32.totalorder %s19_s9, 6   ;;  %s2917_s28 = smov %s2267_s30 }
 0x290   : > { %s2918_s29 = smov %s2921_s10  ;;  %s2919_s30 = smov %s2925_s11 }
 0x291   :  { %18 = sbr.rel (!%p16_p7) target bundleno = 3 (0x3), region = 107 }

// kernel: transformer_block.5
= control target key start
LH: loop header
LB: loop body
LE: loop exit
PB: predicated region body
PF: predicated region fallthrough
CT: control target
= control target key end

     0   :  { %s3281_s0 = inlined_call_operand.vmem [shape: f32[2,256,128], index: 0, kind: input, shape index: {}]   ;;  %s3282_s1 = inlined_call_operand.vmem [shape: bf16[2,256,128], index: 1, kind: input, shape index: {}]   ;;  %s3283_s2 = inlined_call_operand.vmem [shape: bf16[128,128], index: 2, kind: input, shape index: {}]   ;;  %s3284_s3 = inlined_call_operand.vmem [shape: f32[1,128], index: 3, kind: input, shape index: {}]   ;;  %s3285_s4 = inlined_call_operand.vmem [shape: bf16[128,256], index: 4, kind: input, shape index: {}]   ;;  %s3286_s5 = inlined_call_operand.vmem [shape: bf16[128,256], index: 5, kind: input, shape index: {}]   ;;  %s3287_s6 = inlined_call_operand.vmem [shape: bf16[256,128], index: 6, kind: input, shape index: {}]   ;;  %s3288_s7 = inlined_call_operand.hbm [shape: f32[2,256,128], index: 7, kind: output, shape index: {}]  }
   0x1   :  { %3299 = sst [smem:[#allocation20_spill]] %s3285_s4 }
   0x2   :  { %3300 = sst [smem:[#allocation21_spill]] %s3286_s5 }
   0x3   :  { %3301 = sst [smem:[#allocation22_spill]] %s3288_s7 }
   0x4   :  { %12 = vsyncpa [#allocation8], 0 }
   0x5   :  { %14 = vsyncpa [#allocation8 + $0x1], 0  ;;  %s2697_s24 = smov 0   ;;  %s2699_s25 = smov 0  }
   0x6   :  { %s2701_s26 = smov 0   ;;  %s2703_s27 = smov 0  }
   0x7   :  { %s2705_s28 = smov 0   ;;  %s2707_s29 = smov 0  }
   0x8   :  { %s2709_s30 = smov 0   ;;  %s2711_s8 = smov 0  }
   0x9   :  { %s2713_s9 = smov 0   ;;  %s2715_s10 = smov 0  }
   0xa   :  { %s2717_s11 = smov 0   ;;  %s2719_s12 = smov 0  }
   0xb LB: > { %3302 = sst [smem:[#allocation10_spill]] %s2615_s26  ;;  %s1974_s13 = sadd.s32 4294967295, %s2651_s12   ;;  %s2651_s12 = sphi %s2719_s12, %s20_s12   ;;  %s2647_s11 = sphi %s2717_s11, %s3328_s11   ;;  %s2643_s10 = sphi %s2715_s10, %s3327_s10   ;;  %s2639_s9 = sphi %s2713_s9, %s3326_s9   ;;  %s2635_s8 = sphi %s2711_s8, %s3325_s8   ;;  %s2631_s30 = sphi %s2709_s30, %s3324_s30   ;;  %s2627_s29 = sphi %s2707_s29, %s3323_s29   ;;  %s2623_s28 = sphi %s2705_s28, %s3332_s28   ;;  %s2619_s27 = sphi %s2703_s27, %s3321_s27   ;;  %s2615_s26 = sphi %s2701_s26, %s3331_s26   ;;  %s2611_s25 = sphi %s2699_s25, %s3330_s25   ;;  %s2607_s24 = sphi %s2697_s24, %s3329_s24  }
   0xc   : > { %3303 = sst [smem:[#allocation11_spill]] %s2623_s28  ;;  %s1975_s14 = sadd.s32 4294967294, %s2651_s12  }
   0xd   : > { %3304 = sst [smem:[#allocation12_spill]] %s2639_s9  ;;  %s32_s15 = sadd.s32 1, %s2639_s9 }
   0xe   : > { %3305 = sst [smem:[#allocation13_spill]] %s2643_s10  ;;  %p33_p0 = scmp.ge.s32.totalorder %s32_s15, 2 }
   0xf   : > { %3306 = sst [smem:[#allocation14_spill]] %s2647_s11  ;;  %s35_s16 = sadd.s32 1, %s2643_s10 }
  0x10   : > { %s39_s17 = sadd.s32 1, %s2647_s11  ;;  %p151_p1 = scmp.ne.s32.totalorder %s2623_s28, %s2619_s27 }
  0x11   : > { %s3334_s15 = smov (%p33_p0, %s32_s15), 0  ;;  %s3336_s16 = smov (!%p33_p0, %s35_s16), %s2643_s10 }
  0x12   : > { %3307 = sst [smem:[#allocation15_spill]] %s3334_s15  ;;  %s141_s18 = ssub.s32 %s2639_s9, %s3334_s15 }
  0x13   : > { %p152_p2 = scmp.eq.s32.totalorder %s2651_s12, 0  ;;  %p37_p3 = scmp.ge.s32.totalorder %s3336_s16, 2 }
  0x14   : > { %p142_p4 = scmp.eq.s32.totalorder %s141_s18, 0  ;;  %s144_s19 = sadd.s32 1, %s2623_s28 }
  0x15   : > { %p2771_p5 = por %p152_p2, %p151_p1  ;;  %s3338_s16 = smov (%p37_p3, %s3336_s16), 0 }
  0x16   : > { %3309 = sst [smem:[#allocation16_spill]] %s3338_s16  ;;  %s3340_s17 = smov (!%p37_p3, %s39_s17), %s2647_s11 }
  0x17   : > { %s2779_s21 = scalar_select %p142_p4, %s2623_s28, %s144_s19  }
  0x18   : > { %p41_p6 = scmp.ge.s32.totalorder %s3340_s17, 2  ;;  %s220_s22 = ssub.s32 %s2643_s10, %s3338_s16 }
  0x19   : > { %3310 = sst [smem:[#allocation17_spill]] %s2779_s21  ;;  %p234_p7 = scmp.ne.s32.totalorder %s2615_s26, %s2611_s25 }
  0x1a   : > { %p235_p8 = scmp.eq.s32.totalorder %s1974_s13, 7  ;;  %s3342_s17 = smov (%p41_p6, %s3340_s17), 0 }
  0x1b   : > { %3311 = sst [smem:[#allocation18_spill]] %s3342_s17  ;;  %p240_p10 = scmp.ne.s32.totalorder %s2611_s25, %s2607_s24 }
  0x1c   : > { %p2787_p9 = por %p235_p8, %p234_p7  ;;  %s219_s18 = ssub.s32 %s2647_s11, %s3342_s17 }
  0x1d   : > { %p241_p11 = scmp.eq.s32.totalorder %s1975_s14, 7  ;;  %s221_s15 = sor.u32 %s220_s22, %s219_s18 }
  0x1e   : > { %s224_s7 = sadd.s32 1, %s2615_s26  ;;  %p222_p12 = scmp.eq.s32.totalorder %s221_s15, 0 }
  0x1f   : > { %p2796_p13 = por %p241_p11, %p240_p10  ;;  %p1977_p0 = scmp.ge.s32.totalorder %s2651_s12, 8 }
  0x20   : > { %s2801_s16 = scalar_select %p222_p12, %s2615_s26, %s224_s7  }
  0x21   : > { %263 = sbr.rel (%p1977_p0) target bundleno = 80 (0x50), region = 24 }
  0x22   : > { %3314 = sst [smem:[#allocation19_spill]] %s2801_s16 }
  0x28   : > { %292 = sbr.rel (!%p2771_p5) target bundleno = 60 (0x3c), region = 36  ;;  %s294_s13 = sand.u32 (%p2771_p5), 1, %s2623_s28  }
  0x29   : > { %s1979_s17 = sshll.u32 (%p2771_p5), %s2639_s9, 2  ;;  %s1978_s14 = sshll.u32 (%p2771_p5), %s294_s13, 6 }
  0x2a   : > { %s3315_s4 = sld [smem:[#allocation20_spill]] (%p2771_p5)  ;;  %s296_s7 = scalar_lea.vmem (%p2771_p5), [#allocation5], %s1978_s14 }
  0x30   : > { %s2811_s15 = scalar_lea.vmem %s3315_s4, %s1979_s17 }
  0x31   : > { %v314_v0 = vld [vmem:[%s2811_s15] sm:$0xf]  ;;  %v316_v1 = vld [vmem:[%s2811_s15 + $0x8] sm:$0xf]  ;;  %v318_v2 = vld [vmem:[%s2811_s15 + $0x10] sm:$0xf] }
  0x32   : > { %315 = vst [vmem:[%s296_s7] sm:$0xf] %v314_v0  ;;  %317 = vst [vmem:[%s296_s7 + $0x4] sm:$0xf] %v316_v1  ;;  %v320_v3 = vld [vmem:[%s2811_s15 + $0x18] sm:$0xf] }
  0x33   : > { %v322_v4 = vld [vmem:[%s2811_s15 + $0x20] sm:$0xf]  ;;  %319 = vst [vmem:[%s296_s7 + $0x8] sm:$0xf] %v318_v2  ;;  %321 = vst [vmem:[%s296_s7 + $0xc] sm:$0xf] %v320_v3 }
  0x34   : > { %323 = vst [vmem:[%s296_s7 + $0x10] sm:$0xf] %v322_v4  ;;  %v324_v5 = vld [vmem:[%s2811_s15 + $0x28] sm:$0xf]  ;;  %v326_v6 = vld [vmem:[%s2811_s15 + $0x30] sm:$0xf] }
  0x35   : > { %v328_v7 = vld [vmem:[%s2811_s15 + $0x38] sm:$0xf]  ;;  %325 = vst [vmem:[%s296_s7 + $0x14] sm:$0xf] %v324_v5  ;;  %327 = vst [vmem:[%s296_s7 + $0x18] sm:$0xf] %v326_v6 }
  0x36   : > { %329 = vst [vmem:[%s296_s7 + $0x1c] sm:$0xf] %v328_v7  ;;  %v330_v8 = vld [vmem:[%s2811_s15 + $0x40] sm:$0xf]  ;;  %v332_v9 = vld [vmem:[%s2811_s15 + $0x48] sm:$0xf] }
  0x37   : > { %v334_v10 = vld [vmem:[%s2811_s15 + $0x50] sm:$0xf]  ;;  %331 = vst [vmem:[%s296_s7 + $0x20] sm:$0xf] %v330_v8  ;;  %333 = vst [vmem:[%s296_s7 + $0x24] sm:$0xf] %v332_v9 }
  0x38   : > { %335 = vst [vmem:[%s296_s7 + $0x28] sm:$0xf] %v334_v10  ;;  %v336_v11 = vld [vmem:[%s2811_s15 + $0x58] sm:$0xf]  ;;  %v338_v12 = vld [vmem:[%s2811_s15 + $0x60] sm:$0xf] }
  0x39   : > { %v340_v13 = vld [vmem:[%s2811_s15 + $0x68] sm:$0xf]  ;;  %337 = vst [vmem:[%s296_s7 + $0x2c] sm:$0xf] %v336_v11  ;;  %339 = vst [vmem:[%s296_s7 + $0x30] sm:$0xf] %v338_v12 }
  0x3a   : > { %341 = vst [vmem:[%s296_s7 + $0x34] sm:$0xf] %v340_v13  ;;  %v342_v14 = vld [vmem:[%s2811_s15 + $0x70] sm:$0xf]  ;;  %v344_v15 = vld [vmem:[%s2811_s15 + $0x78] sm:$0xf] }
  0x3b   : > { %343 = vst [vmem:[%s296_s7 + $0x38] sm:$0xf] %v342_v14  ;;  %345 = vst [vmem:[%s296_s7 + $0x3c] sm:$0xf] %v344_v15 }
  0x3c PF: > { %400 = sbr.rel (!%p2771_p5) target bundleno = 80 (0x50), region = 77  ;;  %s402_s17 = sand.u32 (%p2771_p5), 1, %s2623_s28  }
  0x3d   : > { %s1981_s13 = sshll.u32 (%p2771_p5), %s2639_s9, 2  ;;  %s1980_s14 = sshll.u32 (%p2771_p5), %s402_s17, 6 }
  0x3e   : > { %s3316_s5 = sld [smem:[#allocation21_spill]] (%p2771_p5)  ;;  %s404_s20 = scalar_lea.vmem (%p2771_p5), [#allocation6], %s1980_s14 }
  0x44   : > { %s2836_s4 = scalar_lea.vmem %s3316_s5, %s1981_s13 }
  0x45   : > { %v422_v16 = vld [vmem:[%s2836_s4] sm:$0xf]  ;;  %v424_v17 = vld [vmem:[%s2836_s4 + $0x8] sm:$0xf]  ;;  %v426_v18 = vld [vmem:[%s2836_s4 + $0x10] sm:$0xf] }
  0x46   : > { %423 = vst [vmem:[%s404_s20] sm:$0xf] %v422_v16  ;;  %425 = vst [vmem:[%s404_s20 + $0x4] sm:$0xf] %v424_v17  ;;  %v428_v19 = vld [vmem:[%s2836_s4 + $0x18] sm:$0xf] }
  0x47   : > { %v430_v20 = vld [vmem:[%s2836_s4 + $0x20] sm:$0xf]  ;;  %427 = vst [vmem:[%s404_s20 + $0x8] sm:$0xf] %v426_v18  ;;  %429 = vst [vmem:[%s404_s20 + $0xc] sm:$0xf] %v428_v19 }
  0x48   : > { %431 = vst [vmem:[%s404_s20 + $0x10] sm:$0xf] %v430_v20  ;;  %v432_v21 = vld [vmem:[%s2836_s4 + $0x28] sm:$0xf]  ;;  %v434_v22 = vld [vmem:[%s2836_s4 + $0x30] sm:$0xf] }
  0x49   : > { %v436_v23 = vld [vmem:[%s2836_s4 + $0x38] sm:$0xf]  ;;  %433 = vst [vmem:[%s404_s20 + $0x14] sm:$0xf] %v432_v21  ;;  %435 = vst [vmem:[%s404_s20 + $0x18] sm:$0xf] %v434_v22 }
  0x4a   : > { %437 = vst [vmem:[%s404_s20 + $0x1c] sm:$0xf] %v436_v23  ;;  %v438_v24 = vld [vmem:[%s2836_s4 + $0x40] sm:$0xf]  ;;  %v440_v25 = vld [vmem:[%s2836_s4 + $0x48] sm:$0xf] }
  0x4b   : > { %v442_v26 = vld [vmem:[%s2836_s4 + $0x50] sm:$0xf]  ;;  %439 = vst [vmem:[%s404_s20 + $0x20] sm:$0xf] %v438_v24  ;;  %441 = vst [vmem:[%s404_s20 + $0x24] sm:$0xf] %v440_v25 }
  0x4c   : > { %443 = vst [vmem:[%s404_s20 + $0x28] sm:$0xf] %v442_v26  ;;  %v444_v27 = vld [vmem:[%s2836_s4 + $0x58] sm:$0xf]  ;;  %v446_v28 = vld [vmem:[%s2836_s4 + $0x60] sm:$0xf] }
  0x4d   : > { %v448_v29 = vld [vmem:[%s2836_s4 + $0x68] sm:$0xf]  ;;  %445 = vst [vmem:[%s404_s20 + $0x2c] sm:$0xf] %v444_v27  ;;  %447 = vst [vmem:[%s404_s20 + $0x30] sm:$0xf] %v446_v28 }
  0x4e   : > { %449 = vst [vmem:[%s404_s20 + $0x34] sm:$0xf] %v448_v29  ;;  %v450_v30 = vld [vmem:[%s2836_s4 + $0x70] sm:$0xf]  ;;  %v452_v31 = vld [vmem:[%s2836_s4 + $0x78] sm:$0xf] }
  0x4f   : > { %451 = vst [vmem:[%s404_s20 + $0x38] sm:$0xf] %v450_v30  ;;  %453 = vst [vmem:[%s404_s20 + $0x3c] sm:$0xf] %v452_v31 }
  0x50 PF: > { %p1982_p1 = scmp.ge.s32.totalorder %s2651_s12, 1  ;;  %p516_p2 = scmp.lt.s32.totalorder %s2651_s12, 9 }
  0x52   : > { %p517_p3 = pnand %p1982_p1, %p516_p2 }
  0x53   : > { %s523_s15 = sand.u32 (!%p517_p3), 1, %s2619_s27   ;;  %s3296_s7 = sand.u32 (!%p517_p3), 1, %s2611_s25  }
  0x54   : > { %520 = sbr.rel (%p517_p3) target bundleno = 1097 (0x449), region = 122  ;;  %s1983_s4 = sshll.u32 (!%p517_p3), %s523_s15, 6 }
  0x55   : > { %s1985_s17 = sshll.u32 (!%p517_p3), %s3296_s7, 7  ;;  %s2861_s13 = sshll.u32 (!%p517_p3), %s2631_s30, 4 }
  0x56   : > { %p589_p4 = scmp.lt.s32.totalorder (!%p517_p3), %s2635_s8, 1  ;;  %p591_p5 = scmp.lt.s32.totalorder (!%p517_p3), %s2861_s13, 31 }
  0x57   : > { %s1992_s14 = sshll.u32 (!%p517_p3), %s2627_s29, 4  ;;  %p1994_p7 = scmp.ne.s32.totalorder (!%p517_p3), %s2627_s29, 0 }
  0x58   : > { %p609_p6 = scmp.lt.s32.totalorder (!%p517_p3), %s1992_s14, 31 }
  0x5b   : > { %s590_s22 = scalar_select %p589_p4, %s2635_s8, 1 }
  0x5c   : > { %s592_s18 = scalar_select %p591_p5, %s2861_s13, 31 }
  0x5d   : > { %s1987_s20 = sshll.u32 %s590_s22, 5  ;;  %s3344_s14 = smov (!%p609_p6, %s1992_s14), 31  ;;  %v2389_v32 = vld [vmem:[%s3283_s2] sm:$0xff] (!%p1994_p7)   ;;  %v2390_v33 = vld [vmem:[%s3283_s2 + $0x8] sm:$0xff] (!%p1994_p7)   ;;  %v2391_v34 = vld [vmem:[%s3283_s2 + $0x10] sm:$0xff] (!%p1994_p7)  }
  0x5e   : > { %s594_s5 = sadd.s32 %s1987_s20, %s592_s18  ;;  %s1993_s28 = sshll.u32 %s3344_s14, 2  ;;  %2123 = vmatprep.subr.bf16.mxu0 (!%p1994_p7), %v2389_v32  ;;  %2251 = vmatprep.subr.bf16.mxu1 (!%p1994_p7), %v2389_v32  ;;  %v2392_v35 = vld [vmem:[%s3283_s2 + $0x18] sm:$0xff] (!%p1994_p7)   ;;  %v2393_v38 = vld [vmem:[%s3283_s2 + $0x20] sm:$0xff] (!%p1994_p7)   ;;  %v2394_v39 = vld [vmem:[%s3283_s2 + $0x28] sm:$0xff] (!%p1994_p7)  }
  0x5f   : > { %s1988_s11 = sshll.u32 %s594_s5, 3  ;;  %s1991_s10 = sshll.u32 %s594_s5, 2  ;;  %2124 = vmatpush3.bf16.msra.mxu0 (!%p1994_p7), %v2389_v32  ;;  %2259 = vmatpush3.bf16.msra.mxu1 (!%p1994_p7), %v2389_v32  ;;  %v2395_v40 = vld [vmem:[%s3283_s2 + $0x30] sm:$0xff] (!%p1994_p7)   ;;  %v2396_v41 = vld [vmem:[%s3283_s2 + $0x38] sm:$0xff] (!%p1994_p7)  }
  0x60   : > { %s2871_s15 = scalar_lea.vmem %s3281_s0, %s1988_s11  ;;  %s2876_s21 = scalar_lea.vmem %s3282_s1, %s1991_s10  ;;  %2125 = vmatprep.subr.bf16.mxu0 (!%p1994_p7), %v2390_v33  ;;  %2252 = vmatprep.subr.bf16.mxu1 (!%p1994_p7), %v2390_v33 }
  0x61   : > { %s2881_s22 = scalar_lea.vmem %s3287_s6, %s1993_s28  ;;  %s2883_s18 = scalar_lea.vmem [#allocation5], %s1983_s4  ;;  %v2397_v36 = vld [vmem:[%s2876_s21] sm:$0xff] (!%p1994_p7)   ;;  %v2399_v42 = vld [vmem:[%s2876_s21 + $0x8] sm:$0xff] (!%p1994_p7)   ;;  %v2401_v44 = vld [vmem:[%s2876_s21 + $0x10] sm:$0xff] (!%p1994_p7)  }
  0x62   : > { %s2885_s5 = scalar_lea.vmem [#allocation6], %s1983_s4  ;;  %s2887_s20 = scalar_lea.vmem [#allocation7], %s1985_s17  ;;  %v2398_v37 = vld [vmem:[%s2876_s21 + $0x20] sm:$0xff] (!%p1994_p7)   ;;  %2139 = vmatprep.mubr.bf16.mxu0 (!%p1994_p7), %v2397_v36  ;;  %v2400_v43 = vld [vmem:[%s2876_s21 + $0x28] sm:$0xff] (!%p1994_p7)   ;;  %v2403_v45 = vld [vmem:[%s2876_s21 + $0x30] sm:$0xff] (!%p1994_p7)  }
  0x63   : > { %619 = sbr.rel (%p1994_p7) target bundleno = 535 (0x217), region = 134  ;;  %2126 = vmatpush3.bf16.msra.mxu0 (!%p1994_p7), %v2390_v33  ;;  %2260 = vmatpush3.bf16.msra.mxu1 (!%p1994_p7), %v2390_v33  ;;  %v2402_v46 = vld [vmem:[%s2876_s21 + $0x18] sm:$0xff] (!%p1994_p7)   ;;  %v847_v48 = vld [vmem:[%s2871_s15 + $0x10] sm:$0xff] (!%p1994_p7)  ;;  %v845_v50 = vld [vmem:[%s2871_s15] sm:$0xff] (!%p1994_p7) }
  0x64   : > { %2127 = vmatprep.subr.bf16.mxu0 (!%p1994_p7), %v2391_v34  ;;  %2253 = vmatprep.subr.bf16.mxu1 (!%p1994_p7), %v2391_v34  ;;  %v2404_v47 = vld [vmem:[%s2876_s21 + $0x38] sm:$0xff] (!%p1994_p7)   ;;  %v855_v49 = vld [vmem:[%s2871_s15 + $0x50] sm:$0xff] (!%p1994_p7)  ;;  %v853_v51 = vld [vmem:[%s2871_s15 + $0x40] sm:$0xff] (!%p1994_p7) }
  0x65   : > { %2147 = vmatprep.mubr.bf16.mxu1 (!%p1994_p7), %v2398_v37  ;;  %v848_v54 = vld [vmem:[%s2871_s15 + $0x18] sm:$0xff] (!%p1994_p7)  ;;  %v846_v60 = vld [vmem:[%s2871_s15 + $0x8] sm:$0xff] (!%p1994_p7)  ;;  %v851_v10 = vld [vmem:[%s2871_s15 + $0x30] sm:$0xff] (!%p1994_p7) }
  0x66   : > { %v856_v55 = vld [vmem:[%s2871_s15 + $0x58] sm:$0xff] (!%p1994_p7)  ;;  %v854_v61 = vld [vmem:[%s2871_s15 + $0x48] sm:$0xff] (!%p1994_p7)  ;;  %v859_v11 = vld [vmem:[%s2871_s15 + $0x70] sm:$0xff] (!%p1994_p7) }
  0x67   : > { %2128 = vmatpush3.bf16.msra.mxu0 (!%p1994_p7), %v2391_v34  ;;  %2261 = vmatpush3.bf16.msra.mxu1 (!%p1994_p7), %v2391_v34  ;;  %v849_v14 = vld [vmem:[%s2871_s15 + $0x20] sm:$0xff] (!%p1994_p7)  ;;  %v852_v17 = vld [vmem:[%s2871_s15 + $0x38] sm:$0xff] (!%p1994_p7)  ;;  %v850_v22 = vld [vmem:[%s2871_s15 + $0x28] sm:$0xff] (!%p1994_p7) }
  0x68   : > { %2129 = vmatprep.subr.bf16.mxu0 (!%p1994_p7), %v2392_v35  ;;  %2254 = vmatprep.subr.bf16.mxu1 (!%p1994_p7), %v2392_v35  ;;  %v857_v15 = vld [vmem:[%s2871_s15 + $0x60] sm:$0xff] (!%p1994_p7)  ;;  %v860_v19 = vld [vmem:[%s2871_s15 + $0x78] sm:$0xff] (!%p1994_p7)  ;;  %v858_v25 = vld [vmem:[%s2871_s15 + $0x68] sm:$0xff] (!%p1994_p7) }
  0x6b   : > { %2130 = vmatpush3.bf16.msra.mxu0 %v2392_v35  ;;  %2262 = vmatpush3.bf16.msra.mxu1 %v2392_v35 }
  0x6c   : > { %2131 = vmatprep.subr.bf16.mxu0 %v2393_v38  ;;  %2255 = vmatprep.subr.bf16.mxu1 %v2393_v38 }
  0x6f   : > { %2132 = vmatpush3.bf16.msra.mxu0 %v2393_v38  ;;  %2263 = vmatpush3.bf16.msra.mxu1 %v2393_v38 }
  0x70   : > { %2133 = vmatprep.subr.bf16.mxu0 %v2394_v39  ;;  %2256 = vmatprep.subr.bf16.mxu1 %v2394_v39 }
  0x73   : > { %2134 = vmatpush3.bf16.msra.mxu0 %v2394_v39  ;;  %2264 = vmatpush3.bf16.msra.mxu1 %v2394_v39 }
  0x74   : > { %2135 = vmatprep.subr.bf16.mxu0 %v2395_v40  ;;  %2257 = vmatprep.subr.bf16.mxu1 %v2395_v40 }
  0x77   : > { %2136 = vmatpush3.bf16.msra.mxu0 %v2395_v40  ;;  %2265 = vmatpush3.bf16.msra.mxu1 %v2395_v40 }
  0x78   : > { %2137 = vmatprep.subr.bf16.mxu0 %v2396_v41  ;;  %2258 = vmatprep.subr.bf16.mxu1 %v2396_v41 }
  0x7b   : > { %2138 = vmatpush3.bf16.msra.mxu0 %v2396_v41  ;;  %2266 = vmatpush3.bf16.msra.mxu1 %v2396_v41 }
  0x7e   : > { %2140 = vmatmul.mubr.bf16.vlgmr.msra.gmra.mrb[0].mxu0 %v2399_v42  ;;  %2148 = vmatmul.mubr.bf16.vlgmr.msra.gmra.mrb[0].mxu1 %v2400_v43 }
  0x7f   : > { %2143 = vmatprep.mubr.bf16.mxu0 %v2401_v44  ;;  %2151 = vmatprep.mubr.bf16.mxu1 %v2403_v45 }
  0x86   : > { %2144 = vmatmul.mubr.bf16.gmra.mrb[4].mxu0 %v2402_v46  ;;  %2152 = vmatmul.mubr.bf16.gmra.mrb[4].mxu1 %v2404_v47 }
 0x151   : > { %v2141_v52 = vpop.f32.mrb[0].mxu0  ;;  %v2149_v53 = vpop.f32.mrb[0].mxu1 }
 0x152   : > { %v2928_v56 = vadd.f32 %v2141_v52, %v847_v48  ;;  %v2930_v57 = vadd.f32 %v2149_v53, %v855_v49  ;;  %v782_v58 = vpop.f32.mrb[1].mxu0  ;;  %v814_v59 = vpop.f32.mrb[1].mxu1  ;;  %v2653_v48 = vmov 0.0  }
 0x153   : > { %v2934_v62 = vadd.f32 %v845_v50, %v782_v58  ;;  %v2936_v63 = vadd.f32 %v853_v51, %v814_v59  ;;  %v2142_v0 = vpop.f32.mrb[2].mxu0  ;;  %v2150_v1 = vpop.f32.mrb[2].mxu1  ;;  %1045 = vst [vmem:[#allocation4] sm:$0xff] %v2653_v48  ;;  %1046 = vst [vmem:[#allocation4 + $0x8] sm:$0xff] %v2653_v48 }
 0x154   : > { %879 = vst [vmem:[#allocation2 + $0x10] sm:$0xff] %v2928_v56  ;;  %887 = vst [vmem:[#allocation2 + $0x50] sm:$0xff] %v2930_v57  ;;  %v2940_v2 = vadd.f32 %v2142_v0, %v848_v54  ;;  %v2942_v3 = vadd.f32 %v2150_v1, %v856_v55  ;;  %v785_v4 = vpop.f32.mrb[3].mxu0  ;;  %v817_v5 = vpop.f32.mrb[3].mxu1  ;;  %v903_v6 = vmul.f32 %v2930_v57, %v2930_v57 }
 0x155   : > { %v895_v7 = vmul.f32 %v2928_v56, %v2928_v56  ;;  %877 = vst [vmem:[#allocation2] sm:$0xff] %v2934_v62  ;;  %885 = vst [vmem:[#allocation2 + $0x40] sm:$0xff] %v2936_v63  ;;  %v2950_v8 = vadd.f32 %v846_v60, %v785_v4  ;;  %v2952_v9 = vadd.f32 %v854_v61, %v817_v5 }
 0x156   : > { %880 = vst [vmem:[#allocation2 + $0x18] sm:$0xff] %v2940_v2  ;;  %888 = vst [vmem:[#allocation2 + $0x58] sm:$0xff] %v2942_v3  ;;  %929 = vadd.xlane.f32.xlu0 %v903_v6  ;;  %v893_v12 = vmul.f32 %v2934_v62, %v2934_v62  ;;  %v896_v13 = vmul.f32 %v2940_v2, %v2940_v2  ;;  %v901_v30 = vmul.f32 %v2936_v63, %v2936_v63 }
 0x157   : > { %913 = vadd.xlane.f32.xlu1 %v895_v7  ;;  %878 = vst [vmem:[#allocation2 + $0x8] sm:$0xff] %v2950_v8  ;;  %886 = vst [vmem:[#allocation2 + $0x48] sm:$0xff] %v2952_v9  ;;  %v904_v31 = vmul.f32 %v2942_v3, %v2942_v3  ;;  %v902_v38 = vmul.f32 %v2952_v9, %v2952_v9  ;;  %v894_v39 = vmul.f32 %v2950_v8, %v2950_v8 }
 0x158   : > { %1047 = vst [vmem:[#allocation4 + $0x10] sm:$0xff] %v2653_v48  ;;  %1048 = vst [vmem:[#allocation4 + $0x18] sm:$0xff] %v2653_v48 }
 0x159   : > { %v2145_v16 = vpop.f32.mrb[4].mxu0  ;;  %v2153_v18 = vpop.f32.mrb[4].mxu1  ;;  %1049 = vst [vmem:[#allocation4 + $0x20] sm:$0xff] %v2653_v48  ;;  %1050 = vst [vmem:[#allocation4 + $0x28] sm:$0xff] %v2653_v48 }
 0x15a   : > { %909 = vadd.xlane.f32.xlu0 %v893_v12  ;;  %v2968_v20 = vadd.f32 %v2145_v16, %v851_v10  ;;  %v798_v21 = vpop.f32.mrb[5].mxu0  ;;  %v2971_v23 = vadd.f32 %v2153_v18, %v859_v11  ;;  %v830_v24 = vpop.f32.mrb[5].mxu1  ;;  %1051 = vst [vmem:[#allocation4 + $0x30] sm:$0xff] %v2653_v48  ;;  %1052 = vst [vmem:[#allocation4 + $0x38] sm:$0xff] %v2653_v48 }
 0x15b   : > { %915 = vadd.xlane.f32.xlu1 %v896_v13  ;;  %v2974_v26 = vadd.f32 %v849_v14, %v798_v21  ;;  %v2146_v27 = vpop.f32.mrb[6].mxu0  ;;  %v2976_v28 = vadd.f32 %v857_v15, %v830_v24  ;;  %v2154_v29 = vpop.f32.mrb[6].mxu1  ;;  %1053 = vst [vmem:[#allocation4 + $0x40] sm:$0xff] %v2653_v48  ;;  %1054 = vst [vmem:[#allocation4 + $0x48] sm:$0xff] %v2653_v48 }
 0x15c   : > { %883 = vst [vmem:[#allocation2 + $0x30] sm:$0xff] %v2968_v20  ;;  %v2983_v32 = vadd.f32 %v2146_v27, %v852_v17  ;;  %v801_v33 = vpop.f32.mrb[7].mxu0  ;;  %891 = vst [vmem:[#allocation2 + $0x70] sm:$0xff] %v2971_v23  ;;  %v2986_v34 = vadd.f32 %v2154_v29, %v860_v19  ;;  %v833_v35 = vpop.f32.mrb[7].mxu1  ;;  %v899_v40 = vmul.f32 %v2968_v20, %v2968_v20 }
 0x15d   : > { %881 = vst [vmem:[#allocation2 + $0x20] sm:$0xff] %v2974_v26  ;;  %v2989_v36 = vadd.f32 %v850_v22, %v801_v33  ;;  %889 = vst [vmem:[#allocation2 + $0x60] sm:$0xff] %v2976_v28  ;;  %v2992_v37 = vadd.f32 %v858_v25, %v833_v35  ;;  %v897_v42 = vmul.f32 %v2974_v26, %v2974_v26 }
 0x15e   : > { %925 = vadd.xlane.f32.xlu0 %v901_v30  ;;  %884 = vst [vmem:[#allocation2 + $0x38] sm:$0xff] %v2983_v32  ;;  %892 = vst [vmem:[#allocation2 + $0x78] sm:$0xff] %v2986_v34  ;;  %v900_v41 = vmul.f32 %v2983_v32, %v2983_v32  ;;  %v905_v44 = vmul.f32 %v2976_v28, %v2976_v28  ;;  %v907_v46 = vmul.f32 %v2971_v23, %v2971_v23 }
 0x15f   : > { %931 = vadd.xlane.f32.xlu1 %v904_v31  ;;  %882 = vst [vmem:[#allocation2 + $0x28] sm:$0xff] %v2989_v36  ;;  %890 = vst [vmem:[#allocation2 + $0x68] sm:$0xff] %v2992_v37  ;;  %v898_v43 = vmul.f32 %v2989_v36, %v2989_v36  ;;  %v906_v45 = vmul.f32 %v2992_v37, %v2992_v37  ;;  %v908_v47 = vmul.f32 %v2986_v34, %v2986_v34  ;;  %v3022_v31 = vld [vmem:[%s3284_s3] ss:$0 sm:$0xff] }
 0x160   : > { %1055 = vst [vmem:[#allocation4 + $0x50] sm:$0xff] %v2653_v48  ;;  %1056 = vst [vmem:[#allocation4 + $0x58] sm:$0xff] %v2653_v48 }
 0x161   : > { %1057 = vst [vmem:[#allocation4 + $0x60] sm:$0xff] %v2653_v48  ;;  %1058 = vst [vmem:[#allocation4 + $0x68] sm:$0xff] %v2653_v48 }
 0x162   : > { %911 = vadd.xlane.f32.xlu0 %v894_v39  ;;  %1059 = vst [vmem:[#allocation4 + $0x70] sm:$0xff] %v2653_v48  ;;  %1060 = vst [vmem:[#allocation4 + $0x78] sm:$0xff] %v2653_v48 }
 0x163   : > { %927 = vadd.xlane.f32.xlu1 %v902_v38 }
 0x166   : > { %921 = vadd.xlane.f32.xlu0 %v899_v40 }
 0x167   : > { %923 = vadd.xlane.f32.xlu1 %v900_v41 }
 0x16a   : > { %917 = vadd.xlane.f32.xlu0 %v897_v42 }
 0x16b   : > { %919 = vadd.xlane.f32.xlu1 %v898_v43 }
 0x16e   : > { %933 = vadd.xlane.f32.xlu0 %v905_v44 }
 0x16f   : > { %935 = vadd.xlane.f32.xlu1 %v906_v45 }
 0x172   : > { %937 = vadd.xlane.f32.xlu0 %v907_v46 }
 0x173   : > { %939 = vadd.xlane.f32.xlu1 %v908_v47 }
 0x1e3   : > { %v930_v49 = vpop.xlane.xlu0 %929 }
 0x1e4   : > { %v914_v50 = vpop.xlane.xlu1 %913  ;;  %v952_v51 = vmul.f32 0.0078125, %v930_v49 }
 0x1e5   : > { %v944_v52 = vmul.f32 0.0078125, %v914_v50 }
 0x1e6   : > { %v968_v58 = vadd.f32 1e-05, %v952_v51 }
 0x1e7   : > { %v960_v53 = vadd.f32 1e-05, %v944_v52  ;;  %v910_v54 = vpop.xlane.xlu0 %909 }
 0x1e8   : > { %v916_v55 = vpop.xlane.xlu1 %915  ;;  %v942_v59 = vmul.f32 0.0078125, %v910_v54 }
 0x1e9   : > { %v945_v60 = vmul.f32 0.0078125, %v916_v55  ;;  %2405 = vrsqrt.f32 %v960_v53 }
 0x1ea   : > { %v958_v0 = vadd.f32 1e-05, %v942_v59  ;;  %2407 = vrsqrt.f32 %v968_v58 }
 0x1eb   : > { %v961_v61 = vadd.f32 1e-05, %v945_v60  ;;  %v926_v1 = vpop.xlane.xlu0 %925 }
 0x1ec   : > { %v932_v4 = vpop.xlane.xlu1 %931  ;;  %v950_v5 = vmul.f32 0.0078125, %v926_v1 }
 0x1ed   : > { %v953_v6 = vmul.f32 0.0078125, %v932_v4  ;;  %2409 = vrsqrt.f32 %v961_v61 }
 0x1ee   : > { %v966_v7 = vadd.f32 1e-05, %v950_v5  ;;  %2411 = vrsqrt.f32 %v958_v0 }
 0x1ef   : > { %v969_v10 = vadd.f32 1e-05, %v953_v6  ;;  %v912_v12 = vpop.xlane.xlu0 %911 }
 0x1f0   : > { %v928_v11 = vpop.xlane.xlu1 %927  ;;  %2413 = vrsqrt.f32 %v966_v7  ;;  %v943_v14 = vmul.f32 0.0078125, %v912_v12 }
 0x1f1   : > { %v951_v13 = vmul.f32 0.0078125, %v928_v11  ;;  %2415 = vrsqrt.f32 %v969_v10 }
 0x1f2   : > { %v959_v16 = vadd.f32 1e-05, %v943_v14 }
 0x1f3   : > { %v967_v15 = vadd.f32 1e-05, %v951_v13  ;;  %v2406_v17 = vpop.eup %2405  ;;  %v922_v18 = vpop.xlane.xlu0 %921 }
 0x1f4   : > { %v924_v19 = vpop.xlane.xlu1 %923  ;;  %v948_v21 = vmul.f32 0.0078125, %v922_v18  ;;  %v2408_v24 = vpop.eup %2407  ;;  %v992_v25 = vmul.f32 %v2406_v17, %v2928_v56 }
 0x1f5   : > { %2417 = vrsqrt.f32 %v967_v15  ;;  %v949_v22 = vmul.f32 0.0078125, %v924_v19  ;;  %v1000_v42 = vmul.f32 %v2408_v24, %v2930_v57 }
 0x1f6   : > { %2419 = vrsqrt.f32 %v959_v16  ;;  %v964_v27 = vadd.f32 1e-05, %v948_v21  ;;  %v1015_v43 = vmul.f32 %v3022_v31, %v992_v25 }
 0x1f7   : > { %v965_v29 = vadd.f32 1e-05, %v949_v22  ;;  %v2410_v30 = vpop.eup %2409  ;;  %v918_v33 = vpop.xlane.xlu0 %917  ;;  %v1023_v54 = vmul.f32 %v3022_v31, %v1000_v42 }
 0x1f8   : > { %v920_v35 = vpop.xlane.xlu1 %919  ;;  %v993_v38 = vmul.f32 %v2410_v30, %v2940_v2  ;;  %2421 = vrsqrt.f32 %v964_v27  ;;  %v946_v39 = vmul.f32 0.0078125, %v918_v33  ;;  %v2412_v41 = vpop.eup %2411 }
 0x1f9   : > { %v947_v40 = vmul.f32 0.0078125, %v920_v35  ;;  %2423 = vrsqrt.f32 %v965_v29  ;;  %v990_v55 = vmul.f32 %v2412_v41, %v2934_v62 }
 0x1fa   : > { %v2414_v56 = vpop.eup %2413  ;;  %v1016_v44 = vmul.f32 %v3022_v31, %v993_v38  ;;  %v962_v45 = vadd.f32 1e-05, %v946_v39 }
 0x1fb   : > { %v963_v46 = vadd.f32 1e-05, %v947_v40  ;;  %v2416_v47 = vpop.eup %2415  ;;  %v934_v48 = vpop.xlane.xlu0 %933  ;;  %v998_v52 = vmul.f32 %v2414_v56, %v2936_v63  ;;  %v1013_v11 = vmul.f32 %v3022_v31, %v990_v55 }
 0x1fc   : > { %v936_v49 = vpop.xlane.xlu1 %935  ;;  %v1030_v50 = vpack.c.bf16 %v1016_v44, %v1015_v43  ;;  %v1001_v2 = vmul.f32 %v2416_v47, %v2942_v3  ;;  %2425 = vrsqrt.f32 %v962_v45  ;;  %v954_v51 = vmul.f32 0.0078125, %v934_v48 }
 0x1fd   : > { %2427 = vrsqrt.f32 %v963_v46  ;;  %v955_v57 = vmul.f32 0.0078125, %v936_v49  ;;  %v1021_v6 = vmul.f32 %v3022_v31, %v998_v52 }
 0x1fe   : > { %1038 = vst [vmem:[#allocation3 + $0x8] sm:$0xff] %v1030_v50  ;;  %v1024_v58 = vmul.f32 %v3022_v31, %v1001_v2  ;;  %v970_v59 = vadd.f32 1e-05, %v954_v51 }
 0x1ff   : > { %v2418_v53 = vpop.eup %2417  ;;  %v971_v0 = vadd.f32 1e-05, %v955_v57  ;;  %v938_v3 = vpop.xlane.xlu0 %937 }
 0x200   : > { %v2420_v60 = vpop.eup %2419  ;;  %v999_v61 = vmul.f32 %v2418_v53, %v2952_v9  ;;  %v940_v1 = vpop.xlane.xlu1 %939  ;;  %v1034_v4 = vpack.c.bf16 %v1024_v58, %v1023_v54  ;;  %2429 = vrsqrt.f32 %v970_v59  ;;  %v956_v5 = vmul.f32 0.0078125, %v938_v3 }
 0x201   : > { %v991_v63 = vmul.f32 %v2420_v60, %v2950_v8  ;;  %2431 = vrsqrt.f32 %v971_v0  ;;  %v957_v62 = vmul.f32 0.0078125, %v940_v1 }
 0x202   : > { %v1022_v7 = vmul.f32 %v3022_v31, %v999_v61  ;;  %v2422_v10 = vpop.eup %2421  ;;  %1042 = vst [vmem:[#allocation3 + $0x28] sm:$0xff] %v1034_v4  ;;  %v972_v12 = vadd.f32 1e-05, %v956_v5 }
 0x203   : > { %v1014_v9 = vmul.f32 %v3022_v31, %v991_v63  ;;  %v2424_v13 = vpop.eup %2423  ;;  %v996_v15 = vmul.f32 %v2422_v10, %v2968_v20  ;;  %v973_v8 = vadd.f32 1e-05, %v957_v62 }
 0x204   : > { %v1033_v14 = vpack.c.bf16 %v1022_v7, %v1021_v6  ;;  %v997_v17 = vmul.f32 %v2424_v13, %v2983_v32  ;;  %2433 = vrsqrt.f32 %v972_v12 }
 0x205   : > { %v1029_v16 = vpack.c.bf16 %v1014_v9, %v1013_v11  ;;  %v1019_v18 = vmul.f32 %v3022_v31, %v996_v15  ;;  %2435 = vrsqrt.f32 %v973_v8 }
 0x206   : > { %1041 = vst [vmem:[#allocation3 + $0x20] sm:$0xff] %v1033_v14  ;;  %v2426_v19 = vpop.eup %2425  ;;  %v1020_v21 = vmul.f32 %v3022_v31, %v997_v17 }
 0x207   : > { %1037 = vst [vmem:[#allocation3] sm:$0xff] %v1029_v16  ;;  %v2428_v22 = vpop.eup %2427  ;;  %v994_v24 = vmul.f32 %v2426_v19, %v2974_v26 }
 0x208   : > { %v1032_v25 = vpack.c.bf16 %v1020_v21, %v1019_v18  ;;  %v995_v27 = vmul.f32 %v2428_v22, %v2989_v36 }
 0x209   : > { %v1017_v20 = vmul.f32 %v3022_v31, %v994_v24 }
 0x20a   : > { %v2430_v29 = vpop.eup %2429  ;;  %1040 = vst [vmem:[#allocation3 + $0x18] sm:$0xff] %v1032_v25  ;;  %v1018_v32 = vmul.f32 %v3022_v31, %v995_v27 }
 0x20b   : > { %v2432_v30 = vpop.eup %2431  ;;  %v1002_v33 = vmul.f32 %v2430_v29, %v2976_v28 }
 0x20c   : > { %v1031_v35 = vpack.c.bf16 %v1018_v32, %v1017_v20  ;;  %v1003_v38 = vmul.f32 %v2432_v30, %v2992_v37 }
 0x20d   : > { %v1025_v39 = vmul.f32 %v3022_v31, %v1002_v33 }
 0x20e   : > { %v2434_v40 = vpop.eup %2433  ;;  %1039 = vst [vmem:[#allocation3 + $0x10] sm:$0xff] %v1031_v35  ;;  %v1026_v26 = vmul.f32 %v3022_v31, %v1003_v38 }
 0x20f   : > { %v2436_v41 = vpop.eup %2435  ;;  %v1004_v36 = vmul.f32 %v2434_v40, %v2971_v23 }
 0x210   : > { %v1035_v42 = vpack.c.bf16 %v1026_v26, %v1025_v39  ;;  %v1005_v56 = vmul.f32 %v2436_v41, %v2986_v34 }
 0x211   : > { %v1027_v43 = vmul.f32 %v3022_v31, %v1004_v36 }
 0x212   : > { %1043 = vst [vmem:[#allocation3 + $0x30] sm:$0xff] %v1035_v42  ;;  %v1028_v28 = vmul.f32 %v3022_v31, %v1005_v56 }
 0x214   : > { %v1036_v44 = vpack.c.bf16 %v1028_v28, %v1027_v43 }
 0x216   : > { %1044 = vst [vmem:[#allocation3 + $0x38] sm:$0xff] %v1036_v44 }
 0x217 PF: > { %v2437_v37 = vld [vmem:[%s2883_s18] sm:$0xff]   ;;  %v2438_v23 = vld [vmem:[%s2883_s18 + $0x8] sm:$0xff]   ;;  %v2439_v34 = vld [vmem:[%s2883_s18 + $0x10] sm:$0xff]   ;;  %p2052_p8 = scmp.ne.s32.totalorder %s2627_s29, 1 }
 0x218   : > { %2155 = vmatprep.subr.bf16.mxu0 %v2437_v37  ;;  %v2444_v45 = vld [vmem:[%s2885_s5] sm:$0xff]   ;;  %v2440_v31 = vld [vmem:[%s2883_s18 + $0x18] sm:$0xff]   ;;  %v2446_v46 = vld [vmem:[%s2885_s5 + $0x8] sm:$0xff]  }
 0x219   : > { %2156 = vmatpush3.bf16.msra.mxu0 %v2437_v37  ;;  %2187 = vmatprep.subr.bf16.mxu1 %v2444_v45  ;;  %v1061_v47 = vld [vmem:[#allocation3] sm:$0xff]  ;;  %v2447_v48 = vld [vmem:[%s2885_s5 + $0x10] sm:$0xff]   ;;  %v2448_v50 = vld [vmem:[%s2885_s5 + $0x18] sm:$0xff]  }
 0x21a   : > { %2157 = vmatprep.subr.bf16.mxu0 %v2438_v23  ;;  %2188 = vmatpush3.bf16.msra.mxu1 %v2444_v45  ;;  %v2441_v49 = vld [vmem:[%s2883_s18 + $0x20] sm:$0xff]   ;;  %v2442_v2 = vld [vmem:[%s2883_s18 + $0x28] sm:$0xff]   ;;  %v2443_v51 = vld [vmem:[%s2883_s18 + $0x30] sm:$0xff]  }
 0x21b   : > { %2189 = vmatprep.subr.bf16.mxu1 %v2446_v46  ;;  %2171 = vmatprep.mubr.bf16.mxu0 %v1061_v47  ;;  %v2449_v52 = vld [vmem:[%s2885_s5 + $0x20] sm:$0xff]   ;;  %v2450_v57 = vld [vmem:[%s2885_s5 + $0x28] sm:$0xff]   ;;  %v2445_v53 = vld [vmem:[%s2883_s18 + $0x38] sm:$0xff]  }
 0x21c   : > { %2203 = vmatprep.mubr.bf16.mxu1 %v1061_v47  ;;  %v2451_v54 = vld [vmem:[%s2885_s5 + $0x30] sm:$0xff]   ;;  %v1062_v55 = vld [vmem:[#allocation3 + $0x8] sm:$0xff]  ;;  %v2452_v58 = vld [vmem:[%s2885_s5 + $0x38] sm:$0xff]  }
 0x21d   : > { %2158 = vmatpush3.bf16.msra.mxu0 %v2438_v23  ;;  %v1063_v59 = vld [vmem:[#allocation3 + $0x10] sm:$0xff]  ;;  %v1064_v60 = vld [vmem:[#allocation3 + $0x18] sm:$0xff]  ;;  %v1065_v61 = vld [vmem:[#allocation3 + $0x20] sm:$0xff] }
 0x21e   : > { %2159 = vmatprep.subr.bf16.mxu0 %v2439_v34  ;;  %2190 = vmatpush3.bf16.msra.mxu1 %v2446_v46  ;;  %v1066_v0 = vld [vmem:[#allocation3 + $0x28] sm:$0xff]  ;;  %v1067_v3 = vld [vmem:[#allocation3 + $0x30] sm:$0xff]  ;;  %v1068_v1 = vld [vmem:[#allocation3 + $0x38] sm:$0xff] }
 0x21f   : > { %2191 = vmatprep.subr.bf16.mxu1 %v2447_v48  ;;  %v2453_v4 = vld [vmem:[%s2881_s22] sm:$0xff]   ;;  %v2454_v63 = vld [vmem:[%s2881_s22 + $0x8] sm:$0xff]   ;;  %v2455_v5 = vld [vmem:[%s2881_s22 + $0x10] sm:$0xff]  }
 0x220   : > { %v2456_v6 = vld [vmem:[%s2881_s22 + $0x18] sm:$0xff]   ;;  %v2457_v7 = vld [vmem:[%s2881_s22 + $0x20] sm:$0xff]   ;;  %v2458_v62 = vld [vmem:[%s2881_s22 + $0x28] sm:$0xff]  }
 0x221   : > { %2160 = vmatpush3.bf16.msra.mxu0 %v2439_v34  ;;  %v2459_v10 = vld [vmem:[%s2881_s22 + $0x30] sm:$0xff]   ;;  %v2460_v11 = vld [vmem:[%s2881_s22 + $0x38] sm:$0xff]  }
 0x222   : > { %2161 = vmatprep.subr.bf16.mxu0 %v2440_v31  ;;  %2192 = vmatpush3.bf16.msra.mxu1 %v2447_v48 }
 0x223   : > { %2193 = vmatprep.subr.bf16.mxu1 %v2448_v50 }
 0x225   : > { %2162 = vmatpush3.bf16.msra.mxu0 %v2440_v31 }
 0x226   : > { %2163 = vmatprep.subr.bf16.mxu0 %v2441_v49  ;;  %2194 = vmatpush3.bf16.msra.mxu1 %v2448_v50 }
 0x227   : > { %2195 = vmatprep.subr.bf16.mxu1 %v2449_v52 }
 0x229   : > { %2164 = vmatpush3.bf16.msra.mxu0 %v2441_v49 }
 0x22a   : > { %2165 = vmatprep.subr.bf16.mxu0 %v2442_v2  ;;  %2196 = vmatpush3.bf16.msra.mxu1 %v2449_v52 }
 0x22b   : > { %2197 = vmatprep.subr.bf16.mxu1 %v2450_v57 }
 0x22d   : > { %2166 = vmatpush3.bf16.msra.mxu0 %v2442_v2 }
 0x22e   : > { %2167 = vmatprep.subr.bf16.mxu0 %v2443_v51  ;;  %2198 = vmatpush3.bf16.msra.mxu1 %v2450_v57 }
 0x22f   : > { %2199 = vmatprep.subr.bf16.mxu1 %v2451_v54 }
 0x231   : > { %2168 = vmatpush3.bf16.msra.mxu0 %v2443_v51 }
 0x232   : > { %2169 = vmatprep.subr.bf16.mxu0 %v2445_v53  ;;  %2200 = vmatpush3.bf16.msra.mxu1 %v2451_v54 }
 0x233   : > { %2201 = vmatprep.subr.bf16.mxu1 %v2452_v58 }
 0x235   : > { %2170 = vmatpush3.bf16.msra.mxu0 %v2445_v53 }
 0x236   : > { %2202 = vmatpush3.bf16.msra.mxu1 %v2452_v58  ;;  %2219 = vmatprep.subr.bf16.mxu0 %v2453_v4 }
 0x237   : > { %2267 = vmatprep.subr.bf16.mxu1 %v2453_v4 }
 0x238   : > { %2172 = vmatmul.mubr.bf16.vlgmr.msra.gmra.mrb[0].mxu0 %v1062_v55 }
 0x239   : > { %2175 = vmatprep.mubr.bf16.mxu0 %v1063_v59  ;;  %2204 = vmatmul.mubr.bf16.vlgmr.msra.gmra.mrb[0].mxu1 %v1062_v55 }
 0x23a   : > { %2207 = vmatprep.mubr.bf16.mxu1 %v1063_v59  ;;  %2220 = vmatpush3.bf16.msra.mxu0 %v2453_v4 }
 0x23b   : > { %2275 = vmatpush3.bf16.msra.mxu1 %v2453_v4  ;;  %2221 = vmatprep.subr.bf16.mxu0 %v2454_v63 }
 0x23c   : > { %2268 = vmatprep.subr.bf16.mxu1 %v2454_v63 }
 0x23e   : > { %2222 = vmatpush3.bf16.msra.mxu0 %v2454_v63 }
 0x23f   : > { %2276 = vmatpush3.bf16.msra.mxu1 %v2454_v63  ;;  %2223 = vmatprep.subr.bf16.mxu0 %v2455_v5 }
 0x240   : > { %2176 = vmatmul.mubr.bf16.gmra.mrb[4].mxu0 %v1064_v60  ;;  %2269 = vmatprep.subr.bf16.mxu1 %v2455_v5 }
 0x241   : > { %2179 = vmatprep.mubr.bf16.mxu0 %v1065_v61  ;;  %2208 = vmatmul.mubr.bf16.gmra.mrb[4].mxu1 %v1064_v60 }
 0x242   : > { %2211 = vmatprep.mubr.bf16.mxu1 %v1065_v61  ;;  %2224 = vmatpush3.bf16.msra.mxu0 %v2455_v5 }
 0x243   : > { %2277 = vmatpush3.bf16.msra.mxu1 %v2455_v5  ;;  %2225 = vmatprep.subr.bf16.mxu0 %v2456_v6 }
 0x244   : > { %2270 = vmatprep.subr.bf16.mxu1 %v2456_v6 }
 0x246   : > { %2226 = vmatpush3.bf16.msra.mxu0 %v2456_v6 }
 0x247   : > { %2278 = vmatpush3.bf16.msra.mxu1 %v2456_v6  ;;  %2227 = vmatprep.subr.bf16.mxu0 %v2457_v7 }
 0x248   : > { %2180 = vmatmul.mubr.bf16.gmra.mrb[8].mxu0 %v1066_v0  ;;  %2271 = vmatprep.subr.bf16.mxu1 %v2457_v7 }
 0x249   : > { %2183 = vmatprep.mubr.bf16.mxu0 %v1067_v3  ;;  %2212 = vmatmul.mubr.bf16.gmra.mrb[8].mxu1 %v1066_v0 }
 0x24a   : > { %2215 = vmatprep.mubr.bf16.mxu1 %v1067_v3  ;;  %2228 = vmatpush3.bf16.msra.mxu0 %v2457_v7 }
 0x24b   : > { %2279 = vmatpush3.bf16.msra.mxu1 %v2457_v7  ;;  %2229 = vmatprep.subr.bf16.mxu0 %v2458_v62 }
 0x24c   : > { %2272 = vmatprep.subr.bf16.mxu1 %v2458_v62 }
 0x24e   : > { %2230 = vmatpush3.bf16.msra.mxu0 %v2458_v62 }
 0x24f   : > { %2280 = vmatpush3.bf16.msra.mxu1 %v2458_v62  ;;  %2231 = vmatprep.subr.bf16.mxu0 %v2459_v10 }
 0x250   : > { %2184 = vmatmul.mubr.bf16.gmra.mrb[12].mxu0 %v1068_v1  ;;  %2273 = vmatprep.subr.bf16.mxu1 %v2459_v10 }
 0x251   : > { %2216 = vmatmul.mubr.bf16.gmra.mrb[12].mxu1 %v1068_v1 }
 0x252   : > { %2232 = vmatpush3.bf16.msra.mxu0 %v2459_v10 }
 0x253   : > { %2281 = vmatpush3.bf16.msra.mxu1 %v2459_v10  ;;  %2233 = vmatprep.subr.bf16.mxu0 %v2460_v11 }
 0x254   : > { %2274 = vmatprep.subr.bf16.mxu1 %v2460_v11 }
 0x256   : > { %2234 = vmatpush3.bf16.msra.mxu0 %v2460_v11 }
 0x257   : > { %2282 = vmatpush3.bf16.msra.mxu1 %v2460_v11 }
 0x30b   : > { %v3079_v9 = vpop.f32.mrb[0].mxu0 }
 0x30c   : > { %v2030_v12 = vmul.f32 -1.442695, %v3079_v9  ;;  %v3082_v13 = vpop.f32.mrb[1].mxu0  ;;  %v3091_v18 = vpop.f32.mrb[0].mxu1 }
 0x30d   : > { %v2028_v14 = vmul.f32 -1.442695, %v3082_v13  ;;  %v3085_v15 = vpop.f32.mrb[2].mxu0  ;;  %v3095_v21 = vpop.f32.mrb[1].mxu1 }
 0x30e   : > { %2461 = vpow2.f32 %v2030_v12  ;;  %v2031_v8 = vmul.f32 -1.442695, %v3085_v15  ;;  %v3088_v16 = vpop.f32.mrb[3].mxu0  ;;  %v3100_v25 = vpop.f32.mrb[2].mxu1 }
 0x30f   : > { %2463 = vpow2.f32 %v2028_v14  ;;  %v2029_v17 = vmul.f32 -1.442695, %v3088_v16  ;;  %v3105_v29 = vpop.f32.mrb[3].mxu1 }
 0x310   : > { %2465 = vpow2.f32 %v2031_v8 }
 0x311   : > { %2467 = vpow2.f32 %v2029_v17 }
 0x313   : > { %v3093_v19 = vpop.f32.mrb[4].mxu0 }
 0x314   : > { %v2034_v22 = vmul.f32 -1.442695, %v3093_v19  ;;  %v3098_v24 = vpop.f32.mrb[5].mxu0  ;;  %v3111_v41 = vpop.f32.mrb[4].mxu1 }
 0x315   : > { %v2032_v27 = vmul.f32 -1.442695, %v3098_v24  ;;  %v3103_v20 = vpop.f32.mrb[6].mxu0  ;;  %v3115_v43 = vpop.f32.mrb[5].mxu1 }
 0x316   : > { %2469 = vpow2.f32 %v2034_v22  ;;  %v2035_v32 = vmul.f32 -1.442695, %v3103_v20  ;;  %v3108_v30 = vpop.f32.mrb[7].mxu0  ;;  %v3120_v23 = vpop.f32.mrb[6].mxu1 }
 0x317   : > { %2471 = vpow2.f32 %v2032_v27  ;;  %v2033_v33 = vmul.f32 -1.442695, %v3108_v30  ;;  %v3125_v31 = vpop.f32.mrb[7].mxu1 }
 0x318   : > { %v2462_v35 = vpop.eup %2461  ;;  %2473 = vpow2.f32 %v2035_v32 }
 0x319   : > { %v2464_v38 = vpop.eup %2463  ;;  %v1441_v39 = vadd.f32 1.0, %v2462_v35  ;;  %2475 = vpow2.f32 %v2033_v33 }
 0x31a   : > { %v2466_v40 = vpop.eup %2465  ;;  %v1439_v26 = vadd.f32 1.0, %v2464_v38 }
 0x31b   : > { %v2468_v36 = vpop.eup %2467  ;;  %2477 = vrcp.f32 %v1441_v39  ;;  %v1442_v42 = vadd.f32 1.0, %v2466_v40  ;;  %v3113_v56 = vpop.f32.mrb[8].mxu0 }
 0x31c   : > { %2479 = vrcp.f32 %v1439_v26  ;;  %v1440_v28 = vadd.f32 1.0, %v2468_v36  ;;  %v2038_v44 = vmul.f32 -1.442695, %v3113_v56  ;;  %v3118_v37 = vpop.f32.mrb[9].mxu0  ;;  %v3131_v57 = vpop.f32.mrb[8].mxu1 }
 0x31d   : > { %2481 = vrcp.f32 %v1442_v42  ;;  %v2036_v34 = vmul.f32 -1.442695, %v3118_v37  ;;  %v3123_v45 = vpop.f32.mrb[10].mxu0  ;;  %v3135_v58 = vpop.f32.mrb[9].mxu1 }
 0x31e   : > { %2483 = vrcp.f32 %v1440_v28  ;;  %v2039_v46 = vmul.f32 -1.442695, %v3123_v45  ;;  %v3128_v47 = vpop.f32.mrb[11].mxu0  ;;  %v3140_v0 = vpop.f32.mrb[10].mxu1 }
 0x31f   : > { %2485 = vpow2.f32 %v2038_v44  ;;  %v2037_v48 = vmul.f32 -1.442695, %v3128_v47  ;;  %v3145_v63 = vpop.f32.mrb[11].mxu1 }
 0x320   : > { %v2470_v49 = vpop.eup %2469  ;;  %2487 = vpow2.f32 %v2036_v34 }
 0x321   : > { %v2472_v50 = vpop.eup %2471  ;;  %v1445_v2 = vadd.f32 1.0, %v2470_v49  ;;  %2489 = vpow2.f32 %v2039_v46 }
 0x322   : > { %v2474_v51 = vpop.eup %2473  ;;  %v1443_v52 = vadd.f32 1.0, %v2472_v50  ;;  %2491 = vpow2.f32 %v2037_v48 }
 0x323   : > { %v2476_v53 = vpop.eup %2475  ;;  %2493 = vrcp.f32 %v1445_v2  ;;  %v1446_v54 = vadd.f32 1.0, %v2474_v51  ;;  %v3133_v55 = vpop.f32.mrb[12].mxu0 }
 0x324   : > { %2495 = vrcp.f32 %v1443_v52  ;;  %v1444_v59 = vadd.f32 1.0, %v2476_v53  ;;  %v2042_v60 = vmul.f32 -1.442695, %v3133_v55  ;;  %v3138_v61 = vpop.f32.mrb[13].mxu0  ;;  %v3158_v35 = vpop.f32.mrb[12].mxu1 }
 0x325   : > { %v2478_v3 = vpop.eup %2477  ;;  %2497 = vrcp.f32 %v1446_v54  ;;  %v2040_v1 = vmul.f32 -1.442695, %v3138_v61  ;;  %v3143_v4 = vpop.f32.mrb[14].mxu0 }
 0x326   : > { %v2480_v5 = vpop.eup %2479  ;;  %v1489_v6 = vmul.f32 %v2478_v3, %v3079_v9  ;;  %2499 = vrcp.f32 %v1444_v59  ;;  %v2043_v7 = vmul.f32 -1.442695, %v3143_v4  ;;  %v3149_v62 = vpop.f32.mrb[15].mxu0 }
 0x327   : > { %v2482_v10 = vpop.eup %2481  ;;  %v1487_v11 = vmul.f32 %v2480_v5, %v3082_v13  ;;  %2501 = vpow2.f32 %v2042_v60  ;;  %v2041_v12 = vmul.f32 -1.442695, %v3149_v62  ;;  %v3161_v40 = vpop.f32.mrb[13].mxu1 }
 0x328   : > { %v2484_v14 = vpop.eup %2483  ;;  %v1490_v8 = vmul.f32 %v2482_v10, %v3085_v15  ;;  %2503 = vpow2.f32 %v2040_v1  ;;  %v1505_v17 = vmul.f32 %v3091_v18, %v1489_v6  ;;  %v3163_v36 = vpop.f32.mrb[14].mxu1 }
 0x329   : > { %v2486_v22 = vpop.eup %2485  ;;  %v1488_v9 = vmul.f32 %v2484_v14, %v3088_v16  ;;  %2505 = vpow2.f32 %v2043_v7  ;;  %v1503_v27 = vmul.f32 %v1487_v11, %v3095_v21  ;;  %v1379_v44 = vpop.f32.mrb[15].mxu1 }
 0x32a   : > { %v2488_v32 = vpop.eup %2487  ;;  %v1449_v33 = vadd.f32 1.0, %v2486_v22  ;;  %2507 = vpow2.f32 %v2041_v12  ;;  %v1506_v13 = vmul.f32 %v3100_v25, %v1490_v8 }
 0x32b   : > { %v2490_v38 = vpop.eup %2489  ;;  %v1447_v39 = vadd.f32 1.0, %v2488_v32  ;;  %v1504_v15 = vmul.f32 %v1488_v9, %v3105_v29 }
 0x32c   : > { %v2492_v18 = vpop.eup %2491  ;;  %2509 = vrcp.f32 %v1449_v33  ;;  %v1450_v26 = vadd.f32 1.0, %v2490_v38  ;;  %v1536_v16 = vpack.c.bf16 %v1506_v13, %v1505_v17 }
 0x32d   : > { %v2494_v21 = vpop.eup %2493  ;;  %2511 = vrcp.f32 %v1447_v39  ;;  %v1448_v42 = vadd.f32 1.0, %v2492_v18  ;;  %v1535_v28 = vpack.c.bf16 %v1504_v15, %v1503_v27  ;;  %v1522_v18 = vld [vmem:[#allocation4 + $0x18] sm:$0xff] }
 0x32e   : > { %v2496_v25 = vpop.eup %2495  ;;  %v1493_v34 = vmul.f32 %v2494_v21, %v3093_v19  ;;  %2513 = vrcp.f32 %v1450_v26 }
 0x32f   : > { %v2498_v46 = vpop.eup %2497  ;;  %v1491_v29 = vmul.f32 %v2496_v25, %v3098_v24  ;;  %2515 = vrcp.f32 %v1448_v42  ;;  %2235 = vmatprep.mubr.bf16.mxu0 %v1535_v28  ;;  %v1523_v28 = vld [vmem:[#allocation4 + $0x20] sm:$0xff]  ;;  %v1526_v25 = vld [vmem:[#allocation4 + $0x38] sm:$0xff] }
 0x330   : > { %v2500_v48 = vpop.eup %2499  ;;  %v1494_v49 = vmul.f32 %v2498_v46, %v3103_v20  ;;  %v1509_v50 = vmul.f32 %v3111_v41, %v1493_v34  ;;  %2236 = vmatmul.mubr.bf16.vlgmr.msra.gmra.mrb[16].mxu0 %v1536_v16  ;;  %v1520_v16 = vld [vmem:[#allocation4 + $0x8] sm:$0xff] }
 0x331   : > { %v2502_v2 = vpop.eup %2501  ;;  %v1492_v51 = vmul.f32 %v2500_v48, %v3108_v30  ;;  %v1507_v52 = vmul.f32 %v1491_v29, %v3115_v43  ;;  %v1524_v29 = vld [vmem:[#allocation4 + $0x28] sm:$0xff] }
 0x332   : > { %v2504_v53 = vpop.eup %2503  ;;  %v1453_v54 = vadd.f32 1.0, %v2502_v2  ;;  %v1510_v19 = vmul.f32 %v3120_v23, %v1494_v49 }
 0x333   : > { %v2506_v59 = vpop.eup %2505  ;;  %v1451_v60 = vadd.f32 1.0, %v2504_v53  ;;  %v1508_v24 = vmul.f32 %v1492_v51, %v3125_v31  ;;  %v1527_v53 = vld [vmem:[#allocation4 + $0x40] sm:$0xff] }
 0x334   : > { %v2508_v3 = vpop.eup %2507  ;;  %2517 = vrcp.f32 %v1453_v54  ;;  %v1454_v1 = vadd.f32 1.0, %v2506_v59  ;;  %v1538_v20 = vpack.c.bf16 %v1510_v19, %v1509_v50  ;;  %v1530_v19 = vld [vmem:[#allocation4 + $0x58] sm:$0xff] }
 0x335   : > { %2519 = vrcp.f32 %v1451_v60  ;;  %v1452_v41 = vadd.f32 1.0, %v2508_v3  ;;  %v1537_v5 = vpack.c.bf16 %v1508_v24, %v1507_v52  ;;  %v1529_v52 = vld [vmem:[#allocation4 + $0x50] sm:$0xff]  ;;  %v1528_v24 = vld [vmem:[#allocation4 + $0x48] sm:$0xff] }
 0x336   : > { %v2510_v6 = vpop.eup %2509  ;;  %2521 = vrcp.f32 %v1454_v1 }
 0x337   : > { %v2512_v30 = vpop.eup %2511  ;;  %v1497_v43 = vmul.f32 %v2510_v6, %v3113_v56  ;;  %2523 = vrcp.f32 %v1452_v41  ;;  %2239 = vmatprep.mubr.bf16.mxu0 %v1537_v5  ;;  %v1533_v6 = vld [vmem:[#allocation4 + $0x70] sm:$0xff] }
 0x338   : > { %v2514_v7 = vpop.eup %2513  ;;  %v1495_v23 = vmul.f32 %v2512_v30, %v3118_v37  ;;  %2240 = vmatmul.mubr.bf16.gmra.mrb[20].mxu0 %v1538_v20  ;;  %v1531_v30 = vld [vmem:[#allocation4 + $0x60] sm:$0xff] }
 0x339   : > { %v2516_v10 = vpop.eup %2515  ;;  %v1498_v31 = vmul.f32 %v2514_v7, %v3123_v45  ;;  %v1513_v11 = vmul.f32 %v3131_v57, %v1497_v43  ;;  %v1534_v7 = vld [vmem:[#allocation4 + $0x78] sm:$0xff] }
 0x33a   : > { %v1496_v12 = vmul.f32 %v2516_v10, %v3128_v47  ;;  %v1511_v14 = vmul.f32 %v1495_v23, %v3135_v58 }
 0x33b   : > { %v1514_v8 = vmul.f32 %v3140_v0, %v1498_v31  ;;  %v1532_v31 = vld [vmem:[#allocation4 + $0x68] sm:$0xff] }
 0x33c   : > { %v1512_v17 = vmul.f32 %v1496_v12, %v3145_v63 }
 0x33d   : > { %v1540_v56 = vpack.c.bf16 %v1514_v8, %v1513_v11 }
 0x33e   : > { %v2518_v22 = vpop.eup %2517  ;;  %v1539_v9 = vpack.c.bf16 %v1512_v17, %v1511_v14 }
 0x33f   : > { %v2520_v27 = vpop.eup %2519  ;;  %v1501_v37 = vmul.f32 %v2518_v22, %v3133_v55  ;;  %v1521_v55 = vld [vmem:[#allocation4 + $0x10] sm:$0xff] }
 0x340   : > { %v2522_v32 = vpop.eup %2521  ;;  %v1499_v33 = vmul.f32 %v2520_v27, %v3138_v61  ;;  %2243 = vmatprep.mubr.bf16.mxu1 %v1539_v9  ;;  %v1519_v61 = vld [vmem:[#allocation4] sm:$0xff]  ;;  %v1741_v9 = vld [vmem:[#allocation2 + $0x8] sm:$0xff] (!%p2052_p8) }
 0x341   : > { %v2524_v45 = vpop.eup %2523  ;;  %v1502_v57 = vmul.f32 %v2522_v32, %v3143_v4  ;;  %v1517_v47 = vmul.f32 %v3158_v35, %v1501_v37  ;;  %2244 = vmatmul.mubr.bf16.vlgmr.msra.gmra.mrb[16].mxu1 %v1540_v56  ;;  %v1740_v56 = vld [vmem:[#allocation2] sm:$0xff] (!%p2052_p8)  ;;  %v1742_v32 = vld [vmem:[#allocation2 + $0x10] sm:$0xff] (!%p2052_p8) }
 0x342   : > { %v1500_v58 = vmul.f32 %v2524_v45, %v3149_v62  ;;  %v1515_v0 = vmul.f32 %v1499_v33, %v3161_v40 }
 0x343   : > { %v1518_v63 = vmul.f32 %v3163_v36, %v1502_v57  ;;  %v1525_v36 = vld [vmem:[#allocation4 + $0x30] sm:$0xff] }
 0x344   : > { %v1516_v13 = vmul.f32 %v1500_v58, %v1379_v44 }
 0x345   : > { %v1542_v38 = vpack.c.bf16 %v1518_v63, %v1517_v47  ;;  %v1743_v47 = vld [vmem:[#allocation2 + $0x18] sm:$0xff] (!%p2052_p8) }
 0x346   : > { %v1541_v39 = vpack.c.bf16 %v1516_v13, %v1515_v0  ;;  %v1744_v0 = vld [vmem:[#allocation2 + $0x20] sm:$0xff] (!%p2052_p8) }
 0x348   : > { %2247 = vmatprep.mubr.bf16.mxu1 %v1541_v39 }
 0x349   : > { %2248 = vmatmul.mubr.bf16.gmra.mrb[20].mxu1 %v1542_v38  ;;  %v1745_v38 = vld [vmem:[#allocation2 + $0x28] sm:$0xff] (!%p2052_p8) }
 0x403   : > { %v2237_v15 = vpop.f32.mrb[16].mxu0 }
 0x404   : > { %v1706_v26 = vadd.f32 %v2237_v15, %v1521_v55  ;;  %v1641_v4 = vpop.f32.mrb[17].mxu0  ;;  %v1746_v15 = vld [vmem:[#allocation2 + $0x30] sm:$0xff] (!%p2052_p8) }
 0x405   : > { %v1704_v35 = vadd.f32 %v1641_v4, %v1519_v61  ;;  %v2238_v21 = vpop.f32.mrb[18].mxu0 }
 0x406   : > { %1722 = vst [vmem:[#allocation4 + $0x10] sm:$0xff] %v1706_v26  ;;  %v1707_v62 = vadd.f32 %v2238_v21, %v1522_v18  ;;  %v1644_v42 = vpop.f32.mrb[19].mxu0  ;;  %v1747_v26 = vld [vmem:[#allocation2 + $0x38] sm:$0xff] (!%p2052_p8) }
 0x407   : > { %1720 = vst [vmem:[#allocation4] sm:$0xff] %v1704_v35  ;;  %v1705_v40 = vadd.f32 %v1644_v42, %v1520_v16  ;;  %v1748_v35 = vld [vmem:[#allocation2 + $0x40] sm:$0xff] (!%p2052_p8) }
 0x408   : > { %1723 = vst [vmem:[#allocation4 + $0x18] sm:$0xff] %v1707_v62 }
 0x409   : > { %1721 = vst [vmem:[#allocation4 + $0x8] sm:$0xff] %v1705_v40  ;;  %v1749_v40 = vld [vmem:[#allocation2 + $0x48] sm:$0xff] (!%p2052_p8) }
 0x40b   : > { %v2241_v44 = vpop.f32.mrb[20].mxu0 }
 0x40c   : > { %v1710_v34 = vadd.f32 %v2241_v44, %v1525_v36  ;;  %v1657_v46 = vpop.f32.mrb[21].mxu0 }
 0x40d   : > { %v1708_v48 = vadd.f32 %v1657_v46, %v1523_v28  ;;  %v2242_v49 = vpop.f32.mrb[22].mxu0  ;;  %v1758_v33 = vld [vmem:[#allocation4 + $0x10] sm:$0xff] (!%p2052_p8) }
 0x40e   : > { %1726 = vst [vmem:[#allocation4 + $0x30] sm:$0xff] %v1710_v34  ;;  %v1711_v50 = vadd.f32 %v2242_v49, %v1526_v25  ;;  %v1660_v2 = vpop.f32.mrb[23].mxu0  ;;  %v1756_v22 = vld [vmem:[#allocation4] sm:$0xff] (!%p2052_p8)  ;;  %v1774_v57 = vadd.f32 (!%p2052_p8), %v1758_v33, %v1742_v32  ;;  %v1750_v28 = vld [vmem:[#allocation2 + $0x50] sm:$0xff] (!%p2052_p8)  ;;  %v1751_v34 = vld [vmem:[#allocation2 + $0x58] sm:$0xff] (!%p2052_p8) }
 0x40f   : > { %1724 = vst [vmem:[#allocation4 + $0x20] sm:$0xff] %v1708_v48  ;;  %v1709_v51 = vadd.f32 %v1660_v2, %v1524_v29  ;;  %v1772_v27 = vadd.f32 (!%p2052_p8), %v1756_v22, %v1740_v56  ;;  %v1759_v58 = vld [vmem:[#allocation4 + $0x18] sm:$0xff] (!%p2052_p8)  ;;  %v1752_v49 = vld [vmem:[#allocation2 + $0x60] sm:$0xff] (!%p2052_p8)  ;;  %v1753_v2 = vld [vmem:[#allocation2 + $0x68] sm:$0xff] (!%p2052_p8) }
 0x410   : > { %1727 = vst [vmem:[#allocation4 + $0x38] sm:$0xff] %v1711_v50  ;;  %v1757_v37 = vld [vmem:[#allocation4 + $0x8] sm:$0xff] (!%p2052_p8)  ;;  %v1775_v63 = vadd.f32 (!%p2052_p8), %v1759_v58, %v1743_v47  ;;  %1790 = vst [vmem:[%s2887_s20 + $0x10] sm:$0xff] (!%p2052_p8), %v1774_v57 }
 0x411   : > { %1725 = vst [vmem:[#allocation4 + $0x28] sm:$0xff] %v1709_v51  ;;  %v1773_v45 = vadd.f32 (!%p2052_p8), %v1757_v37, %v1741_v9  ;;  %1788 = vst [vmem:[%s2887_s20] sm:$0xff] (!%p2052_p8), %v1772_v27 }
 0x412   : > { %1791 = vst [vmem:[%s2887_s20 + $0x18] sm:$0xff] (!%p2052_p8), %v1775_v63 }
 0x413   : > { %1789 = vst [vmem:[%s2887_s20 + $0x8] sm:$0xff] (!%p2052_p8), %v1773_v45 }
 0x414   : > { %v2245_v54 = vpop.f32.mrb[16].mxu1 }
 0x415   : > { %v1714_v59 = vadd.f32 %v2245_v54, %v1529_v52  ;;  %v1673_v60 = vpop.f32.mrb[17].mxu1  ;;  %v1762_v18 = vld [vmem:[#allocation4 + $0x30] sm:$0xff] (!%p2052_p8) }
 0x416   : > { %v1712_v3 = vadd.f32 %v1673_v60, %v1527_v53  ;;  %v2246_v1 = vpop.f32.mrb[18].mxu1  ;;  %v1760_v13 = vld [vmem:[#allocation4 + $0x20] sm:$0xff] (!%p2052_p8)  ;;  %v1778_v4 = vadd.f32 (!%p2052_p8), %v1762_v18, %v1746_v15  ;;  %v1754_v53 = vld [vmem:[#allocation2 + $0x70] sm:$0xff] (!%p2052_p8)  ;;  %v1755_v60 = vld [vmem:[#allocation2 + $0x78] sm:$0xff] (!%p2052_p8) }
 0x417   : > { %1730 = vst [vmem:[#allocation4 + $0x50] sm:$0xff] %v1714_v59  ;;  %v1715_v20 = vadd.f32 %v2246_v1, %v1530_v19  ;;  %v1676_v41 = vpop.f32.mrb[19].mxu1  ;;  %v1776_v55 = vadd.f32 (!%p2052_p8), %v1760_v13, %v1744_v0  ;;  %v1763_v16 = vld [vmem:[#allocation4 + $0x38] sm:$0xff] (!%p2052_p8) }
 0x418   : > { %1728 = vst [vmem:[#allocation4 + $0x40] sm:$0xff] %v1712_v3  ;;  %v1713_v5 = vadd.f32 %v1676_v41, %v1528_v24  ;;  %v1761_v39 = vld [vmem:[#allocation4 + $0x28] sm:$0xff] (!%p2052_p8)  ;;  %v1779_v62 = vadd.f32 (!%p2052_p8), %v1763_v16, %v1747_v26  ;;  %1794 = vst [vmem:[%s2887_s20 + $0x30] sm:$0xff] (!%p2052_p8), %v1778_v4 }
 0x419   : > { %1731 = vst [vmem:[#allocation4 + $0x58] sm:$0xff] %v1715_v20  ;;  %v1777_v61 = vadd.f32 (!%p2052_p8), %v1761_v39, %v1745_v38  ;;  %1792 = vst [vmem:[%s2887_s20 + $0x20] sm:$0xff] (!%p2052_p8), %v1776_v55 }
 0x41a   : > { %1729 = vst [vmem:[#allocation4 + $0x48] sm:$0xff] %v1713_v5  ;;  %1795 = vst [vmem:[%s2887_s20 + $0x38] sm:$0xff] (!%p2052_p8), %v1779_v62 }
 0x41b   : > { %1793 = vst [vmem:[%s2887_s20 + $0x28] sm:$0xff] (!%p2052_p8), %v1777_v61 }
 0x41c   : > { %v2249_v43 = vpop.f32.mrb[20].mxu1  ;;  %1739 = sbr.rel (%p2052_p8) target bundleno = 1069 (0x42d), region = 138 }
 0x41d   : > { %v1718_v23 = vadd.f32 %v2249_v43, %v1533_v6  ;;  %v1689_v10 = vpop.f32.mrb[21].mxu1 }
 0x41e   : > { %v1716_v11 = vadd.f32 %v1689_v10, %v1531_v30  ;;  %v2250_v12 = vpop.f32.mrb[22].mxu1  ;;  %v1766_v25 = vld [vmem:[#allocation4 + $0x50] sm:$0xff] (!%p2052_p8) }
 0x41f   : > { %1734 = vst [vmem:[#allocation4 + $0x70] sm:$0xff] %v1718_v23  ;;  %v1719_v14 = vadd.f32 %v2250_v12, %v1534_v7  ;;  %v1692_v8 = vpop.f32.mrb[23].mxu1  ;;  %v1764_v21 = vld [vmem:[#allocation4 + $0x40] sm:$0xff] (!%p2052_p8)  ;;  %v1782_v29 = vadd.f32 (!%p2052_p8), %v1766_v25, %v1750_v28 }
 0x420   : > { %1732 = vst [vmem:[#allocation4 + $0x60] sm:$0xff] %v1716_v11  ;;  %v1717_v17 = vadd.f32 %v1692_v8, %v1532_v31  ;;  %v1780_v42 = vadd.f32 (!%p2052_p8), %v1764_v21, %v1748_v35  ;;  %v1767_v46 = vld [vmem:[#allocation4 + $0x58] sm:$0xff] (!%p2052_p8) }
 0x421   : > { %1735 = vst [vmem:[#allocation4 + $0x78] sm:$0xff] %v1719_v14  ;;  %v1765_v36 = vld [vmem:[#allocation4 + $0x48] sm:$0xff] (!%p2052_p8)  ;;  %v1783_v48 = vadd.f32 (!%p2052_p8), %v1767_v46, %v1751_v34  ;;  %1798 = vst [vmem:[%s2887_s20 + $0x50] sm:$0xff] (!%p2052_p8), %v1782_v29 }
 0x422   : > { %1733 = vst [vmem:[#allocation4 + $0x68] sm:$0xff] %v1717_v17  ;;  %v1781_v44 = vadd.f32 (!%p2052_p8), %v1765_v36, %v1749_v40  ;;  %1796 = vst [vmem:[%s2887_s20 + $0x40] sm:$0xff] (!%p2052_p8), %v1780_v42 }
 0x423   : > { %1799 = vst [vmem:[%s2887_s20 + $0x58] sm:$0xff] %v1783_v48 }
 0x424   : > { %1797 = vst [vmem:[%s2887_s20 + $0x48] sm:$0xff] %v1781_v44 }
 0x426   : > { %v1770_v54 = vld [vmem:[#allocation4 + $0x70] sm:$0xff] }
 0x427   : > { %v1768_v50 = vld [vmem:[#allocation4 + $0x60] sm:$0xff]  ;;  %v1786_v59 = vadd.f32 %v1770_v54, %v1754_v53 }
 0x428   : > { %v1784_v51 = vadd.f32 %v1768_v50, %v1752_v49  ;;  %v1771_v24 = vld [vmem:[#allocation4 + $0x78] sm:$0xff] }
 0x429   : > { %v1769_v52 = vld [vmem:[#allocation4 + $0x68] sm:$0xff]  ;;  %v1787_v3 = vadd.f32 %v1771_v24, %v1755_v60  ;;  %1802 = vst [vmem:[%s2887_s20 + $0x70] sm:$0xff] %v1786_v59 }
 0x42a   : > { %v1785_v19 = vadd.f32 %v1769_v52, %v1753_v2  ;;  %1800 = vst [vmem:[%s2887_s20 + $0x60] sm:$0xff] %v1784_v51 }
 0x42b   : > { %1803 = vst [vmem:[%s2887_s20 + $0x78] sm:$0xff] %v1787_v3 }
 0x42c   : > { %1801 = vst [vmem:[%s2887_s20 + $0x68] sm:$0xff] %v1785_v19 }
 0x42d PF: > { %s2055_s29 = sshll.u32 %s2635_s8, 5  ;;  %s1820_s18 = sshll.u32 %s2887_s20, 4  ;;  %s3208_s18 = int_to_ptr.vmem [resolvable:$true] %s1820_s18 }
 0x42e   : > { %s1817_s22 = sadd.s32 %s2055_s29, %s2861_s13  ;;  %s3317_s16 = sld [smem:[#allocation22_spill]] }
 0x42f   : > { %s2056_s5 = sshll.u32 %s1817_s22, 7  ;;  %s3318_s17 = sand.u32 1, %s2611_s25  }
 0x430   : > { %s3217_s14 = scalar_lea.sflag [#allocation8], %s3318_s17  ;;  %s2525_s27 = scalar_lea.vmem %s3208_s18, 2048 }
 0x431   : > { %p2526_p10 = scmp.ne.s32.totalorder %s3208_s18, %s2525_s27  ;;  %s2654_s8 = smov [#allocation7]  }
 0x432   : > { %s2529_s13 = sshll.u32 %s2654_s8, 4  ;;  %s2530_s13 = int_to_ptr.vmem [resolvable:$false] %s2529_s13 }
 0x433   : > { %p2527_p11 = pnand %p2526_p10, %p2787_p9  ;;  %s2531_s20 = scalar_lea.vmem %s2530_s13, 4096 }
 0x434   : > { %s3213_s4 = scalar_lea.hbm %s3317_s16, %s2056_s5  ;;  %p2532_p0 = scmp.lt.s32.totalorder %s3208_s18, %s2530_s13 }
 0x435   : > { %p2528_p12 = pneg %p2527_p11  ;;  %p2533_p1 = scmp.lt.s32.totalorder %s2531_s20, %s2525_s27 }
 0x437   : > { %p2534_p2 = por %p2533_p1, %p2532_p0 }
 0x439   : > { %p2535_p3 = pnand %p2534_p2, %p2528_p12 }
 0x43b   : > { %2538 = shalt.err (!%p2535_p3)
}
 0x43c   : > { %s2539_s30 = scalar_lea.hbm %s3213_s4, 2048  ;;  %s2543_s10 = scalar_lea.hbm %s3317_s16, 8192 }
 0x43d   : > { %p2540_p4 = scmp.ne.s32.totalorder %s3213_s4, %s2539_s30  ;;  %p2544_p7 = scmp.lt.u32.totalorder %s3213_s4, %s3317_s16 }
 0x43e   : > { %p2545_p8 = scmp.lt.u32.totalorder %s2543_s10, %s2539_s30  ;;  %p2547_p11 = scmp.lt.u32.totalorder %s2539_s30, %s3213_s4 }
 0x43f   : > { %p2541_p5 = pnand %p2540_p4, %p2787_p9 }
 0x440   : > { %p2546_p10 = por %p2545_p8, %p2544_p7 }
 0x441   : > { %p2542_p6 = pneg %p2541_p5 }
 0x442   : > { %p2548_p12 = por %p2547_p11, %p2546_p10 }
 0x444   : > { %p2549_p0 = pnand %p2548_p12, %p2542_p6 }
 0x446   : > { %2552 = shalt.err (!%p2549_p0)
}
 0x447   : > { %s2655_s15 = smov 128   ;;  %s2656_s29 = smov 8  }
 0x448   : > { %2283 = dma.vmem_to_hbm [thread:$0]  (%p2787_p9), %s3208_s18, 2048, %s3213_s4, %s3217_s14, %s2655_s15, %s2655_s15, %s2656_s29  }
 0x449 PF: > { %p2289_p1 = scmp.ge.s32.totalorder %s2651_s12, 2  ;;  %s1835_s22 = sand.u32 1, %s2607_s24  }
 0x44a   : > { %s1836_s5 = scalar_lea.sflag [#allocation8], %s1835_s22 }
 0x44b   : > { %p2286_p2 = pnand %p2289_p1, %p2796_p13 }
 0x44d   : > { %2602 = dma.done.wait (!%p2286_p2), %s1836_s5, 2048  }
 0x44e   : > { %2604 = vsyncadd (!%p2286_p2), %s1836_s5, 4294965248  ;;  %s20_s12 = sadd.s32 1, %s2651_s12   ;;  %s3319_s26 = sld [smem:[#allocation10_spill]] }
 0x44f   : > { %p17_p3 = scmp.ge.s32.totalorder %s20_s12, 10   ;;  %s3320_s28 = sld [smem:[#allocation19_spill]] }
 0x450   : > { %s3321_s27 = sld [smem:[#allocation11_spill]]  ;;  %s3322_s23 = sld [smem:[#allocation17_spill]] }
 0x451   : > { %s3323_s29 = sld [smem:[#allocation12_spill]]  ;;  %s3324_s30 = sld [smem:[#allocation13_spill]] }
 0x452   : > { %s3325_s8 = sld [smem:[#allocation14_spill]]  ;;  %s3326_s9 = sld [smem:[#allocation15_spill]] }
 0x453   : > { %s3327_s10 = sld [smem:[#allocation16_spill]]  ;;  %s3328_s11 = sld [smem:[#allocation18_spill]] }
 0x454   : > { %s3329_s24 = smov %s2611_s25  ;;  %s3330_s25 = smov %s3319_s26 }
 0x455   : > { %s3331_s26 = smov %s3320_s28  ;;  %19 = sbr.rel (!%p17_p3) target bundleno = 11 (0xb), region = 195 }
 0x456   : > { %s3332_s28 = smov %s3322_s23 }
 0x45c   :  { %1841 = vsyncpa [#allocation8], 1 }
 0x45d   :  { %1843 = vsyncpa [#allocation8 + $0x1], 1 }

</bundles_post_ra>
